<compile_context>
chip_gen: v7x
topology: tpu7x:2x2x1
jax: 0.10.0
libtpu: 0.0.40
codegen_flags: <defaults>
</compile_context>

<pallas_src>
import jax
import jax.numpy as jnp
from jax import lax
from jax.experimental import pallas as pl
from jax.experimental.pallas import tpu as pltpu


# ----------------------- bidirectional GRU layer kernel ----------------------
def _bigru_layer_kernel(gi_ref, whh_ref, bhn_ref, out_ref, hn_ref, h_scr):
    """Sequential part of one GRU direction over the full sequence.

    grid axis 0 = direction (0: forward, 1: backward).  Everything the loop
    touches is VMEM resident:
      gi_ref : (3, T, B, H)  precomputed x-side gate pre-activations
                             (b_ih and b_hr/b_hz already folded in)
      whh_ref: (3, H, H)     per-gate hidden weights, bf16, pre-transposed
      bhn_ref: (1, 1, H)     b_hn (must stay inside the r-gated term)
      out_ref: (1, T, B, H)  per-step hidden states of this direction
      hn_ref : (1, B, H)     final hidden state of this direction
    """
    d = pl.program_id(0)
    T = out_ref.shape[1]

    # Resident weights, hoisted out of the loop.
    w_r = whh_ref[0]
    w_z = whh_ref[1]
    w_n = whh_ref[2]
    b_hn = bhn_ref[0]                                    # (1, H) f32

    h_scr[...] = jnp.zeros_like(h_scr)

    def step(t, carry):
        # Forward walks 0..T-1, backward walks T-1..0 (no reversed HBM copy).
        tt = jnp.where(d == 0, t, T - 1 - t)
        h = h_scr[...]                                   # (B, H) f32
        hb = h.astype(w_r.dtype)                         # bf16 MXU operand
        gh_r = jnp.dot(hb, w_r, preferred_element_type=jnp.float32)
        gh_z = jnp.dot(hb, w_z, preferred_element_type=jnp.float32)
        gh_n = jnp.dot(hb, w_n, preferred_element_type=jnp.float32) + b_hn
        r = jax.nn.sigmoid(gi_ref[0, tt] + gh_r)
        z = jax.nn.sigmoid(gi_ref[1, tt] + gh_z)
        n = jnp.tanh(gi_ref[2, tt] + r * gh_n)
        h_new = (1.0 - z) * n + z * h
        h_scr[...] = h_new
        out_ref[0, tt] = h_new
        return carry

    lax.fori_loop(0, T, step, 0, unroll=True)
    hn_ref[0] = h_scr[...]


def _gru_layer_recurrence(gi, whh, bhn, T, B, H):
    """gi: (6,T,B,H) f32 [dir-major, gate-major]; whh: (6,H,H) bf16; bhn: (2,1,H)."""
    out, hn = pl.pallas_call(
        _bigru_layer_kernel,
        out_shape=(jax.ShapeDtypeStruct((2, T, B, H), jnp.float32),
                   jax.ShapeDtypeStruct((2, B, H), jnp.float32)),
        grid_spec=pltpu.PrefetchScalarGridSpec(
            num_scalar_prefetch=0,
            grid=(2,),                                   # direction axis
            in_specs=[
                pl.BlockSpec((3, T, B, H), lambda d: (d, 0, 0, 0)),
                pl.BlockSpec((3, H, H), lambda d: (d, 0, 0)),
                pl.BlockSpec((1, 1, H), lambda d: (d, 0, 0)),
            ],
            out_specs=[
                pl.BlockSpec((1, T, B, H), lambda d: (d, 0, 0, 0)),
                pl.BlockSpec((1, B, H), lambda d: (d, 0, 0)),
            ],
            scratch_shapes=[pltpu.VMEM((B, H), jnp.float32)],
        ),
        compiler_params=pltpu.CompilerParams(
            dimension_semantics=("parallel",)),          # 2 TCs on v7x
    )(gi, whh, bhn)
    return out, hn


# ----------------------- input projection (hoisted, one big matmul) ----------
def _precompute_gi(x_tm, w_ih, b_ih, b_hh, H, extra=None, w_extra=None):
    """Input-side gate pre-activations for a whole sequence (one direction).

    x_tm: (T, B, D) f32; w_ih: (3H, D); b_ih/b_hh: (3H,)
    Returns (3, T, B, H) f32:  gi[g] = x @ W_g^T + b_ih[g] (+ b_hh[g] for
    g in {r, z}); b_hn stays inside the kernel's r-gated term.  `extra` is an
    optional (T, B, 1) scalar feature handled as a rank-1 update (keeps the
    main contraction dim lane-aligned instead of D = 4H+1 = 129).
    """
    w3 = w_ih.reshape(3, H, -1).astype(jnp.bfloat16)
    gi = jnp.einsum("tbd,ghd->gtbh", x_tm.astype(jnp.bfloat16), w3,
                    preferred_element_type=jnp.float32)
    bi = b_ih.reshape(3, H).astype(jnp.float32)
    bh = b_hh.reshape(3, H).astype(jnp.float32)
    gate_bias = jnp.stack([bi[0] + bh[0], bi[1] + bh[1], bi[2]])   # (3, H)
    gi = gi + gate_bias[:, None, None, :]
    if extra is not None:
        wx = w_extra.reshape(3, H).astype(jnp.float32)
        gi = gi + extra[None] * wx[:, None, None, :]
    return gi


def bigru(x_bf, layer_params, hid_dim, extra_bf=None):
    """Bidirectional multi-layer GRU (batch_first), matching nn.GRU semantics.

    x_bf     : (B, T, D) f32
    extra_bf : optional (B, T) scalar feature corresponding to the LAST input
               column of layer 0 (the tf_idf column of rnn2).
    returns  : outputs (B, T, 2H), h_n (n_layers*2, B, H)
    """
    B, T, _ = x_bf.shape
    H = hid_dim
    inp = jnp.transpose(x_bf, (1, 0, 2))                 # time-major (T, B, D)
    extra_tm = None
    if extra_bf is not None:
        extra_tm = jnp.transpose(extra_bf, (1, 0))[..., None]   # (T, B, 1)

    hiddens = []
    for li, p in enumerate(layer_params):
        ex = extra_tm if (li == 0 and extra_tm is not None) else None
        gi_d, whh_d, bhn_d = [], [], []
        for direc in ("f", "b"):
            w_ih = p[f"w_ih_{direc}"]
            w_hh = p[f"w_hh_{direc}"]
            b_ih = p[f"b_ih_{direc}"]
            b_hh = p[f"b_hh_{direc}"]
            if ex is not None:
                w_main, w_x = w_ih[:, :-1], w_ih[:, -1]
            else:
                w_main, w_x = w_ih, None
            gi_d.append(_precompute_gi(inp, w_main, b_ih, b_hh, H, ex, w_x))
            whh_d.append(jnp.transpose(w_hh.reshape(3, H, H), (0, 2, 1))
                         .astype(jnp.bfloat16))
            bhn_d.append(b_hh[2 * H:].reshape(1, H).astype(jnp.float32))
        gi = jnp.stack(gi_d).reshape(6, T, B, H)          # dir-major, gate-major
        whh = jnp.stack(whh_d).reshape(6, H, H)
        bhn = jnp.stack(bhn_d)                            # (2, 1, H)

        out2, hn2 = _gru_layer_recurrence(gi, whh, bhn, T, B, H)
        hiddens.append(hn2[0])                            # forward final (B, H)
        hiddens.append(hn2[1])                            # backward final (B, H)
        # inter-layer dropout is identity at inference
        inp = jnp.concatenate([out2[0], out2[1]], axis=-1)   # (T, B, 2H)

    outputs = jnp.transpose(inp, (1, 0, 2))               # (B, T, 2H)
    hidden = jnp.stack(hiddens, axis=0)                   # (n_layers*2, B, H)
    return outputs, hidden


# ------------------------- self-attention kernel ----------------------------
def _self_attn_kernel(x_ref, o_ref):
    x = x_ref[0]                                          # (T, D) f32
    xb = x.astype(jnp.bfloat16)
    # scores = x @ x^T via dot_general contracting the feature dim of both
    # operands (no explicit transpose / XLU vxpose).
    s = lax.dot_general(xb, xb, (((1,), (1,)), ((), ())),
                        preferred_element_type=jnp.float32)       # (T, T)
    s = s - jnp.max(s, axis=-1, keepdims=True)
    p = jnp.exp(s)
    p = p * pl.reciprocal(jnp.sum(p, axis=-1, keepdims=True), approx=True)
    o_ref[0] = jnp.dot(p.astype(jnp.bfloat16), xb,
                       preferred_element_type=jnp.float32)


def self_attention(x):
    # TODO(synk): flash-style tiling over the query dim for large T (VMEM on v7x).
    B, T, D = x.shape
    return pl.pallas_call(
        _self_attn_kernel,
        out_shape=jax.ShapeDtypeStruct((B, T, D), jnp.float32),
        grid_spec=pltpu.PrefetchScalarGridSpec(
            num_scalar_prefetch=0,
            grid=(B,),
            in_specs=[pl.BlockSpec((1, T, D), lambda b: (b, 0, 0))],
            out_specs=pl.BlockSpec((1, T, D), lambda b: (b, 0, 0)),
        ),
        compiler_params=pltpu.CompilerParams(dimension_semantics=("parallel",)),
    )(x)


# ------------------------------ parameters ----------------------------------
def init_gru_params(key, input_dim, hid_dim, n_layers):
    layers = []
    bound = hid_dim ** -0.5
    d = input_dim
    for _ in range(n_layers):
        p = {}
        for direc in ("f", "b"):
            key, k1, k2, k3, k4 = jax.random.split(key, 5)
            p[f"w_ih_{direc}"] = jax.random.uniform(k1, (3 * hid_dim, d),
                                                    jnp.float32, -bound, bound)
            p[f"w_hh_{direc}"] = jax.random.uniform(k2, (3 * hid_dim, hid_dim),
                                                    jnp.float32, -bound, bound)
            p[f"b_ih_{direc}"] = jax.random.uniform(k3, (3 * hid_dim,),
                                                    jnp.float32, -bound, bound)
            p[f"b_hh_{direc}"] = jax.random.uniform(k4, (3 * hid_dim,),
                                                    jnp.float32, -bound, bound)
        layers.append(p)
        d = 2 * hid_dim
    return layers, key


def init_encoder_params(key, vocab, emb_dim, hid_dim, n_layers):
    key, k_emb = jax.random.split(key)
    params = {"embedding": jax.random.normal(k_emb, (vocab, emb_dim), jnp.float32)}
    params["rnn1"], key = init_gru_params(key, emb_dim, hid_dim, n_layers)
    params["rnn2"], key = init_gru_params(key, 4 * hid_dim + 1, hid_dim, n_layers)
    return params


# ------------------------------- forward ------------------------------------
def encoder_forward(params, src, tf_idf, hid_dim):
    # embedding lookup (gather) kept as plain-JAX glue
    embedded = jnp.take(params["embedding"], src, axis=0)          # (B, T, E)
    # dropout: identity (inference)
    outputs, _ = bigru(embedded, params["rnn1"], hid_dim)          # (B, T, 2H)
    atten = self_attention(outputs)                                # (B, T, 2H)
    # rnn2 input = [outputs, atten, tf_idf]; the tf_idf column is folded as a
    # rank-1 update inside the gi precompute so the contraction dim stays 4H=128.
    x_main = jnp.concatenate([outputs, atten], axis=-1)            # (B, T, 4H)
    _, hidden = bigru(x_main, params["rnn2"], hid_dim, extra_bf=tf_idf)
    # dropout on hidden: identity (inference)
    return hidden


# --------------------------------- main --------------------------------------
if __name__ == "__main__":
    VOCAB, EMB_DIM, HID_DIM, N_LAYERS = 50, 16, 32, 2
    B, T = 2, 8

    key = jax.random.PRNGKey(0)
    key, k_src, k_tf = jax.random.split(key, 3)
    src = jax.random.randint(k_src, (B, T), 0, VOCAB, dtype=jnp.int32)
    tf_idf = jax.random.uniform(k_tf, (B, T), jnp.float32)

    params = init_encoder_params(jax.random.PRNGKey(0), VOCAB, EMB_DIM,
                                 HID_DIM, N_LAYERS)

    fwd = jax.jit(lambda p, s, t: encoder_forward(p, s, t, HID_DIM))
    hidden = jax.block_until_ready(fwd(params, src, tf_idf))

    assert hidden.shape == (N_LAYERS * 2, B, HID_DIM), hidden.shape
    assert bool(jnp.all(jnp.isfinite(hidden)))
    print("KERNEL_OK")
</pallas_src>

<mosaic_0001>
module attributes {stable_mosaic.version = 11 : i64} {
  func.func @_self_attn_kernel(%arg0: i32, %arg1: memref<1x8x64xf32, #tpu.memory_space<vmem>>, %arg2: memref<1x8x64xf32, #tpu.memory_space<vmem>>) attributes {dimension_semantics = [#tpu.dimension_semantics<parallel>], iteration_bounds = array<i64: 2>, scalar_prefetch = 0 : i64, scratch_operands = 0 : i64, tpu.core_type = #tpu.core_type<tc>, window_params = [{transform_indices = @transform_0, window_bounds = array<i64: 1, 8, 64>}, {transform_indices = @transform_1, window_bounds = array<i64: 1, 8, 64>}]} {
    %c0 = arith.constant 0 : index
    %c0_0 = arith.constant 0 : index
    %c0_1 = arith.constant 0 : index
    %0 = vector.load %arg1[%c0, %c0_0, %c0_1] : memref<1x8x64xf32, #tpu.memory_space<vmem>>, vector<1x8x64xf32>
    %1 = vector.shape_cast %0 : vector<1x8x64xf32> to vector<8x64xf32>
    %2 = arith.truncf %1 : vector<8x64xf32> to vector<8x64xbf16>
    %cst = arith.constant dense<0.000000e+00> : vector<8x8xf32>
    %3 = tpu.matmul %2, %2, %cst {dimension_numbers = #tpu.dot_dimension_numbers<[1], [1], [0], [0], [0, 0, 1, 0], [], []>} : vector<8x64xbf16>, vector<8x64xbf16>, vector<8x8xf32> -> vector<8x8xf32>
    %cst_2 = arith.constant dense<0xFF800000> : vector<8xf32>
    %4 = vector.multi_reduction <maximumf>, %3, %cst_2 [1] : vector<8x8xf32> to vector<8xf32>
    %5 = vector.shape_cast %4 : vector<8xf32> to vector<8x1xf32>
    %6 = vector.broadcast %5 : vector<8x1xf32> to vector<8x8xf32>
    %7 = arith.subf %3, %6 : vector<8x8xf32>
    %8 = math.exp %7 : vector<8x8xf32>
    %cst_3 = arith.constant dense<0.000000e+00> : vector<8xf32>
    %9 = vector.multi_reduction <add>, %8, %cst_3 [1] : vector<8x8xf32> to vector<8xf32>
    %10 = vector.shape_cast %9 : vector<8xf32> to vector<8x1xf32>
    %11 = tpu.reciprocal %10 {approx = true} : vector<8x1xf32> -> vector<8x1xf32>
    %12 = vector.broadcast %11 : vector<8x1xf32> to vector<8x8xf32>
    %13 = arith.mulf %8, %12 : vector<8x8xf32>
    %14 = arith.truncf %13 : vector<8x8xf32> to vector<8x8xbf16>
    %cst_4 = arith.constant dense<0.000000e+00> : vector<8x64xf32>
    %15 = tpu.matmul %14, %2, %cst_4 {dimension_numbers = #tpu.dot_dimension_numbers<[1], [0], [0], [1], [0, 0, 1, 1], [], []>} : vector<8x8xbf16>, vector<8x64xbf16>, vector<8x64xf32> -> vector<8x64xf32>
    %c0_5 = arith.constant 0 : index
    %c0_6 = arith.constant 0 : index
    %c0_7 = arith.constant 0 : index
    %16 = vector.load %arg2[%c0_5, %c0_6, %c0_7] : memref<1x8x64xf32, #tpu.memory_space<vmem>>, vector<1x8x64xf32>
    %17 = vector.shape_cast %16 : vector<1x8x64xf32> to vector<8x64xf32>
    %18 = vector.shape_cast %15 : vector<8x64xf32> to vector<1x8x64xf32>
    tpu.vector_store %arg2[%c0_5, %c0_6, %c0_7], %18 {strides = array<i32>} : memref<1x8x64xf32, #tpu.memory_space<vmem>>, vector<1x8x64xf32>,
    return
  }
  func.func @transform_0(%arg0: i32) -> (i32, i32, i32) {
    %c0_i32 = arith.constant 0 : i32
    %c0_i32_0 = arith.constant 0 : i32
    %c0_i32_1 = arith.constant 0 : i32
    return %arg0, %c0_i32, %c0_i32_0 : i32, i32, i32
  }
  func.func @transform_1(%arg0: i32) -> (i32, i32, i32) {
    %c0_i32 = arith.constant 0 : i32
    %c0_i32_0 = arith.constant 0 : i32
    %c0_i32_1 = arith.constant 0 : i32
    return %arg0, %c0_i32, %c0_i32_0 : i32, i32, i32
  }
}

module attributes {stable_mosaic.version = 11 : i64} {
  func.func @_bigru_layer_kernel(%arg0: i32, %arg1: memref<3x8x2x32xf32, #tpu.memory_space<vmem>>, %arg2: memref<3x32x32xbf16, #tpu.memory_space<vmem>>, %arg3: memref<1x1x32xf32, #tpu.memory_space<vmem>>, %arg4: memref<1x8x2x32xf32, #tpu.memory_space<vmem>>, %arg5: memref<1x2x32xf32, #tpu.memory_space<vmem>>, %arg6: memref<2x32xf32, #tpu.memory_space<vmem>>) attributes {dimension_semantics = [#tpu.dimension_semantics<parallel>], iteration_bounds = array<i64: 2>, scalar_prefetch = 0 : i64, scratch_operands = 1 : i64, tpu.core_type = #tpu.core_type<tc>, window_params = [{transform_indices = @transform_0, window_bounds = array<i64: 3, 8, 2, 32>}, {transform_indices = @transform_1, window_bounds = array<i64: 3, 32, 32>}, {transform_indices = @transform_2, window_bounds = array<i64: 1, 1, 32>}, {transform_indices = @transform_3, window_bounds = array<i64: 1, 8, 2, 32>}, {transform_indices = @transform_4, window_bounds = array<i64: 1, 2, 32>}]} {
    %c0 = arith.constant 0 : index
    %c0_0 = arith.constant 0 : index
    %c0_1 = arith.constant 0 : index
    %0 = vector.load %arg2[%c0, %c0_0, %c0_1] : memref<3x32x32xbf16, #tpu.memory_space<vmem>>, vector<1x32x32xbf16>
    %1 = vector.shape_cast %0 : vector<1x32x32xbf16> to vector<32x32xbf16>
    %c1 = arith.constant 1 : index
    %c0_2 = arith.constant 0 : index
    %c0_3 = arith.constant 0 : index
    %2 = vector.load %arg2[%c1, %c0_2, %c0_3] : memref<3x32x32xbf16, #tpu.memory_space<vmem>>, vector<1x32x32xbf16>
    %3 = vector.shape_cast %2 : vector<1x32x32xbf16> to vector<32x32xbf16>
    %c2 = arith.constant 2 : index
    %c0_4 = arith.constant 0 : index
    %c0_5 = arith.constant 0 : index
    %4 = vector.load %arg2[%c2, %c0_4, %c0_5] : memref<3x32x32xbf16, #tpu.memory_space<vmem>>, vector<1x32x32xbf16>
    %5 = vector.shape_cast %4 : vector<1x32x32xbf16> to vector<32x32xbf16>
    %c0_6 = arith.constant 0 : index
    %c0_7 = arith.constant 0 : index
    %c0_8 = arith.constant 0 : index
    %6 = vector.load %arg3[%c0_6, %c0_7, %c0_8] : memref<1x1x32xf32, #tpu.memory_space<vmem>>, vector<1x1x32xf32>
    %7 = vector.shape_cast %6 : vector<1x1x32xf32> to vector<1x32xf32>
    %cst = arith.constant 0.000000e+00 : f32
    %8 = vector.broadcast %cst : f32 to vector<2x32xf32>
    %c0_9 = arith.constant 0 : index
    %c0_10 = arith.constant 0 : index
    %9 = vector.load %arg6[%c0_9, %c0_10] : memref<2x32xf32, #tpu.memory_space<vmem>>, vector<2x32xf32>
    tpu.vector_store %arg6[%c0_9, %c0_10], %8 {strides = array<i32>} : memref<2x32xf32, #tpu.memory_space<vmem>>, vector<2x32xf32>,
    %c0_i32 = arith.constant 0 : i32
    %c0_i32_11 = arith.constant 0 : i32
    %10 = arith.cmpi eq, %arg0, %c0_i32_11 : i32
    %c7_i32 = arith.constant 7 : i32
    %11 = arith.subi %c7_i32, %c0_i32 : i32
    %12 = arith.select %10, %c0_i32, %11 : i32
    %c0_12 = arith.constant 0 : index
    %c0_13 = arith.constant 0 : index
    %13 = vector.load %arg6[%c0_12, %c0_13] : memref<2x32xf32, #tpu.memory_space<vmem>>, vector<2x32xf32>
    %14 = arith.truncf %13 : vector<2x32xf32> to vector<2x32xbf16>
    %cst_14 = arith.constant dense<0.000000e+00> : vector<2x32xf32>
    %15 = tpu.matmul %14, %1, %cst_14 {dimension_numbers = #tpu.dot_dimension_numbers<[1], [0], [0], [1], [0, 0, 1, 1], [], []>} : vector<2x32xbf16>, vector<32x32xbf16>, vector<2x32xf32> -> vector<2x32xf32>
    %cst_15 = arith.constant dense<0.000000e+00> : vector<2x32xf32>
    %16 = tpu.matmul %14, %3, %cst_15 {dimension_numbers = #tpu.dot_dimension_numbers<[1], [0], [0], [1], [0, 0, 1, 1], [], []>} : vector<2x32xbf16>, vector<32x32xbf16>, vector<2x32xf32> -> vector<2x32xf32>
    %cst_16 = arith.constant dense<0.000000e+00> : vector<2x32xf32>
    %17 = tpu.matmul %14, %5, %cst_16 {dimension_numbers = #tpu.dot_dimension_numbers<[1], [0], [0], [1], [0, 0, 1, 1], [], []>} : vector<2x32xbf16>, vector<32x32xbf16>, vector<2x32xf32> -> vector<2x32xf32>
    %18 = vector.broadcast %7 : vector<1x32xf32> to vector<2x32xf32>
    %19 = arith.addf %17, %18 : vector<2x32xf32>
    %c0_17 = arith.constant 0 : index
    %20 = arith.index_cast %12 : i32 to index
    %c0_18 = arith.constant 0 : index
    %c0_19 = arith.constant 0 : index
    %21 = vector.load %arg1[%c0_17, %20, %c0_18, %c0_19] : memref<3x8x2x32xf32, #tpu.memory_space<vmem>>, vector<1x1x2x32xf32>
    %22 = vector.shape_cast %21 : vector<1x1x2x32xf32> to vector<2x32xf32>
    %23 = arith.addf %22, %15 : vector<2x32xf32>
    %24 = arith.negf %23 : vector<2x32xf32>
    %25 = math.exp %24 : vector<2x32xf32>
    %cst_20 = arith.constant 1.000000e+00 : f32
    %26 = vector.broadcast %cst_20 : f32 to vector<2x32xf32>
    %27 = arith.addf %26, %25 : vector<2x32xf32>
    %28 = arith.divf %26, %27 : vector<2x32xf32>
    %c1_21 = arith.constant 1 : index
    %29 = arith.index_cast %12 : i32 to index
    %c0_22 = arith.constant 0 : index
    %c0_23 = arith.constant 0 : index
    %30 = vector.load %arg1[%c1_21, %29, %c0_22, %c0_23] : memref<3x8x2x32xf32, #tpu.memory_space<vmem>>, vector<1x1x2x32xf32>
    %31 = vector.shape_cast %30 : vector<1x1x2x32xf32> to vector<2x32xf32>
    %32 = arith.addf %31, %16 : vector<2x32xf32>
    %33 = arith.negf %32 : vector<2x32xf32>
    %34 = math.exp %33 : vector<2x32xf32>
    %cst_24 = arith.constant 1.000000e+00 : f32
    %35 = vector.broadcast %cst_24 : f32 to vector<2x32xf32>
    %36 = arith.addf %35, %34 : vector<2x32xf32>
    %37 = arith.divf %35, %36 : vector<2x32xf32>
    %c2_25 = arith.constant 2 : index
    %38 = arith.index_cast %12 : i32 to index
    %c0_26 = arith.constant 0 : index
    %c0_27 = arith.constant 0 : index
    %39 = vector.load %arg1[%c2_25, %38, %c0_26, %c0_27] : memref<3x8x2x32xf32, #tpu.memory_space<vmem>>, vector<1x1x2x32xf32>
    %40 = vector.shape_cast %39 : vector<1x1x2x32xf32> to vector<2x32xf32>
    %41 = arith.mulf %28, %19 : vector<2x32xf32>
    %42 = arith.addf %40, %41 : vector<2x32xf32>
    %43 = math.tanh %42 : vector<2x32xf32>
    %cst_28 = arith.constant 1.000000e+00 : f32
    %44 = vector.broadcast %cst_28 : f32 to vector<2x32xf32>
    %45 = arith.subf %44, %37 : vector<2x32xf32>
    %46 = arith.mulf %45, %43 : vector<2x32xf32>
    %47 = arith.mulf %37, %13 : vector<2x32xf32>
    %48 = arith.addf %46, %47 : vector<2x32xf32>
    %c0_29 = arith.constant 0 : index
    %c0_30 = arith.constant 0 : index
    %49 = vector.load %arg6[%c0_29, %c0_30] : memref<2x32xf32, #tpu.memory_space<vmem>>, vector<2x32xf32>
    tpu.vector_store %arg6[%c0_29, %c0_30], %48 {strides = array<i32>} : memref<2x32xf32, #tpu.memory_space<vmem>>, vector<2x32xf32>,
    %c0_31 = arith.constant 0 : index
    %50 = arith.index_cast %12 : i32 to index
    %c0_32 = arith.constant 0 : index
    %c0_33 = arith.constant 0 : index
    %51 = vector.load %arg4[%c0_31, %50, %c0_32, %c0_33] : memref<1x8x2x32xf32, #tpu.memory_space<vmem>>, vector<1x1x2x32xf32>
    %52 = vector.shape_cast %51 : vector<1x1x2x32xf32> to vector<2x32xf32>
    %53 = vector.shape_cast %48 : vector<2x32xf32> to vector<1x1x2x32xf32>
    tpu.vector_store %arg4[%c0_31, %50, %c0_32, %c0_33], %53 {strides = array<i32>} : memref<1x8x2x32xf32, #tpu.memory_space<vmem>>, vector<1x1x2x32xf32>,
    %c1_i32 = arith.constant 1 : i32
    %c0_i32_34 = arith.constant 0 : i32
    %54 = arith.cmpi eq, %arg0, %c0_i32_34 : i32
    %c7_i32_35 = arith.constant 7 : i32
    %55 = arith.subi %c7_i32_35, %c1_i32 : i32
    %56 = arith.select %54, %c1_i32, %55 : i32
    %c0_36 = arith.constant 0 : index
    %c0_37 = arith.constant 0 : index
    %57 = vector.load %arg6[%c0_36, %c0_37] : memref<2x32xf32, #tpu.memory_space<vmem>>, vector<2x32xf32>
    %58 = arith.truncf %57 : vector<2x32xf32> to vector<2x32xbf16>
    %cst_38 = arith.constant dense<0.000000e+00> : vector<2x32xf32>
    %59 = tpu.matmul %58, %1, %cst_38 {dimension_numbers = #tpu.dot_dimension_numbers<[1], [0], [0], [1], [0, 0, 1, 1], [], []>} : vector<2x32xbf16>, vector<32x32xbf16>, vector<2x32xf32> -> vector<2x32xf32>
    %cst_39 = arith.constant dense<0.000000e+00> : vector<2x32xf32>
    %60 = tpu.matmul %58, %3, %cst_39 {dimension_numbers = #tpu.dot_dimension_numbers<[1], [0], [0], [1], [0, 0, 1, 1], [], []>} : vector<2x32xbf16>, vector<32x32xbf16>, vector<2x32xf32> -> vector<2x32xf32>
    %cst_40 = arith.constant dense<0.000000e+00> : vector<2x32xf32>
    %61 = tpu.matmul %58, %5, %cst_40 {dimension_numbers = #tpu.dot_dimension_numbers<[1], [0], [0], [1], [0, 0, 1, 1], [], []>} : vector<2x32xbf16>, vector<32x32xbf16>, vector<2x32xf32> -> vector<2x32xf32>
    %62 = vector.broadcast %7 : vector<1x32xf32> to vector<2x32xf32>
    %63 = arith.addf %61, %62 : vector<2x32xf32>
    %c0_41 = arith.constant 0 : index
    %64 = arith.index_cast %56 : i32 to index
    %c0_42 = arith.constant 0 : index
    %c0_43 = arith.constant 0 : index
    %65 = vector.load %arg1[%c0_41, %64, %c0_42, %c0_43] : memref<3x8x2x32xf32, #tpu.memory_space<vmem>>, vector<1x1x2x32xf32>
    %66 = vector.shape_cast %65 : vector<1x1x2x32xf32> to vector<2x32xf32>
    %67 = arith.addf %66, %59 : vector<2x32xf32>
    %68 = arith.negf %67 : vector<2x32xf32>
    %69 = math.exp %68 : vector<2x32xf32>
    %cst_44 = arith.constant 1.000000e+00 : f32
    %70 = vector.broadcast %cst_44 : f32 to vector<2x32xf32>
    %71 = arith.addf %70, %69 : vector<2x32xf32>
    %72 = arith.divf %70, %71 : vector<2x32xf32>
    %c1_45 = arith.constant 1 : index
    %73 = arith.index_cast %56 : i32 to index
    %c0_46 = arith.constant 0 : index
    %c0_47 = arith.constant 0 : index
    %74 = vector.load %arg1[%c1_45, %73, %c0_46, %c0_47] : memref<3x8x2x32xf32, #tpu.memory_space<vmem>>, vector<1x1x2x32xf32>
    %75 = vector.shape_cast %74 : vector<1x1x2x32xf32> to vector<2x32xf32>
    %76 = arith.addf %75, %60 : vector<2x32xf32>
    %77 = arith.negf %76 : vector<2x32xf32>
    %78 = math.exp %77 : vector<2x32xf32>
    %cst_48 = arith.constant 1.000000e+00 : f32
    %79 = vector.broadcast %cst_48 : f32 to vector<2x32xf32>
    %80 = arith.addf %79, %78 : vector<2x32xf32>
    %81 = arith.divf %79, %80 : vector<2x32xf32>
    %c2_49 = arith.constant 2 : index
    %82 = arith.index_cast %56 : i32 to index
    %c0_50 = arith.constant 0 : index
    %c0_51 = arith.constant 0 : index
    %83 = vector.load %arg1[%c2_49, %82, %c0_50, %c0_51] : memref<3x8x2x32xf32, #tpu.memory_space<vmem>>, vector<1x1x2x32xf32>
    %84 = vector.shape_cast %83 : vector<1x1x2x32xf32> to vector<2x32xf32>
    %85 = arith.mulf %72, %63 : vector<2x32xf32>
    %86 = arith.addf %84, %85 : vector<2x32xf32>
    %87 = math.tanh %86 : vector<2x32xf32>
    %cst_52 = arith.constant 1.000000e+00 : f32
    %88 = vector.broadcast %cst_52 : f32 to vector<2x32xf32>
    %89 = arith.subf %88, %81 : vector<2x32xf32>
    %90 = arith.mulf %89, %87 : vector<2x32xf32>
    %91 = arith.mulf %81, %57 : vector<2x32xf32>
    %92 = arith.addf %90, %91 : vector<2x32xf32>
    %c0_53 = arith.constant 0 : index
    %c0_54 = arith.constant 0 : index
    %93 = vector.load %arg6[%c0_53, %c0_54] : memref<2x32xf32, #tpu.memory_space<vmem>>, vector<2x32xf32>
    tpu.vector_store %arg6[%c0_53, %c0_54], %92 {strides = array<i32>} : memref<2x32xf32, #tpu.memory_space<vmem>>, vector<2x32xf32>,
    %c0_55 = arith.constant 0 : index
    %94 = arith.index_cast %56 : i32 to index
    %c0_56 = arith.constant 0 : index
    %c0_57 = arith.constant 0 : index
    %95 = vector.load %arg4[%c0_55, %94, %c0_56, %c0_57] : memref<1x8x2x32xf32, #tpu.memory_space<vmem>>, vector<1x1x2x32xf32>
    %96 = vector.shape_cast %95 : vector<1x1x2x32xf32> to vector<2x32xf32>
    %97 = vector.shape_cast %92 : vector<2x32xf32> to vector<1x1x2x32xf32>
    tpu.vector_store %arg4[%c0_55, %94, %c0_56, %c0_57], %97 {strides = array<i32>} : memref<1x8x2x32xf32, #tpu.memory_space<vmem>>, vector<1x1x2x32xf32>,
    %c2_i32 = arith.constant 2 : i32
    %c0_i32_58 = arith.constant 0 : i32
    %98 = arith.cmpi eq, %arg0, %c0_i32_58 : i32
    %c7_i32_59 = arith.constant 7 : i32
    %99 = arith.subi %c7_i32_59, %c2_i32 : i32
    %100 = arith.select %98, %c2_i32, %99 : i32
    %c0_60 = arith.constant 0 : index
    %c0_61 = arith.constant 0 : index
    %101 = vector.load %arg6[%c0_60, %c0_61] : memref<2x32xf32, #tpu.memory_space<vmem>>, vector<2x32xf32>
    %102 = arith.truncf %101 : vector<2x32xf32> to vector<2x32xbf16>
    %cst_62 = arith.constant dense<0.000000e+00> : vector<2x32xf32>
    %103 = tpu.matmul %102, %1, %cst_62 {dimension_numbers = #tpu.dot_dimension_numbers<[1], [0], [0], [1], [0, 0, 1, 1], [], []>} : vector<2x32xbf16>, vector<32x32xbf16>, vector<2x32xf32> -> vector<2x32xf32>
    %cst_63 = arith.constant dense<0.000000e+00> : vector<2x32xf32>
    %104 = tpu.matmul %102, %3, %cst_63 {dimension_numbers = #tpu.dot_dimension_numbers<[1], [0], [0], [1], [0, 0, 1, 1], [], []>} : vector<2x32xbf16>, vector<32x32xbf16>, vector<2x32xf32> -> vector<2x32xf32>
    %cst_64 = arith.constant dense<0.000000e+00> : vector<2x32xf32>
    %105 = tpu.matmul %102, %5, %cst_64 {dimension_numbers = #tpu.dot_dimension_numbers<[1], [0], [0], [1], [0, 0, 1, 1], [], []>} : vector<2x32xbf16>, vector<32x32xbf16>, vector<2x32xf32> -> vector<2x32xf32>
    %106 = vector.broadcast %7 : vector<1x32xf32> to vector<2x32xf32>
    %107 = arith.addf %105, %106 : vector<2x32xf32>
    %c0_65 = arith.constant 0 : index
    %108 = arith.index_cast %100 : i32 to index
    %c0_66 = arith.constant 0 : index
    %c0_67 = arith.constant 0 : index
    %109 = vector.load %arg1[%c0_65, %108, %c0_66, %c0_67] : memref<3x8x2x32xf32, #tpu.memory_space<vmem>>, vector<1x1x2x32xf32>
    %110 = vector.shape_cast %109 : vector<1x1x2x32xf32> to vector<2x32xf32>
    %111 = arith.addf %110, %103 : vector<2x32xf32>
    %112 = arith.negf %111 : vector<2x32xf32>
    %113 = math.exp %112 : vector<2x32xf32>
    %cst_68 = arith.constant 1.000000e+00 : f32
    %114 = vector.broadcast %cst_68 : f32 to vector<2x32xf32>
    %115 = arith.addf %114, %113 : vector<2x32xf32>
    %116 = arith.divf %114, %115 : vector<2x32xf32>
    %c1_69 = arith.constant 1 : index
    %117 = arith.index_cast %100 : i32 to index
    %c0_70 = arith.constant 0 : index
    %c0_71 = arith.constant 0 : index
    %118 = vector.load %arg1[%c1_69, %117, %c0_70, %c0_71] : memref<3x8x2x32xf32, #tpu.memory_space<vmem>>, vector<1x1x2x32xf32>
    %119 = vector.shape_cast %118 : vector<1x1x2x32xf32> to vector<2x32xf32>
    %120 = arith.addf %119, %104 : vector<2x32xf32>
    %121 = arith.negf %120 : vector<2x32xf32>
    %122 = math.exp %121 : vector<2x32xf32>
    %cst_72 = arith.constant 1.000000e+00 : f32
    %123 = vector.broadcast %cst_72 : f32 to vector<2x32xf32>
    %124 = arith.addf %123, %122 : vector<2x32xf32>
    %125 = arith.divf %123, %124 : vector<2x32xf32>
    %c2_73 = arith.constant 2 : index
    %126 = arith.index_cast %100 : i32 to index
    %c0_74 = arith.constant 0 : index
    %c0_75 = arith.constant 0 : index
    %127 = vector.load %arg1[%c2_73, %126, %c0_74, %c0_75] : memref<3x8x2x32xf32, #tpu.memory_space<vmem>>, vector<1x1x2x32xf32>
    %128 = vector.shape_cast %127 : vector<1x1x2x32xf32> to vector<2x32xf32>
    %129 = arith.mulf %116, %107 : vector<2x32xf32>
    %130 = arith.addf %128, %129 : vector<2x32xf32>
    %131 = math.tanh %130 : vector<2x32xf32>
    %cst_76 = arith.constant 1.000000e+00 : f32
    %132 = vector.broadcast %cst_76 : f32 to vector<2x32xf32>
    %133 = arith.subf %132, %125 : vector<2x32xf32>
    %134 = arith.mulf %133, %131 : vector<2x32xf32>
    %135 = arith.mulf %125, %101 : vector<2x32xf32>
    %136 = arith.addf %134, %135 : vector<2x32xf32>
    %c0_77 = arith.constant 0 : index
    %c0_78 = arith.constant 0 : index
    %137 = vector.load %arg6[%c0_77, %c0_78] : memref<2x32xf32, #tpu.memory_space<vmem>>, vector<2x32xf32>
    tpu.vector_store %arg6[%c0_77, %c0_78], %136 {strides = array<i32>} : memref<2x32xf32, #tpu.memory_space<vmem>>, vector<2x32xf32>,
    %c0_79 = arith.constant 0 : index
    %138 = arith.index_cast %100 : i32 to index
    %c0_80 = arith.constant 0 : index
    %c0_81 = arith.constant 0 : index
    %139 = vector.load %arg4[%c0_79, %138, %c0_80, %c0_81] : memref<1x8x2x32xf32, #tpu.memory_space<vmem>>, vector<1x1x2x32xf32>
    %140 = vector.shape_cast %139 : vector<1x1x2x32xf32> to vector<2x32xf32>
    %141 = vector.shape_cast %136 : vector<2x32xf32> to vector<1x1x2x32xf32>
    tpu.vector_store %arg4[%c0_79, %138, %c0_80, %c0_81], %141 {strides = array<i32>} : memref<1x8x2x32xf32, #tpu.memory_space<vmem>>, vector<1x1x2x32xf32>,
    %c3_i32 = arith.constant 3 : i32
    %c0_i32_82 = arith.constant 0 : i32
    %142 = arith.cmpi eq, %arg0, %c0_i32_82 : i32
    %c7_i32_83 = arith.constant 7 : i32
    %143 = arith.subi %c7_i32_83, %c3_i32 : i32
    %144 = arith.select %142, %c3_i32, %143 : i32
    %c0_84 = arith.constant 0 : index
    %c0_85 = arith.constant 0 : index
    %145 = vector.load %arg6[%c0_84, %c0_85] : memref<2x32xf32, #tpu.memory_space<vmem>>, vector<2x32xf32>
    %146 = arith.truncf %145 : vector<2x32xf32> to vector<2x32xbf16>
    %cst_86 = arith.constant dense<0.000000e+00> : vector<2x32xf32>
    %147 = tpu.matmul %146, %1, %cst_86 {dimension_numbers = #tpu.dot_dimension_numbers<[1], [0], [0], [1], [0, 0, 1, 1], [], []>} : vector<2x32xbf16>, vector<32x32xbf16>, vector<2x32xf32> -> vector<2x32xf32>
    %cst_87 = arith.constant dense<0.000000e+00> : vector<2x32xf32>
    %148 = tpu.matmul %146, %3, %cst_87 {dimension_numbers = #tpu.dot_dimension_numbers<[1], [0], [0], [1], [0, 0, 1, 1], [], []>} : vector<2x32xbf16>, vector<32x32xbf16>, vector<2x32xf32> -> vector<2x32xf32>
    %cst_88 = arith.constant dense<0.000000e+00> : vector<2x32xf32>
    %149 = tpu.matmul %146, %5, %cst_88 {dimension_numbers = #tpu.dot_dimension_numbers<[1], [0], [0], [1], [0, 0, 1, 1], [], []>} : vector<2x32xbf16>, vector<32x32xbf16>, vector<2x32xf32> -> vector<2x32xf32>
    %150 = vector.broadcast %7 : vector<1x32xf32> to vector<2x32xf32>
    %151 = arith.addf %149, %150 : vector<2x32xf32>
    %c0_89 = arith.constant 0 : index
    %152 = arith.index_cast %144 : i32 to index
    %c0_90 = arith.constant 0 : index
    %c0_91 = arith.constant 0 : index
    %153 = vector.load %arg1[%c0_89, %152, %c0_90, %c0_91] : memref<3x8x2x32xf32, #tpu.memory_space<vmem>>, vector<1x1x2x32xf32>
    %154 = vector.shape_cast %153 : vector<1x1x2x32xf32> to vector<2x32xf32>
    %155 = arith.addf %154, %147 : vector<2x32xf32>
    %156 = arith.negf %155 : vector<2x32xf32>
    %157 = math.exp %156 : vector<2x32xf32>
    %cst_92 = arith.constant 1.000000e+00 : f32
    %158 = vector.broadcast %cst_92 : f32 to vector<2x32xf32>
    %159 = arith.addf %158, %157 : vector<2x32xf32>
    %160 = arith.divf %158, %159 : vector<2x32xf32>
    %c1_93 = arith.constant 1 : index
    %161 = arith.index_cast %144 : i32 to index
    %c0_94 = arith.constant 0 : index
    %c0_95 = arith.constant 0 : index
    %162 = vector.load %arg1[%c1_93, %161, %c0_94, %c0_95] : memref<3x8x2x32xf32, #tpu.memory_space<vmem>>, vector<1x1x2x32xf32>
    %163 = vector.shape_cast %162 : vector<1x1x2x32xf32> to vector<2x32xf32>
    %164 = arith.addf %163, %148 : vector<2x32xf32>
    %165 = arith.negf %164 : vector<2x32xf32>
    %166 = math.exp %165 : vector<2x32xf32>
    %cst_96 = arith.constant 1.000000e+00 : f32
    %167 = vector.broadcast %cst_96 : f32 to vector<2x32xf32>
    %168 = arith.addf %167, %166 : vector<2x32xf32>
    %169 = arith.divf %167, %168 : vector<2x32xf32>
    %c2_97 = arith.constant 2 : index
    %170 = arith.index_cast %144 : i32 to index
    %c0_98 = arith.constant 0 : index
    %c0_99 = arith.constant 0 : index
    %171 = vector.load %arg1[%c2_97, %170, %c0_98, %c0_99] : memref<3x8x2x32xf32, #tpu.memory_space<vmem>>, vector<1x1x2x32xf32>
    %172 = vector.shape_cast %171 : vector<1x1x2x32xf32> to vector<2x32xf32>
    %173 = arith.mulf %160, %151 : vector<2x32xf32>
    %174 = arith.addf %172, %173 : vector<2x32xf32>
    %175 = math.tanh %174 : vector<2x32xf32>
    %cst_100 = arith.constant 1.000000e+00 : f32
    %176 = vector.broadcast %cst_100 : f32 to vector<2x32xf32>
    %177 = arith.subf %176, %169 : vector<2x32xf32>
    %178 = arith.mulf %177, %175 : vector<2x32xf32>
    %179 = arith.mulf %169, %145 : vector<2x32xf32>
    %180 = arith.addf %178, %179 : vector<2x32xf32>
    %c0_101 = arith.constant 0 : index
    %c0_102 = arith.constant 0 : index
    %181 = vector.load %arg6[%c0_101, %c0_102] : memref<2x32xf32, #tpu.memory_space<vmem>>, vector<2x32xf32>
    tpu.vector_store %arg6[%c0_101, %c0_102], %180 {strides = array<i32>} : memref<2x32xf32, #tpu.memory_space<vmem>>, vector<2x32xf32>,
    %c0_103 = arith.constant 0 : index
    %182 = arith.index_cast %144 : i32 to index
    %c0_104 = arith.constant 0 : index
    %c0_105 = arith.constant 0 : index
    %183 = vector.load %arg4[%c0_103, %182, %c0_104, %c0_105] : memref<1x8x2x32xf32, #tpu.memory_space<vmem>>, vector<1x1x2x32xf32>
    %184 = vector.shape_cast %183 : vector<1x1x2x32xf32> to vector<2x32xf32>
    %185 = vector.shape_cast %180 : vector<2x32xf32> to vector<1x1x2x32xf32>
    tpu.vector_store %arg4[%c0_103, %182, %c0_104, %c0_105], %185 {strides = array<i32>} : memref<1x8x2x32xf32, #tpu.memory_space<vmem>>, vector<1x1x2x32xf32>,
    %c4_i32 = arith.constant 4 : i32
    %c0_i32_106 = arith.constant 0 : i32
    %186 = arith.cmpi eq, %arg0, %c0_i32_106 : i32
    %c7_i32_107 = arith.constant 7 : i32
    %187 = arith.subi %c7_i32_107, %c4_i32 : i32
    %188 = arith.select %186, %c4_i32, %187 : i32
    %c0_108 = arith.constant 0 : index
    %c0_109 = arith.constant 0 : index
    %189 = vector.load %arg6[%c0_108, %c0_109] : memref<2x32xf32, #tpu.memory_space<vmem>>, vector<2x32xf32>
    %190 = arith.truncf %189 : vector<2x32xf32> to vector<2x32xbf16>
    %cst_110 = arith.constant dense<0.000000e+00> : vector<2x32xf32>
    %191 = tpu.matmul %190, %1, %cst_110 {dimension_numbers = #tpu.dot_dimension_numbers<[1], [0], [0], [1], [0, 0, 1, 1], [], []>} : vector<2x32xbf16>, vector<32x32xbf16>, vector<2x32xf32> -> vector<2x32xf32>
    %cst_111 = arith.constant dense<0.000000e+00> : vector<2x32xf32>
    %192 = tpu.matmul %190, %3, %cst_111 {dimension_numbers = #tpu.dot_dimension_numbers<[1], [0], [0], [1], [0, 0, 1, 1], [], []>} : vector<2x32xbf16>, vector<32x32xbf16>, vector<2x32xf32> -> vector<2x32xf32>
    %cst_112 = arith.constant dense<0.000000e+00> : vector<2x32xf32>
    %193 = tpu.matmul %190, %5, %cst_112 {dimension_numbers = #tpu.dot_dimension_numbers<[1], [0], [0], [1], [0, 0, 1, 1], [], []>} : vector<2x32xbf16>, vector<32x32xbf16>, vector<2x32xf32> -> vector<2x32xf32>
    %194 = vector.broadcast %7 : vector<1x32xf32> to vector<2x32xf32>
    %195 = arith.addf %193, %194 : vector<2x32xf32>
    %c0_113 = arith.constant 0 : index
    %196 = arith.index_cast %188 : i32 to index
    %c0_114 = arith.constant 0 : index
    %c0_115 = arith.constant 0 : index
    %197 = vector.load %arg1[%c0_113, %196, %c0_114, %c0_115] : memref<3x8x2x32xf32, #tpu.memory_space<vmem>>, vector<1x1x2x32xf32>
    %198 = vector.shape_cast %197 : vector<1x1x2x32xf32> to vector<2x32xf32>
    %199 = arith.addf %198, %191 : vector<2x32xf32>
    %200 = arith.negf %199 : vector<2x32xf32>
    %201 = math.exp %200 : vector<2x32xf32>
    %cst_116 = arith.constant 1.000000e+00 : f32
    %202 = vector.broadcast %cst_116 : f32 to vector<2x32xf32>
    %203 = arith.addf %202, %201 : vector<2x32xf32>
    %204 = arith.divf %202, %203 : vector<2x32xf32>
    %c1_117 = arith.constant 1 : index
    %205 = arith.index_cast %188 : i32 to index
    %c0_118 = arith.constant 0 : index
    %c0_119 = arith.constant 0 : index
    %206 = vector.load %arg1[%c1_117, %205, %c0_118, %c0_119] : memref<3x8x2x32xf32, #tpu.memory_space<vmem>>, vector<1x1x2x32xf32>
    %207 = vector.shape_cast %206 : vector<1x1x2x32xf32> to vector<2x32xf32>
    %208 = arith.addf %207, %192 : vector<2x32xf32>
    %209 = arith.negf %208 : vector<2x32xf32>
    %210 = math.exp %209 : vector<2x32xf32>
    %cst_120 = arith.constant 1.000000e+00 : f32
    %211 = vector.broadcast %cst_120 : f32 to vector<2x32xf32>
    %212 = arith.addf %211, %210 : vector<2x32xf32>
    %213 = arith.divf %211, %212 : vector<2x32xf32>
    %c2_121 = arith.constant 2 : index
    %214 = arith.index_cast %188 : i32 to index
    %c0_122 = arith.constant 0 : index
    %c0_123 = arith.constant 0 : index
    %215 = vector.load %arg1[%c2_121, %214, %c0_122, %c0_123] : memref<3x8x2x32xf32, #tpu.memory_space<vmem>>, vector<1x1x2x32xf32>
    %216 = vector.shape_cast %215 : vector<1x1x2x32xf32> to vector<2x32xf32>
    %217 = arith.mulf %204, %195 : vector<2x32xf32>
    %218 = arith.addf %216, %217 : vector<2x32xf32>
    %219 = math.tanh %218 : vector<2x32xf32>
    %cst_124 = arith.constant 1.000000e+00 : f32
    %220 = vector.broadcast %cst_124 : f32 to vector<2x32xf32>
    %221 = arith.subf %220, %213 : vector<2x32xf32>
    %222 = arith.mulf %221, %219 : vector<2x32xf32>
    %223 = arith.mulf %213, %189 : vector<2x32xf32>
    %224 = arith.addf %222, %223 : vector<2x32xf32>
    %c0_125 = arith.constant 0 : index
    %c0_126 = arith.constant 0 : index
    %225 = vector.load %arg6[%c0_125, %c0_126] : memref<2x32xf32, #tpu.memory_space<vmem>>, vector<2x32xf32>
    tpu.vector_store %arg6[%c0_125, %c0_126], %224 {strides = array<i32>} : memref<2x32xf32, #tpu.memory_space<vmem>>, vector<2x32xf32>,
    %c0_127 = arith.constant 0 : index
    %226 = arith.index_cast %188 : i32 to index
    %c0_128 = arith.constant 0 : index
    %c0_129 = arith.constant 0 : index
    %227 = vector.load %arg4[%c0_127, %226, %c0_128, %c0_129] : memref<1x8x2x32xf32, #tpu.memory_space<vmem>>, vector<1x1x2x32xf32>
    %228 = vector.shape_cast %227 : vector<1x1x2x32xf32> to vector<2x32xf32>
    %229 = vector.shape_cast %224 : vector<2x32xf32> to vector<1x1x2x32xf32>
    tpu.vector_store %arg4[%c0_127, %226, %c0_128, %c0_129], %229 {strides = array<i32>} : memref<1x8x2x32xf32, #tpu.memory_space<vmem>>, vector<1x1x2x32xf32>,
    %c5_i32 = arith.constant 5 : i32
    %c0_i32_130 = arith.constant 0 : i32
    %230 = arith.cmpi eq, %arg0, %c0_i32_130 : i32
    %c7_i32_131 = arith.constant 7 : i32
    %231 = arith.subi %c7_i32_131, %c5_i32 : i32
    %232 = arith.select %230, %c5_i32, %231 : i32
    %c0_132 = arith.constant 0 : index
    %c0_133 = arith.constant 0 : index
    %233 = vector.load %arg6[%c0_132, %c0_133] : memref<2x32xf32, #tpu.memory_space<vmem>>, vector<2x32xf32>
    %234 = arith.truncf %233 : vector<2x32xf32> to vector<2x32xbf16>
    %cst_134 = arith.constant dense<0.000000e+00> : vector<2x32xf32>
    %235 = tpu.matmul %234, %1, %cst_134 {dimension_numbers = #tpu.dot_dimension_numbers<[1], [0], [0], [1], [0, 0, 1, 1], [], []>} : vector<2x32xbf16>, vector<32x32xbf16>, vector<2x32xf32> -> vector<2x32xf32>
    %cst_135 = arith.constant dense<0.000000e+00> : vector<2x32xf32>
    %236 = tpu.matmul %234, %3, %cst_135 {dimension_numbers = #tpu.dot_dimension_numbers<[1], [0], [0], [1], [0, 0, 1, 1], [], []>} : vector<2x32xbf16>, vector<32x32xbf16>, vector<2x32xf32> -> vector<2x32xf32>
    %cst_136 = arith.constant dense<0.000000e+00> : vector<2x32xf32>
    %237 = tpu.matmul %234, %5, %cst_136 {dimension_numbers = #tpu.dot_dimension_numbers<[1], [0], [0], [1], [0, 0, 1, 1], [], []>} : vector<2x32xbf16>, vector<32x32xbf16>, vector<2x32xf32> -> vector<2x32xf32>
    %238 = vector.broadcast %7 : vector<1x32xf32> to vector<2x32xf32>
    %239 = arith.addf %237, %238 : vector<2x32xf32>
    %c0_137 = arith.constant 0 : index
    %240 = arith.index_cast %232 : i32 to index
    %c0_138 = arith.constant 0 : index
    %c0_139 = arith.constant 0 : index
    %241 = vector.load %arg1[%c0_137, %240, %c0_138, %c0_139] : memref<3x8x2x32xf32, #tpu.memory_space<vmem>>, vector<1x1x2x32xf32>
    %242 = vector.shape_cast %241 : vector<1x1x2x32xf32> to vector<2x32xf32>
    %243 = arith.addf %242, %235 : vector<2x32xf32>
    %244 = arith.negf %243 : vector<2x32xf32>
    %245 = math.exp %244 : vector<2x32xf32>
    %cst_140 = arith.constant 1.000000e+00 : f32
    %246 = vector.broadcast %cst_140 : f32 to vector<2x32xf32>
    %247 = arith.addf %246, %245 : vector<2x32xf32>
    %248 = arith.divf %246, %247 : vector<2x32xf32>
    %c1_141 = arith.constant 1 : index
    %249 = arith.index_cast %232 : i32 to index
    %c0_142 = arith.constant 0 : index
    %c0_143 = arith.constant 0 : index
    %250 = vector.load %arg1[%c1_141, %249, %c0_142, %c0_143] : memref<3x8x2x32xf32, #tpu.memory_space<vmem>>, vector<1x1x2x32xf32>
    %251 = vector.shape_cast %250 : vector<1x1x2x32xf32> to vector<2x32xf32>
    %252 = arith.addf %251, %236 : vector<2x32xf32>
    %253 = arith.negf %252 : vector<2x32xf32>
    %254 = math.exp %253 : vector<2x32xf32>
    %cst_144 = arith.constant 1.000000e+00 : f32
    %255 = vector.broadcast %cst_144 : f32 to vector<2x32xf32>
    %256 = arith.addf %255, %254 : vector<2x32xf32>
    %257 = arith.divf %255, %256 : vector<2x32xf32>
    %c2_145 = arith.constant 2 : index
    %258 = arith.index_cast %232 : i32 to index
    %c0_146 = arith.constant 0 : index
    %c0_147 = arith.constant 0 : index
    %259 = vector.load %arg1[%c2_145, %258, %c0_146, %c0_147] : memref<3x8x2x32xf32, #tpu.memory_space<vmem>>, vector<1x1x2x32xf32>
    %260 = vector.shape_cast %259 : vector<1x1x2x32xf32> to vector<2x32xf32>
    %261 = arith.mulf %248, %239 : vector<2x32xf32>
    %262 = arith.addf %260, %261 : vector<2x32xf32>
    %263 = math.tanh %262 : vector<2x32xf32>
    %cst_148 = arith.constant 1.000000e+00 : f32
    %264 = vector.broadcast %cst_148 : f32 to vector<2x32xf32>
    %265 = arith.subf %264, %257 : vector<2x32xf32>
    %266 = arith.mulf %265, %263 : vector<2x32xf32>
    %267 = arith.mulf %257, %233 : vector<2x32xf32>
    %268 = arith.addf %266, %267 : vector<2x32xf32>
    %c0_149 = arith.constant 0 : index
    %c0_150 = arith.constant 0 : index
    %269 = vector.load %arg6[%c0_149, %c0_150] : memref<2x32xf32, #tpu.memory_space<vmem>>, vector<2x32xf32>
    tpu.vector_store %arg6[%c0_149, %c0_150], %268 {strides = array<i32>} : memref<2x32xf32, #tpu.memory_space<vmem>>, vector<2x32xf32>,
    %c0_151 = arith.constant 0 : index
    %270 = arith.index_cast %232 : i32 to index
    %c0_152 = arith.constant 0 : index
    %c0_153 = arith.constant 0 : index
    %271 = vector.load %arg4[%c0_151, %270, %c0_152, %c0_153] : memref<1x8x2x32xf32, #tpu.memory_space<vmem>>, vector<1x1x2x32xf32>
    %272 = vector.shape_cast %271 : vector<1x1x2x32xf32> to vector<2x32xf32>
    %273 = vector.shape_cast %268 : vector<2x32xf32> to vector<1x1x2x32xf32>
    tpu.vector_store %arg4[%c0_151, %270, %c0_152, %c0_153], %273 {strides = array<i32>} : memref<1x8x2x32xf32, #tpu.memory_space<vmem>>, vector<1x1x2x32xf32>,
    %c6_i32 = arith.constant 6 : i32
    %c0_i32_154 = arith.constant 0 : i32
    %274 = arith.cmpi eq, %arg0, %c0_i32_154 : i32
    %c7_i32_155 = arith.constant 7 : i32
    %275 = arith.subi %c7_i32_155, %c6_i32 : i32
    %276 = arith.select %274, %c6_i32, %275 : i32
    %c0_156 = arith.constant 0 : index
    %c0_157 = arith.constant 0 : index
    %277 = vector.load %arg6[%c0_156, %c0_157] : memref<2x32xf32, #tpu.memory_space<vmem>>, vector<2x32xf32>
    %278 = arith.truncf %277 : vector<2x32xf32> to vector<2x32xbf16>
    %cst_158 = arith.constant dense<0.000000e+00> : vector<2x32xf32>
    %279 = tpu.matmul %278, %1, %cst_158 {dimension_numbers = #tpu.dot_dimension_numbers<[1], [0], [0], [1], [0, 0, 1, 1], [], []>} : vector<2x32xbf16>, vector<32x32xbf16>, vector<2x32xf32> -> vector<2x32xf32>
    %cst_159 = arith.constant dense<0.000000e+00> : vector<2x32xf32>
    %280 = tpu.matmul %278, %3, %cst_159 {dimension_numbers = #tpu.dot_dimension_numbers<[1], [0], [0], [1], [0, 0, 1, 1], [], []>} : vector<2x32xbf16>, vector<32x32xbf16>, vector<2x32xf32> -> vector<2x32xf32>
    %cst_160 = arith.constant dense<0.000000e+00> : vector<2x32xf32>
    %281 = tpu.matmul %278, %5, %cst_160 {dimension_numbers = #tpu.dot_dimension_numbers<[1], [0], [0], [1], [0, 0, 1, 1], [], []>} : vector<2x32xbf16>, vector<32x32xbf16>, vector<2x32xf32> -> vector<2x32xf32>
    %282 = vector.broadcast %7 : vector<1x32xf32> to vector<2x32xf32>
    %283 = arith.addf %281, %282 : vector<2x32xf32>
    %c0_161 = arith.constant 0 : index
    %284 = arith.index_cast %276 : i32 to index
    %c0_162 = arith.constant 0 : index
    %c0_163 = arith.constant 0 : index
    %285 = vector.load %arg1[%c0_161, %284, %c0_162, %c0_163] : memref<3x8x2x32xf32, #tpu.memory_space<vmem>>, vector<1x1x2x32xf32>
    %286 = vector.shape_cast %285 : vector<1x1x2x32xf32> to vector<2x32xf32>
    %287 = arith.addf %286, %279 : vector<2x32xf32>
    %288 = arith.negf %287 : vector<2x32xf32>
    %289 = math.exp %288 : vector<2x32xf32>
    %cst_164 = arith.constant 1.000000e+00 : f32
    %290 = vector.broadcast %cst_164 : f32 to vector<2x32xf32>
    %291 = arith.addf %290, %289 : vector<2x32xf32>
    %292 = arith.divf %290, %291 : vector<2x32xf32>
    %c1_165 = arith.constant 1 : index
    %293 = arith.index_cast %276 : i32 to index
    %c0_166 = arith.constant 0 : index
    %c0_167 = arith.constant 0 : index
    %294 = vector.load %arg1[%c1_165, %293, %c0_166, %c0_167] : memref<3x8x2x32xf32, #tpu.memory_space<vmem>>, vector<1x1x2x32xf32>
    %295 = vector.shape_cast %294 : vector<1x1x2x32xf32> to vector<2x32xf32>
    %296 = arith.addf %295, %280 : vector<2x32xf32>
    %297 = arith.negf %296 : vector<2x32xf32>
    %298 = math.exp %297 : vector<2x32xf32>
    %cst_168 = arith.constant 1.000000e+00 : f32
    %299 = vector.broadcast %cst_168 : f32 to vector<2x32xf32>
    %300 = arith.addf %299, %298 : vector<2x32xf32>
    %301 = arith.divf %299, %300 : vector<2x32xf32>
    %c2_169 = arith.constant 2 : index
    %302 = arith.index_cast %276 : i32 to index
    %c0_170 = arith.constant 0 : index
    %c0_171 = arith.constant 0 : index
    %303 = vector.load %arg1[%c2_169, %302, %c0_170, %c0_171] : memref<3x8x2x32xf32, #tpu.memory_space<vmem>>, vector<1x1x2x32xf32>
    %304 = vector.shape_cast %303 : vector<1x1x2x32xf32> to vector<2x32xf32>
    %305 = arith.mulf %292, %283 : vector<2x32xf32>
    %306 = arith.addf %304, %305 : vector<2x32xf32>
    %307 = math.tanh %306 : vector<2x32xf32>
    %cst_172 = arith.constant 1.000000e+00 : f32
    %308 = vector.broadcast %cst_172 : f32 to vector<2x32xf32>
    %309 = arith.subf %308, %301 : vector<2x32xf32>
    %310 = arith.mulf %309, %307 : vector<2x32xf32>
    %311 = arith.mulf %301, %277 : vector<2x32xf32>
    %312 = arith.addf %310, %311 : vector<2x32xf32>
    %c0_173 = arith.constant 0 : index
    %c0_174 = arith.constant 0 : index
    %313 = vector.load %arg6[%c0_173, %c0_174] : memref<2x32xf32, #tpu.memory_space<vmem>>, vector<2x32xf32>
    tpu.vector_store %arg6[%c0_173, %c0_174], %312 {strides = array<i32>} : memref<2x32xf32, #tpu.memory_space<vmem>>, vector<2x32xf32>,
    %c0_175 = arith.constant 0 : index
    %314 = arith.index_cast %276 : i32 to index
    %c0_176 = arith.constant 0 : index
    %c0_177 = arith.constant 0 : index
    %315 = vector.load %arg4[%c0_175, %314, %c0_176, %c0_177] : memref<1x8x2x32xf32, #tpu.memory_space<vmem>>, vector<1x1x2x32xf32>
    %316 = vector.shape_cast %315 : vector<1x1x2x32xf32> to vector<2x32xf32>
    %317 = vector.shape_cast %312 : vector<2x32xf32> to vector<1x1x2x32xf32>
    tpu.vector_store %arg4[%c0_175, %314, %c0_176, %c0_177], %317 {strides = array<i32>} : memref<1x8x2x32xf32, #tpu.memory_space<vmem>>, vector<1x1x2x32xf32>,
    %c7_i32_178 = arith.constant 7 : i32
    %c0_i32_179 = arith.constant 0 : i32
    %318 = arith.cmpi eq, %arg0, %c0_i32_179 : i32
    %c7_i32_180 = arith.constant 7 : i32
    %319 = arith.subi %c7_i32_180, %c7_i32_178 : i32
    %320 = arith.select %318, %c7_i32_178, %319 : i32
    %c0_181 = arith.constant 0 : index
    %c0_182 = arith.constant 0 : index
    %321 = vector.load %arg6[%c0_181, %c0_182] : memref<2x32xf32, #tpu.memory_space<vmem>>, vector<2x32xf32>
    %322 = arith.truncf %321 : vector<2x32xf32> to vector<2x32xbf16>
    %cst_183 = arith.constant dense<0.000000e+00> : vector<2x32xf32>
    %323 = tpu.matmul %322, %1, %cst_183 {dimension_numbers = #tpu.dot_dimension_numbers<[1], [0], [0], [1], [0, 0, 1, 1], [], []>} : vector<2x32xbf16>, vector<32x32xbf16>, vector<2x32xf32> -> vector<2x32xf32>
    %cst_184 = arith.constant dense<0.000000e+00> : vector<2x32xf32>
    %324 = tpu.matmul %322, %3, %cst_184 {dimension_numbers = #tpu.dot_dimension_numbers<[1], [0], [0], [1], [0, 0, 1, 1], [], []>} : vector<2x32xbf16>, vector<32x32xbf16>, vector<2x32xf32> -> vector<2x32xf32>
    %cst_185 = arith.constant dense<0.000000e+00> : vector<2x32xf32>
    %325 = tpu.matmul %322, %5, %cst_185 {dimension_numbers = #tpu.dot_dimension_numbers<[1], [0], [0], [1], [0, 0, 1, 1], [], []>} : vector<2x32xbf16>, vector<32x32xbf16>, vector<2x32xf32> -> vector<2x32xf32>
    %326 = vector.broadcast %7 : vector<1x32xf32> to vector<2x32xf32>
    %327 = arith.addf %325, %326 : vector<2x32xf32>
    %c0_186 = arith.constant 0 : index
    %328 = arith.index_cast %320 : i32 to index
    %c0_187 = arith.constant 0 : index
    %c0_188 = arith.constant 0 : index
    %329 = vector.load %arg1[%c0_186, %328, %c0_187, %c0_188] : memref<3x8x2x32xf32, #tpu.memory_space<vmem>>, vector<1x1x2x32xf32>
    %330 = vector.shape_cast %329 : vector<1x1x2x32xf32> to vector<2x32xf32>
    %331 = arith.addf %330, %323 : vector<2x32xf32>
    %332 = arith.negf %331 : vector<2x32xf32>
    %333 = math.exp %332 : vector<2x32xf32>
    %cst_189 = arith.constant 1.000000e+00 : f32
    %334 = vector.broadcast %cst_189 : f32 to vector<2x32xf32>
    %335 = arith.addf %334, %333 : vector<2x32xf32>
    %336 = arith.divf %334, %335 : vector<2x32xf32>
    %c1_190 = arith.constant 1 : index
    %337 = arith.index_cast %320 : i32 to index
    %c0_191 = arith.constant 0 : index
    %c0_192 = arith.constant 0 : index
    %338 = vector.load %arg1[%c1_190, %337, %c0_191, %c0_192] : memref<3x8x2x32xf32, #tpu.memory_space<vmem>>, vector<1x1x2x32xf32>
    %339 = vector.shape_cast %338 : vector<1x1x2x32xf32> to vector<2x32xf32>
    %340 = arith.addf %339, %324 : vector<2x32xf32>
    %341 = arith.negf %340 : vector<2x32xf32>
    %342 = math.exp %341 : vector<2x32xf32>
    %cst_193 = arith.constant 1.000000e+00 : f32
    %343 = vector.broadcast %cst_193 : f32 to vector<2x32xf32>
    %344 = arith.addf %343, %342 : vector<2x32xf32>
    %345 = arith.divf %343, %344 : vector<2x32xf32>
    %c2_194 = arith.constant 2 : index
    %346 = arith.index_cast %320 : i32 to index
    %c0_195 = arith.constant 0 : index
    %c0_196 = arith.constant 0 : index
    %347 = vector.load %arg1[%c2_194, %346, %c0_195, %c0_196] : memref<3x8x2x32xf32, #tpu.memory_space<vmem>>, vector<1x1x2x32xf32>
    %348 = vector.shape_cast %347 : vector<1x1x2x32xf32> to vector<2x32xf32>
    %349 = arith.mulf %336, %327 : vector<2x32xf32>
    %350 = arith.addf %348, %349 : vector<2x32xf32>
    %351 = math.tanh %350 : vector<2x32xf32>
    %cst_197 = arith.constant 1.000000e+00 : f32
    %352 = vector.broadcast %cst_197 : f32 to vector<2x32xf32>
    %353 = arith.subf %352, %345 : vector<2x32xf32>
    %354 = arith.mulf %353, %351 : vector<2x32xf32>
    %355 = arith.mulf %345, %321 : vector<2x32xf32>
    %356 = arith.addf %354, %355 : vector<2x32xf32>
    %c0_198 = arith.constant 0 : index
    %c0_199 = arith.constant 0 : index
    %357 = vector.load %arg6[%c0_198, %c0_199] : memref<2x32xf32, #tpu.memory_space<vmem>>, vector<2x32xf32>
    tpu.vector_store %arg6[%c0_198, %c0_199], %356 {strides = array<i32>} : memref<2x32xf32, #tpu.memory_space<vmem>>, vector<2x32xf32>,
    %c0_200 = arith.constant 0 : index
    %358 = arith.index_cast %320 : i32 to index
    %c0_201 = arith.constant 0 : index
    %c0_202 = arith.constant 0 : index
    %359 = vector.load %arg4[%c0_200, %358, %c0_201, %c0_202] : memref<1x8x2x32xf32, #tpu.memory_space<vmem>>, vector<1x1x2x32xf32>
    %360 = vector.shape_cast %359 : vector<1x1x2x32xf32> to vector<2x32xf32>
    %361 = vector.shape_cast %356 : vector<2x32xf32> to vector<1x1x2x32xf32>
    tpu.vector_store %arg4[%c0_200, %358, %c0_201, %c0_202], %361 {strides = array<i32>} : memref<1x8x2x32xf32, #tpu.memory_space<vmem>>, vector<1x1x2x32xf32>,
    %c8_i32 = arith.constant 8 : i32
    %c0_203 = arith.constant 0 : index
    %c0_204 = arith.constant 0 : index
    %362 = vector.load %arg6[%c0_203, %c0_204] : memref<2x32xf32, #tpu.memory_space<vmem>>, vector<2x32xf32>
    %c0_205 = arith.constant 0 : index
    %c0_206 = arith.constant 0 : index
    %c0_207 = arith.constant 0 : index
    %363 = vector.load %arg5[%c0_205, %c0_206, %c0_207] : memref<1x2x32xf32, #tpu.memory_space<vmem>>, vector<1x2x32xf32>
    %364 = vector.shape_cast %363 : vector<1x2x32xf32> to vector<2x32xf32>
    %365 = vector.shape_cast %362 : vector<2x32xf32> to vector<1x2x32xf32>
    tpu.vector_store %arg5[%c0_205, %c0_206, %c0_207], %365 {strides = array<i32>} : memref<1x2x32xf32, #tpu.memory_space<vmem>>, vector<1x2x32xf32>,
    return
  }
  func.func @transform_0(%arg0: i32) -> (i32, i32, i32, i32) {
    %c0_i32 = arith.constant 0 : i32
    %c0_i32_0 = arith.constant 0 : i32
    %c0_i32_1 = arith.constant 0 : i32
    %c0_i32_2 = arith.constant 0 : i32
    return %arg0, %c0_i32, %c0_i32_0, %c0_i32_1 : i32, i32, i32, i32
  }
  func.func @transform_1(%arg0: i32) -> (i32, i32, i32) {
    %c0_i32 = arith.constant 0 : i32
    %c0_i32_0 = arith.constant 0 : i32
    %c0_i32_1 = arith.constant 0 : i32
    return %arg0, %c0_i32, %c0_i32_0 : i32, i32, i32
  }
  func.func @transform_2(%arg0: i32) -> (i32, i32, i32) {
    %c0_i32 = arith.constant 0 : i32
    %c0_i32_0 = arith.constant 0 : i32
    %c0_i32_1 = arith.constant 0 : i32
    return %arg0, %c0_i32, %c0_i32_0 : i32, i32, i32
  }
  func.func @transform_3(%arg0: i32) -> (i32, i32, i32, i32) {
    %c0_i32 = arith.constant 0 : i32
    %c0_i32_0 = arith.constant 0 : i32
    %c0_i32_1 = arith.constant 0 : i32
    %c0_i32_2 = arith.constant 0 : i32
    return %arg0, %c0_i32, %c0_i32_0, %c0_i32_1 : i32, i32, i32, i32
  }
  func.func @transform_4(%arg0: i32) -> (i32, i32, i32) {
    %c0_i32 = arith.constant 0 : i32
    %c0_i32_0 = arith.constant 0 : i32
    %c0_i32_1 = arith.constant 0 : i32
    return %arg0, %c0_i32, %c0_i32_0 : i32, i32, i32
  }
}

module attributes {stable_mosaic.version = 11 : i64} {
  func.func @_bigru_layer_kernel(%arg0: i32, %arg1: memref<3x8x2x32xf32, #tpu.memory_space<vmem>>, %arg2: memref<3x32x32xbf16, #tpu.memory_space<vmem>>, %arg3: memref<1x1x32xf32, #tpu.memory_space<vmem>>, %arg4: memref<1x8x2x32xf32, #tpu.memory_space<vmem>>, %arg5: memref<1x2x32xf32, #tpu.memory_space<vmem>>, %arg6: memref<2x32xf32, #tpu.memory_space<vmem>>) attributes {dimension_semantics = [#tpu.dimension_semantics<parallel>], iteration_bounds = array<i64: 2>, scalar_prefetch = 0 : i64, scratch_operands = 1 : i64, tpu.core_type = #tpu.core_type<tc>, window_params = [{transform_indices = @transform_0, window_bounds = array<i64: 3, 8, 2, 32>}, {transform_indices = @transform_1, window_bounds = array<i64: 3, 32, 32>}, {transform_indices = @transform_2, window_bounds = array<i64: 1, 1, 32>}, {transform_indices = @transform_3, window_bounds = array<i64: 1, 8, 2, 32>}, {transform_indices = @transform_4, window_bounds = array<i64: 1, 2, 32>}]} {
    %c0 = arith.constant 0 : index
    %c0_0 = arith.constant 0 : index
    %c0_1 = arith.constant 0 : index
    %0 = vector.load %arg2[%c0, %c0_0, %c0_1] : memref<3x32x32xbf16, #tpu.memory_space<vmem>>, vector<1x32x32xbf16>
    %1 = vector.shape_cast %0 : vector<1x32x32xbf16> to vector<32x32xbf16>
    %c1 = arith.constant 1 : index
    %c0_2 = arith.constant 0 : index
    %c0_3 = arith.constant 0 : index
    %2 = vector.load %arg2[%c1, %c0_2, %c0_3] : memref<3x32x32xbf16, #tpu.memory_space<vmem>>, vector<1x32x32xbf16>
    %3 = vector.shape_cast %2 : vector<1x32x32xbf16> to vector<32x32xbf16>
    %c2 = arith.constant 2 : index
    %c0_4 = arith.constant 0 : index
    %c0_5 = arith.constant 0 : index
    %4 = vector.load %arg2[%c2, %c0_4, %c0_5] : memref<3x32x32xbf16, #tpu.memory_space<vmem>>, vector<1x32x32xbf16>
    %5 = vector.shape_cast %4 : vector<1x32x32xbf16> to vector<32x32xbf16>
    %c0_6 = arith.constant 0 : index
    %c0_7 = arith.constant 0 : index
    %c0_8 = arith.constant 0 : index
    %6 = vector.load %arg3[%c0_6, %c0_7, %c0_8] : memref<1x1x32xf32, #tpu.memory_space<vmem>>, vector<1x1x32xf32>
    %7 = vector.shape_cast %6 : vector<1x1x32xf32> to vector<1x32xf32>
    %cst = arith.constant 0.000000e+00 : f32
    %8 = vector.broadcast %cst : f32 to vector<2x32xf32>
    %c0_9 = arith.constant 0 : index
    %c0_10 = arith.constant 0 : index
    %9 = vector.load %arg6[%c0_9, %c0_10] : memref<2x32xf32, #tpu.memory_space<vmem>>, vector<2x32xf32>
    tpu.vector_store %arg6[%c0_9, %c0_10], %8 {strides = array<i32>} : memref<2x32xf32, #tpu.memory_space<vmem>>, vector<2x32xf32>,
    %c0_i32 = arith.constant 0 : i32
    %c0_i32_11 = arith.constant 0 : i32
    %10 = arith.cmpi eq, %arg0, %c0_i32_11 : i32
    %c7_i32 = arith.constant 7 : i32
    %11 = arith.subi %c7_i32, %c0_i32 : i32
    %12 = arith.select %10, %c0_i32, %11 : i32
    %c0_12 = arith.constant 0 : index
    %c0_13 = arith.constant 0 : index
    %13 = vector.load %arg6[%c0_12, %c0_13] : memref<2x32xf32, #tpu.memory_space<vmem>>, vector<2x32xf32>
    %14 = arith.truncf %13 : vector<2x32xf32> to vector<2x32xbf16>
    %cst_14 = arith.constant dense<0.000000e+00> : vector<2x32xf32>
    %15 = tpu.matmul %14, %1, %cst_14 {dimension_numbers = #tpu.dot_dimension_numbers<[1], [0], [0], [1], [0, 0, 1, 1], [], []>} : vector<2x32xbf16>, vector<32x32xbf16>, vector<2x32xf32> -> vector<2x32xf32>
    %cst_15 = arith.constant dense<0.000000e+00> : vector<2x32xf32>
    %16 = tpu.matmul %14, %3, %cst_15 {dimension_numbers = #tpu.dot_dimension_numbers<[1], [0], [0], [1], [0, 0, 1, 1], [], []>} : vector<2x32xbf16>, vector<32x32xbf16>, vector<2x32xf32> -> vector<2x32xf32>
    %cst_16 = arith.constant dense<0.000000e+00> : vector<2x32xf32>
    %17 = tpu.matmul %14, %5, %cst_16 {dimension_numbers = #tpu.dot_dimension_numbers<[1], [0], [0], [1], [0, 0, 1, 1], [], []>} : vector<2x32xbf16>, vector<32x32xbf16>, vector<2x32xf32> -> vector<2x32xf32>
    %18 = vector.broadcast %7 : vector<1x32xf32> to vector<2x32xf32>
    %19 = arith.addf %17, %18 : vector<2x32xf32>
    %c0_17 = arith.constant 0 : index
    %20 = arith.index_cast %12 : i32 to index
    %c0_18 = arith.constant 0 : index
    %c0_19 = arith.constant 0 : index
    %21 = vector.load %arg1[%c0_17, %20, %c0_18, %c0_19] : memref<3x8x2x32xf32, #tpu.memory_space<vmem>>, vector<1x1x2x32xf32>
    %22 = vector.shape_cast %21 : vector<1x1x2x32xf32> to vector<2x32xf32>
    %23 = arith.addf %22, %15 : vector<2x32xf32>
    %24 = arith.negf %23 : vector<2x32xf32>
    %25 = math.exp %24 : vector<2x32xf32>
    %cst_20 = arith.constant 1.000000e+00 : f32
    %26 = vector.broadcast %cst_20 : f32 to vector<2x32xf32>
    %27 = arith.addf %26, %25 : vector<2x32xf32>
    %28 = arith.divf %26, %27 : vector<2x32xf32>
    %c1_21 = arith.constant 1 : index
    %29 = arith.index_cast %12 : i32 to index
    %c0_22 = arith.constant 0 : index
    %c0_23 = arith.constant 0 : index
    %30 = vector.load %arg1[%c1_21, %29, %c0_22, %c0_23] : memref<3x8x2x32xf32, #tpu.memory_space<vmem>>, vector<1x1x2x32xf32>
    %31 = vector.shape_cast %30 : vector<1x1x2x32xf32> to vector<2x32xf32>
    %32 = arith.addf %31, %16 : vector<2x32xf32>
    %33 = arith.negf %32 : vector<2x32xf32>
    %34 = math.exp %33 : vector<2x32xf32>
    %cst_24 = arith.constant 1.000000e+00 : f32
    %35 = vector.broadcast %cst_24 : f32 to vector<2x32xf32>
    %36 = arith.addf %35, %34 : vector<2x32xf32>
    %37 = arith.divf %35, %36 : vector<2x32xf32>
    %c2_25 = arith.constant 2 : index
    %38 = arith.index_cast %12 : i32 to index
    %c0_26 = arith.constant 0 : index
    %c0_27 = arith.constant 0 : index
    %39 = vector.load %arg1[%c2_25, %38, %c0_26, %c0_27] : memref<3x8x2x32xf32, #tpu.memory_space<vmem>>, vector<1x1x2x32xf32>
    %40 = vector.shape_cast %39 : vector<1x1x2x32xf32> to vector<2x32xf32>
    %41 = arith.mulf %28, %19 : vector<2x32xf32>
    %42 = arith.addf %40, %41 : vector<2x32xf32>
    %43 = math.tanh %42 : vector<2x32xf32>
    %cst_28 = arith.constant 1.000000e+00 : f32
    %44 = vector.broadcast %cst_28 : f32 to vector<2x32xf32>
    %45 = arith.subf %44, %37 : vector<2x32xf32>
    %46 = arith.mulf %45, %43 : vector<2x32xf32>
    %47 = arith.mulf %37, %13 : vector<2x32xf32>
    %48 = arith.addf %46, %47 : vector<2x32xf32>
    %c0_29 = arith.constant 0 : index
    %c0_30 = arith.constant 0 : index
    %49 = vector.load %arg6[%c0_29, %c0_30] : memref<2x32xf32, #tpu.memory_space<vmem>>, vector<2x32xf32>
    tpu.vector_store %arg6[%c0_29, %c0_30], %48 {strides = array<i32>} : memref<2x32xf32, #tpu.memory_space<vmem>>, vector<2x32xf32>,
    %c0_31 = arith.constant 0 : index
    %50 = arith.index_cast %12 : i32 to index
    %c0_32 = arith.constant 0 : index
    %c0_33 = arith.constant 0 : index
    %51 = vector.load %arg4[%c0_31, %50, %c0_32, %c0_33] : memref<1x8x2x32xf32, #tpu.memory_space<vmem>>, vector<1x1x2x32xf32>
    %52 = vector.shape_cast %51 : vector<1x1x2x32xf32> to vector<2x32xf32>
    %53 = vector.shape_cast %48 : vector<2x32xf32> to vector<1x1x2x32xf32>
    tpu.vector_store %arg4[%c0_31, %50, %c0_32, %c0_33], %53 {strides = array<i32>} : memref<1x8x2x32xf32, #tpu.memory_space<vmem>>, vector<1x1x2x32xf32>,
    %c1_i32 = arith.constant 1 : i32
    %c0_i32_34 = arith.constant 0 : i32
    %54 = arith.cmpi eq, %arg0, %c0_i32_34 : i32
    %c7_i32_35 = arith.constant 7 : i32
    %55 = arith.subi %c7_i32_35, %c1_i32 : i32
    %56 = arith.select %54, %c1_i32, %55 : i32
    %c0_36 = arith.constant 0 : index
    %c0_37 = arith.constant 0 : index
    %57 = vector.load %arg6[%c0_36, %c0_37] : memref<2x32xf32, #tpu.memory_space<vmem>>, vector<2x32xf32>
    %58 = arith.truncf %57 : vector<2x32xf32> to vector<2x32xbf16>
    %cst_38 = arith.constant dense<0.000000e+00> : vector<2x32xf32>
    %59 = tpu.matmul %58, %1, %cst_38 {dimension_numbers = #tpu.dot_dimension_numbers<[1], [0], [0], [1], [0, 0, 1, 1], [], []>} : vector<2x32xbf16>, vector<32x32xbf16>, vector<2x32xf32> -> vector<2x32xf32>
    %cst_39 = arith.constant dense<0.000000e+00> : vector<2x32xf32>
    %60 = tpu.matmul %58, %3, %cst_39 {dimension_numbers = #tpu.dot_dimension_numbers<[1], [0], [0], [1], [0, 0, 1, 1], [], []>} : vector<2x32xbf16>, vector<32x32xbf16>, vector<2x32xf32> -> vector<2x32xf32>
    %cst_40 = arith.constant dense<0.000000e+00> : vector<2x32xf32>
    %61 = tpu.matmul %58, %5, %cst_40 {dimension_numbers = #tpu.dot_dimension_numbers<[1], [0], [0], [1], [0, 0, 1, 1], [], []>} : vector<2x32xbf16>, vector<32x32xbf16>, vector<2x32xf32> -> vector<2x32xf32>
    %62 = vector.broadcast %7 : vector<1x32xf32> to vector<2x32xf32>
    %63 = arith.addf %61, %62 : vector<2x32xf32>
    %c0_41 = arith.constant 0 : index
    %64 = arith.index_cast %56 : i32 to index
    %c0_42 = arith.constant 0 : index
    %c0_43 = arith.constant 0 : index
    %65 = vector.load %arg1[%c0_41, %64, %c0_42, %c0_43] : memref<3x8x2x32xf32, #tpu.memory_space<vmem>>, vector<1x1x2x32xf32>
    %66 = vector.shape_cast %65 : vector<1x1x2x32xf32> to vector<2x32xf32>
    %67 = arith.addf %66, %59 : vector<2x32xf32>
    %68 = arith.negf %67 : vector<2x32xf32>
    %69 = math.exp %68 : vector<2x32xf32>
    %cst_44 = arith.constant 1.000000e+00 : f32
    %70 = vector.broadcast %cst_44 : f32 to vector<2x32xf32>
    %71 = arith.addf %70, %69 : vector<2x32xf32>
    %72 = arith.divf %70, %71 : vector<2x32xf32>
    %c1_45 = arith.constant 1 : index
    %73 = arith.index_cast %56 : i32 to index
    %c0_46 = arith.constant 0 : index
    %c0_47 = arith.constant 0 : index
    %74 = vector.load %arg1[%c1_45, %73, %c0_46, %c0_47] : memref<3x8x2x32xf32, #tpu.memory_space<vmem>>, vector<1x1x2x32xf32>
    %75 = vector.shape_cast %74 : vector<1x1x2x32xf32> to vector<2x32xf32>
    %76 = arith.addf %75, %60 : vector<2x32xf32>
    %77 = arith.negf %76 : vector<2x32xf32>
    %78 = math.exp %77 : vector<2x32xf32>
    %cst_48 = arith.constant 1.000000e+00 : f32
    %79 = vector.broadcast %cst_48 : f32 to vector<2x32xf32>
    %80 = arith.addf %79, %78 : vector<2x32xf32>
    %81 = arith.divf %79, %80 : vector<2x32xf32>
    %c2_49 = arith.constant 2 : index
    %82 = arith.index_cast %56 : i32 to index
    %c0_50 = arith.constant 0 : index
    %c0_51 = arith.constant 0 : index
    %83 = vector.load %arg1[%c2_49, %82, %c0_50, %c0_51] : memref<3x8x2x32xf32, #tpu.memory_space<vmem>>, vector<1x1x2x32xf32>
    %84 = vector.shape_cast %83 : vector<1x1x2x32xf32> to vector<2x32xf32>
    %85 = arith.mulf %72, %63 : vector<2x32xf32>
    %86 = arith.addf %84, %85 : vector<2x32xf32>
    %87 = math.tanh %86 : vector<2x32xf32>
    %cst_52 = arith.constant 1.000000e+00 : f32
    %88 = vector.broadcast %cst_52 : f32 to vector<2x32xf32>
    %89 = arith.subf %88, %81 : vector<2x32xf32>
    %90 = arith.mulf %89, %87 : vector<2x32xf32>
    %91 = arith.mulf %81, %57 : vector<2x32xf32>
    %92 = arith.addf %90, %91 : vector<2x32xf32>
    %c0_53 = arith.constant 0 : index
    %c0_54 = arith.constant 0 : index
    %93 = vector.load %arg6[%c0_53, %c0_54] : memref<2x32xf32, #tpu.memory_space<vmem>>, vector<2x32xf32>
    tpu.vector_store %arg6[%c0_53, %c0_54], %92 {strides = array<i32>} : memref<2x32xf32, #tpu.memory_space<vmem>>, vector<2x32xf32>,
    %c0_55 = arith.constant 0 : index
    %94 = arith.index_cast %56 : i32 to index
    %c0_56 = arith.constant 0 : index
    %c0_57 = arith.constant 0 : index
    %95 = vector.load %arg4[%c0_55, %94, %c0_56, %c0_57] : memref<1x8x2x32xf32, #tpu.memory_space<vmem>>, vector<1x1x2x32xf32>
    %96 = vector.shape_cast %95 : vector<1x1x2x32xf32> to vector<2x32xf32>
    %97 = vector.shape_cast %92 : vector<2x32xf32> to vector<1x1x2x32xf32>
    tpu.vector_store %arg4[%c0_55, %94, %c0_56, %c0_57], %97 {strides = array<i32>} : memref<1x8x2x32xf32, #tpu.memory_space<vmem>>, vector<1x1x2x32xf32>,
    %c2_i32 = arith.constant 2 : i32
    %c0_i32_58 = arith.constant 0 : i32
    %98 = arith.cmpi eq, %arg0, %c0_i32_58 : i32
    %c7_i32_59 = arith.constant 7 : i32
    %99 = arith.subi %c7_i32_59, %c2_i32 : i32
    %100 = arith.select %98, %c2_i32, %99 : i32
    %c0_60 = arith.constant 0 : index
    %c0_61 = arith.constant 0 : index
    %101 = vector.load %arg6[%c0_60, %c0_61] : memref<2x32xf32, #tpu.memory_space<vmem>>, vector<2x32xf32>
    %102 = arith.truncf %101 : vector<2x32xf32> to vector<2x32xbf16>
    %cst_62 = arith.constant dense<0.000000e+00> : vector<2x32xf32>
    %103 = tpu.matmul %102, %1, %cst_62 {dimension_numbers = #tpu.dot_dimension_numbers<[1], [0], [0], [1], [0, 0, 1, 1], [], []>} : vector<2x32xbf16>, vector<32x32xbf16>, vector<2x32xf32> -> vector<2x32xf32>
    %cst_63 = arith.constant dense<0.000000e+00> : vector<2x32xf32>
    %104 = tpu.matmul %102, %3, %cst_63 {dimension_numbers = #tpu.dot_dimension_numbers<[1], [0], [0], [1], [0, 0, 1, 1], [], []>} : vector<2x32xbf16>, vector<32x32xbf16>, vector<2x32xf32> -> vector<2x32xf32>
    %cst_64 = arith.constant dense<0.000000e+00> : vector<2x32xf32>
    %105 = tpu.matmul %102, %5, %cst_64 {dimension_numbers = #tpu.dot_dimension_numbers<[1], [0], [0], [1], [0, 0, 1, 1], [], []>} : vector<2x32xbf16>, vector<32x32xbf16>, vector<2x32xf32> -> vector<2x32xf32>
    %106 = vector.broadcast %7 : vector<1x32xf32> to vector<2x32xf32>
    %107 = arith.addf %105, %106 : vector<2x32xf32>
    %c0_65 = arith.constant 0 : index
    %108 = arith.index_cast %100 : i32 to index
    %c0_66 = arith.constant 0 : index
    %c0_67 = arith.constant 0 : index
    %109 = vector.load %arg1[%c0_65, %108, %c0_66, %c0_67] : memref<3x8x2x32xf32, #tpu.memory_space<vmem>>, vector<1x1x2x32xf32>
    %110 = vector.shape_cast %109 : vector<1x1x2x32xf32> to vector<2x32xf32>
    %111 = arith.addf %110, %103 : vector<2x32xf32>
    %112 = arith.negf %111 : vector<2x32xf32>
    %113 = math.exp %112 : vector<2x32xf32>
    %cst_68 = arith.constant 1.000000e+00 : f32
    %114 = vector.broadcast %cst_68 : f32 to vector<2x32xf32>
    %115 = arith.addf %114, %113 : vector<2x32xf32>
    %116 = arith.divf %114, %115 : vector<2x32xf32>
    %c1_69 = arith.constant 1 : index
    %117 = arith.index_cast %100 : i32 to index
    %c0_70 = arith.constant 0 : index
    %c0_71 = arith.constant 0 : index
    %118 = vector.load %arg1[%c1_69, %117, %c0_70, %c0_71] : memref<3x8x2x32xf32, #tpu.memory_space<vmem>>, vector<1x1x2x32xf32>
    %119 = vector.shape_cast %118 : vector<1x1x2x32xf32> to vector<2x32xf32>
    %120 = arith.addf %119, %104 : vector<2x32xf32>
    %121 = arith.negf %120 : vector<2x32xf32>
    %122 = math.exp %121 : vector<2x32xf32>
    %cst_72 = arith.constant 1.000000e+00 : f32
    %123 = vector.broadcast %cst_72 : f32 to vector<2x32xf32>
    %124 = arith.addf %123, %122 : vector<2x32xf32>
    %125 = arith.divf %123, %124 : vector<2x32xf32>
    %c2_73 = arith.constant 2 : index
    %126 = arith.index_cast %100 : i32 to index
    %c0_74 = arith.constant 0 : index
    %c0_75 = arith.constant 0 : index
    %127 = vector.load %arg1[%c2_73, %126, %c0_74, %c0_75] : memref<3x8x2x32xf32, #tpu.memory_space<vmem>>, vector<1x1x2x32xf32>
    %128 = vector.shape_cast %127 : vector<1x1x2x32xf32> to vector<2x32xf32>
    %129 = arith.mulf %116, %107 : vector<2x32xf32>
    %130 = arith.addf %128, %129 : vector<2x32xf32>
    %131 = math.tanh %130 : vector<2x32xf32>
    %cst_76 = arith.constant 1.000000e+00 : f32
    %132 = vector.broadcast %cst_76 : f32 to vector<2x32xf32>
    %133 = arith.subf %132, %125 : vector<2x32xf32>
    %134 = arith.mulf %133, %131 : vector<2x32xf32>
    %135 = arith.mulf %125, %101 : vector<2x32xf32>
    %136 = arith.addf %134, %135 : vector<2x32xf32>
    %c0_77 = arith.constant 0 : index
    %c0_78 = arith.constant 0 : index
    %137 = vector.load %arg6[%c0_77, %c0_78] : memref<2x32xf32, #tpu.memory_space<vmem>>, vector<2x32xf32>
    tpu.vector_store %arg6[%c0_77, %c0_78], %136 {strides = array<i32>} : memref<2x32xf32, #tpu.memory_space<vmem>>, vector<2x32xf32>,
    %c0_79 = arith.constant 0 : index
    %138 = arith.index_cast %100 : i32 to index
    %c0_80 = arith.constant 0 : index
    %c0_81 = arith.constant 0 : index
    %139 = vector.load %arg4[%c0_79, %138, %c0_80, %c0_81] : memref<1x8x2x32xf32, #tpu.memory_space<vmem>>, vector<1x1x2x32xf32>
    %140 = vector.shape_cast %139 : vector<1x1x2x32xf32> to vector<2x32xf32>
    %141 = vector.shape_cast %136 : vector<2x32xf32> to vector<1x1x2x32xf32>
    tpu.vector_store %arg4[%c0_79, %138, %c0_80, %c0_81], %141 {strides = array<i32>} : memref<1x8x2x32xf32, #tpu.memory_space<vmem>>, vector<1x1x2x32xf32>,
    %c3_i32 = arith.constant 3 : i32
    %c0_i32_82 = arith.constant 0 : i32
    %142 = arith.cmpi eq, %arg0, %c0_i32_82 : i32
    %c7_i32_83 = arith.constant 7 : i32
    %143 = arith.subi %c7_i32_83, %c3_i32 : i32
    %144 = arith.select %142, %c3_i32, %143 : i32
    %c0_84 = arith.constant 0 : index
    %c0_85 = arith.constant 0 : index
    %145 = vector.load %arg6[%c0_84, %c0_85] : memref<2x32xf32, #tpu.memory_space<vmem>>, vector<2x32xf32>
    %146 = arith.truncf %145 : vector<2x32xf32> to vector<2x32xbf16>
    %cst_86 = arith.constant dense<0.000000e+00> : vector<2x32xf32>
    %147 = tpu.matmul %146, %1, %cst_86 {dimension_numbers = #tpu.dot_dimension_numbers<[1], [0], [0], [1], [0, 0, 1, 1], [], []>} : vector<2x32xbf16>, vector<32x32xbf16>, vector<2x32xf32> -> vector<2x32xf32>
    %cst_87 = arith.constant dense<0.000000e+00> : vector<2x32xf32>
    %148 = tpu.matmul %146, %3, %cst_87 {dimension_numbers = #tpu.dot_dimension_numbers<[1], [0], [0], [1], [0, 0, 1, 1], [], []>} : vector<2x32xbf16>, vector<32x32xbf16>, vector<2x32xf32> -> vector<2x32xf32>
    %cst_88 = arith.constant dense<0.000000e+00> : vector<2x32xf32>
    %149 = tpu.matmul %146, %5, %cst_88 {dimension_numbers = #tpu.dot_dimension_numbers<[1], [0], [0], [1], [0, 0, 1, 1], [], []>} : vector<2x32xbf16>, vector<32x32xbf16>, vector<2x32xf32> -> vector<2x32xf32>
    %150 = vector.broadcast %7 : vector<1x32xf32> to vector<2x32xf32>
    %151 = arith.addf %149, %150 : vector<2x32xf32>
    %c0_89 = arith.constant 0 : index
    %152 = arith.index_cast %144 : i32 to index
    %c0_90 = arith.constant 0 : index
    %c0_91 = arith.constant 0 : index
    %153 = vector.load %arg1[%c0_89, %152, %c0_90, %c0_91] : memref<3x8x2x32xf32, #tpu.memory_space<vmem>>, vector<1x1x2x32xf32>
    %154 = vector.shape_cast %153 : vector<1x1x2x32xf32> to vector<2x32xf32>
    %155 = arith.addf %154, %147 : vector<2x32xf32>
    %156 = arith.negf %155 : vector<2x32xf32>
    %157 = math.exp %156 : vector<2x32xf32>
    %cst_92 = arith.constant 1.000000e+00 : f32
    %158 = vector.broadcast %cst_92 : f32 to vector<2x32xf32>
    %159 = arith.addf %158, %157 : vector<2x32xf32>
    %160 = arith.divf %158, %159 : vector<2x32xf32>
    %c1_93 = arith.constant 1 : index
    %161 = arith.index_cast %144 : i32 to index
    %c0_94 = arith.constant 0 : index
    %c0_95 = arith.constant 0 : index
    %162 = vector.load %arg1[%c1_93, %161, %c0_94, %c0_95] : memref<3x8x2x32xf32, #tpu.memory_space<vmem>>, vector<1x1x2x32xf32>
    %163 = vector.shape_cast %162 : vector<1x1x2x32xf32> to vector<2x32xf32>
    %164 = arith.addf %163, %148 : vector<2x32xf32>
    %165 = arith.negf %164 : vector<2x32xf32>
    %166 = math.exp %165 : vector<2x32xf32>
    %cst_96 = arith.constant 1.000000e+00 : f32
    %167 = vector.broadcast %cst_96 : f32 to vector<2x32xf32>
    %168 = arith.addf %167, %166 : vector<2x32xf32>
    %169 = arith.divf %167, %168 : vector<2x32xf32>
    %c2_97 = arith.constant 2 : index
    %170 = arith.index_cast %144 : i32 to index
    %c0_98 = arith.constant 0 : index
    %c0_99 = arith.constant 0 : index
    %171 = vector.load %arg1[%c2_97, %170, %c0_98, %c0_99] : memref<3x8x2x32xf32, #tpu.memory_space<vmem>>, vector<1x1x2x32xf32>
    %172 = vector.shape_cast %171 : vector<1x1x2x32xf32> to vector<2x32xf32>
    %173 = arith.mulf %160, %151 : vector<2x32xf32>
    %174 = arith.addf %172, %173 : vector<2x32xf32>
    %175 = math.tanh %174 : vector<2x32xf32>
    %cst_100 = arith.constant 1.000000e+00 : f32
    %176 = vector.broadcast %cst_100 : f32 to vector<2x32xf32>
    %177 = arith.subf %176, %169 : vector<2x32xf32>
    %178 = arith.mulf %177, %175 : vector<2x32xf32>
    %179 = arith.mulf %169, %145 : vector<2x32xf32>
    %180 = arith.addf %178, %179 : vector<2x32xf32>
    %c0_101 = arith.constant 0 : index
    %c0_102 = arith.constant 0 : index
    %181 = vector.load %arg6[%c0_101, %c0_102] : memref<2x32xf32, #tpu.memory_space<vmem>>, vector<2x32xf32>
    tpu.vector_store %arg6[%c0_101, %c0_102], %180 {strides = array<i32>} : memref<2x32xf32, #tpu.memory_space<vmem>>, vector<2x32xf32>,
    %c0_103 = arith.constant 0 : index
    %182 = arith.index_cast %144 : i32 to index
    %c0_104 = arith.constant 0 : index
    %c0_105 = arith.constant 0 : index
    %183 = vector.load %arg4[%c0_103, %182, %c0_104, %c0_105] : memref<1x8x2x32xf32, #tpu.memory_space<vmem>>, vector<1x1x2x32xf32>
    %184 = vector.shape_cast %183 : vector<1x1x2x32xf32> to vector<2x32xf32>
    %185 = vector.shape_cast %180 : vector<2x32xf32> to vector<1x1x2x32xf32>
    tpu.vector_store %arg4[%c0_103, %182, %c0_104, %c0_105], %185 {strides = array<i32>} : memref<1x8x2x32xf32, #tpu.memory_space<vmem>>, vector<1x1x2x32xf32>,
    %c4_i32 = arith.constant 4 : i32
    %c0_i32_106 = arith.constant 0 : i32
    %186 = arith.cmpi eq, %arg0, %c0_i32_106 : i32
    %c7_i32_107 = arith.constant 7 : i32
    %187 = arith.subi %c7_i32_107, %c4_i32 : i32
    %188 = arith.select %186, %c4_i32, %187 : i32
    %c0_108 = arith.constant 0 : index
    %c0_109 = arith.constant 0 : index
    %189 = vector.load %arg6[%c0_108, %c0_109] : memref<2x32xf32, #tpu.memory_space<vmem>>, vector<2x32xf32>
    %190 = arith.truncf %189 : vector<2x32xf32> to vector<2x32xbf16>
    %cst_110 = arith.constant dense<0.000000e+00> : vector<2x32xf32>
    %191 = tpu.matmul %190, %1, %cst_110 {dimension_numbers = #tpu.dot_dimension_numbers<[1], [0], [0], [1], [0, 0, 1, 1], [], []>} : vector<2x32xbf16>, vector<32x32xbf16>, vector<2x32xf32> -> vector<2x32xf32>
    %cst_111 = arith.constant dense<0.000000e+00> : vector<2x32xf32>
    %192 = tpu.matmul %190, %3, %cst_111 {dimension_numbers = #tpu.dot_dimension_numbers<[1], [0], [0], [1], [0, 0, 1, 1], [], []>} : vector<2x32xbf16>, vector<32x32xbf16>, vector<2x32xf32> -> vector<2x32xf32>
    %cst_112 = arith.constant dense<0.000000e+00> : vector<2x32xf32>
    %193 = tpu.matmul %190, %5, %cst_112 {dimension_numbers = #tpu.dot_dimension_numbers<[1], [0], [0], [1], [0, 0, 1, 1], [], []>} : vector<2x32xbf16>, vector<32x32xbf16>, vector<2x32xf32> -> vector<2x32xf32>
    %194 = vector.broadcast %7 : vector<1x32xf32> to vector<2x32xf32>
    %195 = arith.addf %193, %194 : vector<2x32xf32>
    %c0_113 = arith.constant 0 : index
    %196 = arith.index_cast %188 : i32 to index
    %c0_114 = arith.constant 0 : index
    %c0_115 = arith.constant 0 : index
    %197 = vector.load %arg1[%c0_113, %196, %c0_114, %c0_115] : memref<3x8x2x32xf32, #tpu.memory_space<vmem>>, vector<1x1x2x32xf32>
    %198 = vector.shape_cast %197 : vector<1x1x2x32xf32> to vector<2x32xf32>
    %199 = arith.addf %198, %191 : vector<2x32xf32>
    %200 = arith.negf %199 : vector<2x32xf32>
    %201 = math.exp %200 : vector<2x32xf32>
    %cst_116 = arith.constant 1.000000e+00 : f32
    %202 = vector.broadcast %cst_116 : f32 to vector<2x32xf32>
    %203 = arith.addf %202, %201 : vector<2x32xf32>
    %204 = arith.divf %202, %203 : vector<2x32xf32>
    %c1_117 = arith.constant 1 : index
    %205 = arith.index_cast %188 : i32 to index
    %c0_118 = arith.constant 0 : index
    %c0_119 = arith.constant 0 : index
    %206 = vector.load %arg1[%c1_117, %205, %c0_118, %c0_119] : memref<3x8x2x32xf32, #tpu.memory_space<vmem>>, vector<1x1x2x32xf32>
    %207 = vector.shape_cast %206 : vector<1x1x2x32xf32> to vector<2x32xf32>
    %208 = arith.addf %207, %192 : vector<2x32xf32>
    %209 = arith.negf %208 : vector<2x32xf32>
    %210 = math.exp %209 : vector<2x32xf32>
    %cst_120 = arith.constant 1.000000e+00 : f32
    %211 = vector.broadcast %cst_120 : f32 to vector<2x32xf32>
    %212 = arith.addf %211, %210 : vector<2x32xf32>
    %213 = arith.divf %211, %212 : vector<2x32xf32>
    %c2_121 = arith.constant 2 : index
    %214 = arith.index_cast %188 : i32 to index
    %c0_122 = arith.constant 0 : index
    %c0_123 = arith.constant 0 : index
    %215 = vector.load %arg1[%c2_121, %214, %c0_122, %c0_123] : memref<3x8x2x32xf32, #tpu.memory_space<vmem>>, vector<1x1x2x32xf32>
    %216 = vector.shape_cast %215 : vector<1x1x2x32xf32> to vector<2x32xf32>
    %217 = arith.mulf %204, %195 : vector<2x32xf32>
    %218 = arith.addf %216, %217 : vector<2x32xf32>
    %219 = math.tanh %218 : vector<2x32xf32>
    %cst_124 = arith.constant 1.000000e+00 : f32
    %220 = vector.broadcast %cst_124 : f32 to vector<2x32xf32>
    %221 = arith.subf %220, %213 : vector<2x32xf32>
    %222 = arith.mulf %221, %219 : vector<2x32xf32>
    %223 = arith.mulf %213, %189 : vector<2x32xf32>
    %224 = arith.addf %222, %223 : vector<2x32xf32>
    %c0_125 = arith.constant 0 : index
    %c0_126 = arith.constant 0 : index
    %225 = vector.load %arg6[%c0_125, %c0_126] : memref<2x32xf32, #tpu.memory_space<vmem>>, vector<2x32xf32>
    tpu.vector_store %arg6[%c0_125, %c0_126], %224 {strides = array<i32>} : memref<2x32xf32, #tpu.memory_space<vmem>>, vector<2x32xf32>,
    %c0_127 = arith.constant 0 : index
    %226 = arith.index_cast %188 : i32 to index
    %c0_128 = arith.constant 0 : index
    %c0_129 = arith.constant 0 : index
    %227 = vector.load %arg4[%c0_127, %226, %c0_128, %c0_129] : memref<1x8x2x32xf32, #tpu.memory_space<vmem>>, vector<1x1x2x32xf32>
    %228 = vector.shape_cast %227 : vector<1x1x2x32xf32> to vector<2x32xf32>
    %229 = vector.shape_cast %224 : vector<2x32xf32> to vector<1x1x2x32xf32>
    tpu.vector_store %arg4[%c0_127, %226, %c0_128, %c0_129], %229 {strides = array<i32>} : memref<1x8x2x32xf32, #tpu.memory_space<vmem>>, vector<1x1x2x32xf32>,
    %c5_i32 = arith.constant 5 : i32
    %c0_i32_130 = arith.constant 0 : i32
    %230 = arith.cmpi eq, %arg0, %c0_i32_130 : i32
    %c7_i32_131 = arith.constant 7 : i32
    %231 = arith.subi %c7_i32_131, %c5_i32 : i32
    %232 = arith.select %230, %c5_i32, %231 : i32
    %c0_132 = arith.constant 0 : index
    %c0_133 = arith.constant 0 : index
    %233 = vector.load %arg6[%c0_132, %c0_133] : memref<2x32xf32, #tpu.memory_space<vmem>>, vector<2x32xf32>
    %234 = arith.truncf %233 : vector<2x32xf32> to vector<2x32xbf16>
    %cst_134 = arith.constant dense<0.000000e+00> : vector<2x32xf32>
    %235 = tpu.matmul %234, %1, %cst_134 {dimension_numbers = #tpu.dot_dimension_numbers<[1], [0], [0], [1], [0, 0, 1, 1], [], []>} : vector<2x32xbf16>, vector<32x32xbf16>, vector<2x32xf32> -> vector<2x32xf32>
    %cst_135 = arith.constant dense<0.000000e+00> : vector<2x32xf32>
    %236 = tpu.matmul %234, %3, %cst_135 {dimension_numbers = #tpu.dot_dimension_numbers<[1], [0], [0], [1], [0, 0, 1, 1], [], []>} : vector<2x32xbf16>, vector<32x32xbf16>, vector<2x32xf32> -> vector<2x32xf32>
    %cst_136 = arith.constant dense<0.000000e+00> : vector<2x32xf32>
    %237 = tpu.matmul %234, %5, %cst_136 {dimension_numbers = #tpu.dot_dimension_numbers<[1], [0], [0], [1], [0, 0, 1, 1], [], []>} : vector<2x32xbf16>, vector<32x32xbf16>, vector<2x32xf32> -> vector<2x32xf32>
    %238 = vector.broadcast %7 : vector<1x32xf32> to vector<2x32xf32>
    %239 = arith.addf %237, %238 : vector<2x32xf32>
    %c0_137 = arith.constant 0 : index
    %240 = arith.index_cast %232 : i32 to index
    %c0_138 = arith.constant 0 : index
    %c0_139 = arith.constant 0 : index
    %241 = vector.load %arg1[%c0_137, %240, %c0_138, %c0_139] : memref<3x8x2x32xf32, #tpu.memory_space<vmem>>, vector<1x1x2x32xf32>
    %242 = vector.shape_cast %241 : vector<1x1x2x32xf32> to vector<2x32xf32>
    %243 = arith.addf %242, %235 : vector<2x32xf32>
    %244 = arith.negf %243 : vector<2x32xf32>
    %245 = math.exp %244 : vector<2x32xf32>
    %cst_140 = arith.constant 1.000000e+00 : f32
    %246 = vector.broadcast %cst_140 : f32 to vector<2x32xf32>
    %247 = arith.addf %246, %245 : vector<2x32xf32>
    %248 = arith.divf %246, %247 : vector<2x32xf32>
    %c1_141 = arith.constant 1 : index
    %249 = arith.index_cast %232 : i32 to index
    %c0_142 = arith.constant 0 : index
    %c0_143 = arith.constant 0 : index
    %250 = vector.load %arg1[%c1_141, %249, %c0_142, %c0_143] : memref<3x8x2x32xf32, #tpu.memory_space<vmem>>, vector<1x1x2x32xf32>
    %251 = vector.shape_cast %250 : vector<1x1x2x32xf32> to vector<2x32xf32>
    %252 = arith.addf %251, %236 : vector<2x32xf32>
    %253 = arith.negf %252 : vector<2x32xf32>
    %254 = math.exp %253 : vector<2x32xf32>
    %cst_144 = arith.constant 1.000000e+00 : f32
    %255 = vector.broadcast %cst_144 : f32 to vector<2x32xf32>
    %256 = arith.addf %255, %254 : vector<2x32xf32>
    %257 = arith.divf %255, %256 : vector<2x32xf32>
    %c2_145 = arith.constant 2 : index
    %258 = arith.index_cast %232 : i32 to index
    %c0_146 = arith.constant 0 : index
    %c0_147 = arith.constant 0 : index
    %259 = vector.load %arg1[%c2_145, %258, %c0_146, %c0_147] : memref<3x8x2x32xf32, #tpu.memory_space<vmem>>, vector<1x1x2x32xf32>
    %260 = vector.shape_cast %259 : vector<1x1x2x32xf32> to vector<2x32xf32>
    %261 = arith.mulf %248, %239 : vector<2x32xf32>
    %262 = arith.addf %260, %261 : vector<2x32xf32>
    %263 = math.tanh %262 : vector<2x32xf32>
    %cst_148 = arith.constant 1.000000e+00 : f32
    %264 = vector.broadcast %cst_148 : f32 to vector<2x32xf32>
    %265 = arith.subf %264, %257 : vector<2x32xf32>
    %266 = arith.mulf %265, %263 : vector<2x32xf32>
    %267 = arith.mulf %257, %233 : vector<2x32xf32>
    %268 = arith.addf %266, %267 : vector<2x32xf32>
    %c0_149 = arith.constant 0 : index
    %c0_150 = arith.constant 0 : index
    %269 = vector.load %arg6[%c0_149, %c0_150] : memref<2x32xf32, #tpu.memory_space<vmem>>, vector<2x32xf32>
    tpu.vector_store %arg6[%c0_149, %c0_150], %268 {strides = array<i32>} : memref<2x32xf32, #tpu.memory_space<vmem>>, vector<2x32xf32>,
    %c0_151 = arith.constant 0 : index
    %270 = arith.index_cast %232 : i32 to index
    %c0_152 = arith.constant 0 : index
    %c0_153 = arith.constant 0 : index
    %271 = vector.load %arg4[%c0_151, %270, %c0_152, %c0_153] : memref<1x8x2x32xf32, #tpu.memory_space<vmem>>, vector<1x1x2x32xf32>
    %272 = vector.shape_cast %271 : vector<1x1x2x32xf32> to vector<2x32xf32>
    %273 = vector.shape_cast %268 : vector<2x32xf32> to vector<1x1x2x32xf32>
    tpu.vector_store %arg4[%c0_151, %270, %c0_152, %c0_153], %273 {strides = array<i32>} : memref<1x8x2x32xf32, #tpu.memory_space<vmem>>, vector<1x1x2x32xf32>,
    %c6_i32 = arith.constant 6 : i32
    %c0_i32_154 = arith.constant 0 : i32
    %274 = arith.cmpi eq, %arg0, %c0_i32_154 : i32
    %c7_i32_155 = arith.constant 7 : i32
    %275 = arith.subi %c7_i32_155, %c6_i32 : i32
    %276 = arith.select %274, %c6_i32, %275 : i32
    %c0_156 = arith.constant 0 : index
    %c0_157 = arith.constant 0 : index
    %277 = vector.load %arg6[%c0_156, %c0_157] : memref<2x32xf32, #tpu.memory_space<vmem>>, vector<2x32xf32>
    %278 = arith.truncf %277 : vector<2x32xf32> to vector<2x32xbf16>
    %cst_158 = arith.constant dense<0.000000e+00> : vector<2x32xf32>
    %279 = tpu.matmul %278, %1, %cst_158 {dimension_numbers = #tpu.dot_dimension_numbers<[1], [0], [0], [1], [0, 0, 1, 1], [], []>} : vector<2x32xbf16>, vector<32x32xbf16>, vector<2x32xf32> -> vector<2x32xf32>
    %cst_159 = arith.constant dense<0.000000e+00> : vector<2x32xf32>
    %280 = tpu.matmul %278, %3, %cst_159 {dimension_numbers = #tpu.dot_dimension_numbers<[1], [0], [0], [1], [0, 0, 1, 1], [], []>} : vector<2x32xbf16>, vector<32x32xbf16>, vector<2x32xf32> -> vector<2x32xf32>
    %cst_160 = arith.constant dense<0.000000e+00> : vector<2x32xf32>
    %281 = tpu.matmul %278, %5, %cst_160 {dimension_numbers = #tpu.dot_dimension_numbers<[1], [0], [0], [1], [0, 0, 1, 1], [], []>} : vector<2x32xbf16>, vector<32x32xbf16>, vector<2x32xf32> -> vector<2x32xf32>
    %282 = vector.broadcast %7 : vector<1x32xf32> to vector<2x32xf32>
    %283 = arith.addf %281, %282 : vector<2x32xf32>
    %c0_161 = arith.constant 0 : index
    %284 = arith.index_cast %276 : i32 to index
    %c0_162 = arith.constant 0 : index
    %c0_163 = arith.constant 0 : index
    %285 = vector.load %arg1[%c0_161, %284, %c0_162, %c0_163] : memref<3x8x2x32xf32, #tpu.memory_space<vmem>>, vector<1x1x2x32xf32>
    %286 = vector.shape_cast %285 : vector<1x1x2x32xf32> to vector<2x32xf32>
    %287 = arith.addf %286, %279 : vector<2x32xf32>
    %288 = arith.negf %287 : vector<2x32xf32>
    %289 = math.exp %288 : vector<2x32xf32>
    %cst_164 = arith.constant 1.000000e+00 : f32
    %290 = vector.broadcast %cst_164 : f32 to vector<2x32xf32>
    %291 = arith.addf %290, %289 : vector<2x32xf32>
    %292 = arith.divf %290, %291 : vector<2x32xf32>
    %c1_165 = arith.constant 1 : index
    %293 = arith.index_cast %276 : i32 to index
    %c0_166 = arith.constant 0 : index
    %c0_167 = arith.constant 0 : index
    %294 = vector.load %arg1[%c1_165, %293, %c0_166, %c0_167] : memref<3x8x2x32xf32, #tpu.memory_space<vmem>>, vector<1x1x2x32xf32>
    %295 = vector.shape_cast %294 : vector<1x1x2x32xf32> to vector<2x32xf32>
    %296 = arith.addf %295, %280 : vector<2x32xf32>
    %297 = arith.negf %296 : vector<2x32xf32>
    %298 = math.exp %297 : vector<2x32xf32>
    %cst_168 = arith.constant 1.000000e+00 : f32
    %299 = vector.broadcast %cst_168 : f32 to vector<2x32xf32>
    %300 = arith.addf %299, %298 : vector<2x32xf32>
    %301 = arith.divf %299, %300 : vector<2x32xf32>
    %c2_169 = arith.constant 2 : index
    %302 = arith.index_cast %276 : i32 to index
    %c0_170 = arith.constant 0 : index
    %c0_171 = arith.constant 0 : index
    %303 = vector.load %arg1[%c2_169, %302, %c0_170, %c0_171] : memref<3x8x2x32xf32, #tpu.memory_space<vmem>>, vector<1x1x2x32xf32>
    %304 = vector.shape_cast %303 : vector<1x1x2x32xf32> to vector<2x32xf32>
    %305 = arith.mulf %292, %283 : vector<2x32xf32>
    %306 = arith.addf %304, %305 : vector<2x32xf32>
    %307 = math.tanh %306 : vector<2x32xf32>
    %cst_172 = arith.constant 1.000000e+00 : f32
    %308 = vector.broadcast %cst_172 : f32 to vector<2x32xf32>
    %309 = arith.subf %308, %301 : vector<2x32xf32>
    %310 = arith.mulf %309, %307 : vector<2x32xf32>
    %311 = arith.mulf %301, %277 : vector<2x32xf32>
    %312 = arith.addf %310, %311 : vector<2x32xf32>
    %c0_173 = arith.constant 0 : index
    %c0_174 = arith.constant 0 : index
    %313 = vector.load %arg6[%c0_173, %c0_174] : memref<2x32xf32, #tpu.memory_space<vmem>>, vector<2x32xf32>
    tpu.vector_store %arg6[%c0_173, %c0_174], %312 {strides = array<i32>} : memref<2x32xf32, #tpu.memory_space<vmem>>, vector<2x32xf32>,
    %c0_175 = arith.constant 0 : index
    %314 = arith.index_cast %276 : i32 to index
    %c0_176 = arith.constant 0 : index
    %c0_177 = arith.constant 0 : index
    %315 = vector.load %arg4[%c0_175, %314, %c0_176, %c0_177] : memref<1x8x2x32xf32, #tpu.memory_space<vmem>>, vector<1x1x2x32xf32>
    %316 = vector.shape_cast %315 : vector<1x1x2x32xf32> to vector<2x32xf32>
    %317 = vector.shape_cast %312 : vector<2x32xf32> to vector<1x1x2x32xf32>
    tpu.vector_store %arg4[%c0_175, %314, %c0_176, %c0_177], %317 {strides = array<i32>} : memref<1x8x2x32xf32, #tpu.memory_space<vmem>>, vector<1x1x2x32xf32>,
    %c7_i32_178 = arith.constant 7 : i32
    %c0_i32_179 = arith.constant 0 : i32
    %318 = arith.cmpi eq, %arg0, %c0_i32_179 : i32
    %c7_i32_180 = arith.constant 7 : i32
    %319 = arith.subi %c7_i32_180, %c7_i32_178 : i32
    %320 = arith.select %318, %c7_i32_178, %319 : i32
    %c0_181 = arith.constant 0 : index
    %c0_182 = arith.constant 0 : index
    %321 = vector.load %arg6[%c0_181, %c0_182] : memref<2x32xf32, #tpu.memory_space<vmem>>, vector<2x32xf32>
    %322 = arith.truncf %321 : vector<2x32xf32> to vector<2x32xbf16>
    %cst_183 = arith.constant dense<0.000000e+00> : vector<2x32xf32>
    %323 = tpu.matmul %322, %1, %cst_183 {dimension_numbers = #tpu.dot_dimension_numbers<[1], [0], [0], [1], [0, 0, 1, 1], [], []>} : vector<2x32xbf16>, vector<32x32xbf16>, vector<2x32xf32> -> vector<2x32xf32>
    %cst_184 = arith.constant dense<0.000000e+00> : vector<2x32xf32>
    %324 = tpu.matmul %322, %3, %cst_184 {dimension_numbers = #tpu.dot_dimension_numbers<[1], [0], [0], [1], [0, 0, 1, 1], [], []>} : vector<2x32xbf16>, vector<32x32xbf16>, vector<2x32xf32> -> vector<2x32xf32>
    %cst_185 = arith.constant dense<0.000000e+00> : vector<2x32xf32>
    %325 = tpu.matmul %322, %5, %cst_185 {dimension_numbers = #tpu.dot_dimension_numbers<[1], [0], [0], [1], [0, 0, 1, 1], [], []>} : vector<2x32xbf16>, vector<32x32xbf16>, vector<2x32xf32> -> vector<2x32xf32>
    %326 = vector.broadcast %7 : vector<1x32xf32> to vector<2x32xf32>
    %327 = arith.addf %325, %326 : vector<2x32xf32>
    %c0_186 = arith.constant 0 : index
    %328 = arith.index_cast %320 : i32 to index
    %c0_187 = arith.constant 0 : index
    %c0_188 = arith.constant 0 : index
    %329 = vector.load %arg1[%c0_186, %328, %c0_187, %c0_188] : memref<3x8x2x32xf32, #tpu.memory_space<vmem>>, vector<1x1x2x32xf32>
    %330 = vector.shape_cast %329 : vector<1x1x2x32xf32> to vector<2x32xf32>
    %331 = arith.addf %330, %323 : vector<2x32xf32>
    %332 = arith.negf %331 : vector<2x32xf32>
    %333 = math.exp %332 : vector<2x32xf32>
    %cst_189 = arith.constant 1.000000e+00 : f32
    %334 = vector.broadcast %cst_189 : f32 to vector<2x32xf32>
    %335 = arith.addf %334, %333 : vector<2x32xf32>
    %336 = arith.divf %334, %335 : vector<2x32xf32>
    %c1_190 = arith.constant 1 : index
    %337 = arith.index_cast %320 : i32 to index
    %c0_191 = arith.constant 0 : index
    %c0_192 = arith.constant 0 : index
    %338 = vector.load %arg1[%c1_190, %337, %c0_191, %c0_192] : memref<3x8x2x32xf32, #tpu.memory_space<vmem>>, vector<1x1x2x32xf32>
    %339 = vector.shape_cast %338 : vector<1x1x2x32xf32> to vector<2x32xf32>
    %340 = arith.addf %339, %324 : vector<2x32xf32>
    %341 = arith.negf %340 : vector<2x32xf32>
    %342 = math.exp %341 : vector<2x32xf32>
    %cst_193 = arith.constant 1.000000e+00 : f32
    %343 = vector.broadcast %cst_193 : f32 to vector<2x32xf32>
    %344 = arith.addf %343, %342 : vector<2x32xf32>
    %345 = arith.divf %343, %344 : vector<2x32xf32>
    %c2_194 = arith.constant 2 : index
    %346 = arith.index_cast %320 : i32 to index
    %c0_195 = arith.constant 0 : index
    %c0_196 = arith.constant 0 : index
    %347 = vector.load %arg1[%c2_194, %346, %c0_195, %c0_196] : memref<3x8x2x32xf32, #tpu.memory_space<vmem>>, vector<1x1x2x32xf32>
    %348 = vector.shape_cast %347 : vector<1x1x2x32xf32> to vector<2x32xf32>
    %349 = arith.mulf %336, %327 : vector<2x32xf32>
    %350 = arith.addf %348, %349 : vector<2x32xf32>
    %351 = math.tanh %350 : vector<2x32xf32>
    %cst_197 = arith.constant 1.000000e+00 : f32
    %352 = vector.broadcast %cst_197 : f32 to vector<2x32xf32>
    %353 = arith.subf %352, %345 : vector<2x32xf32>
    %354 = arith.mulf %353, %351 : vector<2x32xf32>
    %355 = arith.mulf %345, %321 : vector<2x32xf32>
    %356 = arith.addf %354, %355 : vector<2x32xf32>
    %c0_198 = arith.constant 0 : index
    %c0_199 = arith.constant 0 : index
    %357 = vector.load %arg6[%c0_198, %c0_199] : memref<2x32xf32, #tpu.memory_space<vmem>>, vector<2x32xf32>
    tpu.vector_store %arg6[%c0_198, %c0_199], %356 {strides = array<i32>} : memref<2x32xf32, #tpu.memory_space<vmem>>, vector<2x32xf32>,
    %c0_200 = arith.constant 0 : index
    %358 = arith.index_cast %320 : i32 to index
    %c0_201 = arith.constant 0 : index
    %c0_202 = arith.constant 0 : index
    %359 = vector.load %arg4[%c0_200, %358, %c0_201, %c0_202] : memref<1x8x2x32xf32, #tpu.memory_space<vmem>>, vector<1x1x2x32xf32>
    %360 = vector.shape_cast %359 : vector<1x1x2x32xf32> to vector<2x32xf32>
    %361 = vector.shape_cast %356 : vector<2x32xf32> to vector<1x1x2x32xf32>
    tpu.vector_store %arg4[%c0_200, %358, %c0_201, %c0_202], %361 {strides = array<i32>} : memref<1x8x2x32xf32, #tpu.memory_space<vmem>>, vector<1x1x2x32xf32>,
    %c8_i32 = arith.constant 8 : i32
    %c0_203 = arith.constant 0 : index
    %c0_204 = arith.constant 0 : index
    %362 = vector.load %arg6[%c0_203, %c0_204] : memref<2x32xf32, #tpu.memory_space<vmem>>, vector<2x32xf32>
    %c0_205 = arith.constant 0 : index
    %c0_206 = arith.constant 0 : index
    %c0_207 = arith.constant 0 : index
    %363 = vector.load %arg5[%c0_205, %c0_206, %c0_207] : memref<1x2x32xf32, #tpu.memory_space<vmem>>, vector<1x2x32xf32>
    %364 = vector.shape_cast %363 : vector<1x2x32xf32> to vector<2x32xf32>
    %365 = vector.shape_cast %362 : vector<2x32xf32> to vector<1x2x32xf32>
    tpu.vector_store %arg5[%c0_205, %c0_206, %c0_207], %365 {strides = array<i32>} : memref<1x2x32xf32, #tpu.memory_space<vmem>>, vector<1x2x32xf32>,
    return
  }
  func.func @transform_0(%arg0: i32) -> (i32, i32, i32, i32) {
    %c0_i32 = arith.constant 0 : i32
    %c0_i32_0 = arith.constant 0 : i32
    %c0_i32_1 = arith.constant 0 : i32
    %c0_i32_2 = arith.constant 0 : i32
    return %arg0, %c0_i32, %c0_i32_0, %c0_i32_1 : i32, i32, i32, i32
  }
  func.func @transform_1(%arg0: i32) -> (i32, i32, i32) {
    %c0_i32 = arith.constant 0 : i32
    %c0_i32_0 = arith.constant 0 : i32
    %c0_i32_1 = arith.constant 0 : i32
    return %arg0, %c0_i32, %c0_i32_0 : i32, i32, i32
  }
  func.func @transform_2(%arg0: i32) -> (i32, i32, i32) {
    %c0_i32 = arith.constant 0 : i32
    %c0_i32_0 = arith.constant 0 : i32
    %c0_i32_1 = arith.constant 0 : i32
    return %arg0, %c0_i32, %c0_i32_0 : i32, i32, i32
  }
  func.func @transform_3(%arg0: i32) -> (i32, i32, i32, i32) {
    %c0_i32 = arith.constant 0 : i32
    %c0_i32_0 = arith.constant 0 : i32
    %c0_i32_1 = arith.constant 0 : i32
    %c0_i32_2 = arith.constant 0 : i32
    return %arg0, %c0_i32, %c0_i32_0, %c0_i32_1 : i32, i32, i32, i32
  }
  func.func @transform_4(%arg0: i32) -> (i32, i32, i32) {
    %c0_i32 = arith.constant 0 : i32
    %c0_i32_0 = arith.constant 0 : i32
    %c0_i32_1 = arith.constant 0 : i32
    return %arg0, %c0_i32, %c0_i32_0 : i32, i32, i32
  }
}

module attributes {stable_mosaic.version = 11 : i64} {
  func.func @_bigru_layer_kernel(%arg0: i32, %arg1: memref<3x8x2x32xf32, #tpu.memory_space<vmem>>, %arg2: memref<3x32x32xbf16, #tpu.memory_space<vmem>>, %arg3: memref<1x1x32xf32, #tpu.memory_space<vmem>>, %arg4: memref<1x8x2x32xf32, #tpu.memory_space<vmem>>, %arg5: memref<1x2x32xf32, #tpu.memory_space<vmem>>, %arg6: memref<2x32xf32, #tpu.memory_space<vmem>>) attributes {dimension_semantics = [#tpu.dimension_semantics<parallel>], iteration_bounds = array<i64: 2>, scalar_prefetch = 0 : i64, scratch_operands = 1 : i64, tpu.core_type = #tpu.core_type<tc>, window_params = [{transform_indices = @transform_0, window_bounds = array<i64: 3, 8, 2, 32>}, {transform_indices = @transform_1, window_bounds = array<i64: 3, 32, 32>}, {transform_indices = @transform_2, window_bounds = array<i64: 1, 1, 32>}, {transform_indices = @transform_3, window_bounds = array<i64: 1, 8, 2, 32>}, {transform_indices = @transform_4, window_bounds = array<i64: 1, 2, 32>}]} {
    %c0 = arith.constant 0 : index
    %c0_0 = arith.constant 0 : index
    %c0_1 = arith.constant 0 : index
    %0 = vector.load %arg2[%c0, %c0_0, %c0_1] : memref<3x32x32xbf16, #tpu.memory_space<vmem>>, vector<1x32x32xbf16>
    %1 = vector.shape_cast %0 : vector<1x32x32xbf16> to vector<32x32xbf16>
    %c1 = arith.constant 1 : index
    %c0_2 = arith.constant 0 : index
    %c0_3 = arith.constant 0 : index
    %2 = vector.load %arg2[%c1, %c0_2, %c0_3] : memref<3x32x32xbf16, #tpu.memory_space<vmem>>, vector<1x32x32xbf16>
    %3 = vector.shape_cast %2 : vector<1x32x32xbf16> to vector<32x32xbf16>
    %c2 = arith.constant 2 : index
    %c0_4 = arith.constant 0 : index
    %c0_5 = arith.constant 0 : index
    %4 = vector.load %arg2[%c2, %c0_4, %c0_5] : memref<3x32x32xbf16, #tpu.memory_space<vmem>>, vector<1x32x32xbf16>
    %5 = vector.shape_cast %4 : vector<1x32x32xbf16> to vector<32x32xbf16>
    %c0_6 = arith.constant 0 : index
    %c0_7 = arith.constant 0 : index
    %c0_8 = arith.constant 0 : index
    %6 = vector.load %arg3[%c0_6, %c0_7, %c0_8] : memref<1x1x32xf32, #tpu.memory_space<vmem>>, vector<1x1x32xf32>
    %7 = vector.shape_cast %6 : vector<1x1x32xf32> to vector<1x32xf32>
    %cst = arith.constant 0.000000e+00 : f32
    %8 = vector.broadcast %cst : f32 to vector<2x32xf32>
    %c0_9 = arith.constant 0 : index
    %c0_10 = arith.constant 0 : index
    %9 = vector.load %arg6[%c0_9, %c0_10] : memref<2x32xf32, #tpu.memory_space<vmem>>, vector<2x32xf32>
    tpu.vector_store %arg6[%c0_9, %c0_10], %8 {strides = array<i32>} : memref<2x32xf32, #tpu.memory_space<vmem>>, vector<2x32xf32>,
    %c0_i32 = arith.constant 0 : i32
    %c0_i32_11 = arith.constant 0 : i32
    %10 = arith.cmpi eq, %arg0, %c0_i32_11 : i32
    %c7_i32 = arith.constant 7 : i32
    %11 = arith.subi %c7_i32, %c0_i32 : i32
    %12 = arith.select %10, %c0_i32, %11 : i32
    %c0_12 = arith.constant 0 : index
    %c0_13 = arith.constant 0 : index
    %13 = vector.load %arg6[%c0_12, %c0_13] : memref<2x32xf32, #tpu.memory_space<vmem>>, vector<2x32xf32>
    %14 = arith.truncf %13 : vector<2x32xf32> to vector<2x32xbf16>
    %cst_14 = arith.constant dense<0.000000e+00> : vector<2x32xf32>
    %15 = tpu.matmul %14, %1, %cst_14 {dimension_numbers = #tpu.dot_dimension_numbers<[1], [0], [0], [1], [0, 0, 1, 1], [], []>} : vector<2x32xbf16>, vector<32x32xbf16>, vector<2x32xf32> -> vector<2x32xf32>
    %cst_15 = arith.constant dense<0.000000e+00> : vector<2x32xf32>
    %16 = tpu.matmul %14, %3, %cst_15 {dimension_numbers = #tpu.dot_dimension_numbers<[1], [0], [0], [1], [0, 0, 1, 1], [], []>} : vector<2x32xbf16>, vector<32x32xbf16>, vector<2x32xf32> -> vector<2x32xf32>
    %cst_16 = arith.constant dense<0.000000e+00> : vector<2x32xf32>
    %17 = tpu.matmul %14, %5, %cst_16 {dimension_numbers = #tpu.dot_dimension_numbers<[1], [0], [0], [1], [0, 0, 1, 1], [], []>} : vector<2x32xbf16>, vector<32x32xbf16>, vector<2x32xf32> -> vector<2x32xf32>
    %18 = vector.broadcast %7 : vector<1x32xf32> to vector<2x32xf32>
    %19 = arith.addf %17, %18 : vector<2x32xf32>
    %c0_17 = arith.constant 0 : index
    %20 = arith.index_cast %12 : i32 to index
    %c0_18 = arith.constant 0 : index
    %c0_19 = arith.constant 0 : index
    %21 = vector.load %arg1[%c0_17, %20, %c0_18, %c0_19] : memref<3x8x2x32xf32, #tpu.memory_space<vmem>>, vector<1x1x2x32xf32>
    %22 = vector.shape_cast %21 : vector<1x1x2x32xf32> to vector<2x32xf32>
    %23 = arith.addf %22, %15 : vector<2x32xf32>
    %24 = arith.negf %23 : vector<2x32xf32>
    %25 = math.exp %24 : vector<2x32xf32>
    %cst_20 = arith.constant 1.000000e+00 : f32
    %26 = vector.broadcast %cst_20 : f32 to vector<2x32xf32>
    %27 = arith.addf %26, %25 : vector<2x32xf32>
    %28 = arith.divf %26, %27 : vector<2x32xf32>
    %c1_21 = arith.constant 1 : index
    %29 = arith.index_cast %12 : i32 to index
    %c0_22 = arith.constant 0 : index
    %c0_23 = arith.constant 0 : index
    %30 = vector.load %arg1[%c1_21, %29, %c0_22, %c0_23] : memref<3x8x2x32xf32, #tpu.memory_space<vmem>>, vector<1x1x2x32xf32>
    %31 = vector.shape_cast %30 : vector<1x1x2x32xf32> to vector<2x32xf32>
    %32 = arith.addf %31, %16 : vector<2x32xf32>
    %33 = arith.negf %32 : vector<2x32xf32>
    %34 = math.exp %33 : vector<2x32xf32>
    %cst_24 = arith.constant 1.000000e+00 : f32
    %35 = vector.broadcast %cst_24 : f32 to vector<2x32xf32>
    %36 = arith.addf %35, %34 : vector<2x32xf32>
    %37 = arith.divf %35, %36 : vector<2x32xf32>
    %c2_25 = arith.constant 2 : index
    %38 = arith.index_cast %12 : i32 to index
    %c0_26 = arith.constant 0 : index
    %c0_27 = arith.constant 0 : index
    %39 = vector.load %arg1[%c2_25, %38, %c0_26, %c0_27] : memref<3x8x2x32xf32, #tpu.memory_space<vmem>>, vector<1x1x2x32xf32>
    %40 = vector.shape_cast %39 : vector<1x1x2x32xf32> to vector<2x32xf32>
    %41 = arith.mulf %28, %19 : vector<2x32xf32>
    %42 = arith.addf %40, %41 : vector<2x32xf32>
    %43 = math.tanh %42 : vector<2x32xf32>
    %cst_28 = arith.constant 1.000000e+00 : f32
    %44 = vector.broadcast %cst_28 : f32 to vector<2x32xf32>
    %45 = arith.subf %44, %37 : vector<2x32xf32>
    %46 = arith.mulf %45, %43 : vector<2x32xf32>
    %47 = arith.mulf %37, %13 : vector<2x32xf32>
    %48 = arith.addf %46, %47 : vector<2x32xf32>
    %c0_29 = arith.constant 0 : index
    %c0_30 = arith.constant 0 : index
    %49 = vector.load %arg6[%c0_29, %c0_30] : memref<2x32xf32, #tpu.memory_space<vmem>>, vector<2x32xf32>
    tpu.vector_store %arg6[%c0_29, %c0_30], %48 {strides = array<i32>} : memref<2x32xf32, #tpu.memory_space<vmem>>, vector<2x32xf32>,
    %c0_31 = arith.constant 0 : index
    %50 = arith.index_cast %12 : i32 to index
    %c0_32 = arith.constant 0 : index
    %c0_33 = arith.constant 0 : index
    %51 = vector.load %arg4[%c0_31, %50, %c0_32, %c0_33] : memref<1x8x2x32xf32, #tpu.memory_space<vmem>>, vector<1x1x2x32xf32>
    %52 = vector.shape_cast %51 : vector<1x1x2x32xf32> to vector<2x32xf32>
    %53 = vector.shape_cast %48 : vector<2x32xf32> to vector<1x1x2x32xf32>
    tpu.vector_store %arg4[%c0_31, %50, %c0_32, %c0_33], %53 {strides = array<i32>} : memref<1x8x2x32xf32, #tpu.memory_space<vmem>>, vector<1x1x2x32xf32>,
    %c1_i32 = arith.constant 1 : i32
    %c0_i32_34 = arith.constant 0 : i32
    %54 = arith.cmpi eq, %arg0, %c0_i32_34 : i32
    %c7_i32_35 = arith.constant 7 : i32
    %55 = arith.subi %c7_i32_35, %c1_i32 : i32
    %56 = arith.select %54, %c1_i32, %55 : i32
    %c0_36 = arith.constant 0 : index
    %c0_37 = arith.constant 0 : index
    %57 = vector.load %arg6[%c0_36, %c0_37] : memref<2x32xf32, #tpu.memory_space<vmem>>, vector<2x32xf32>
    %58 = arith.truncf %57 : vector<2x32xf32> to vector<2x32xbf16>
    %cst_38 = arith.constant dense<0.000000e+00> : vector<2x32xf32>
    %59 = tpu.matmul %58, %1, %cst_38 {dimension_numbers = #tpu.dot_dimension_numbers<[1], [0], [0], [1], [0, 0, 1, 1], [], []>} : vector<2x32xbf16>, vector<32x32xbf16>, vector<2x32xf32> -> vector<2x32xf32>
    %cst_39 = arith.constant dense<0.000000e+00> : vector<2x32xf32>
    %60 = tpu.matmul %58, %3, %cst_39 {dimension_numbers = #tpu.dot_dimension_numbers<[1], [0], [0], [1], [0, 0, 1, 1], [], []>} : vector<2x32xbf16>, vector<32x32xbf16>, vector<2x32xf32> -> vector<2x32xf32>
    %cst_40 = arith.constant dense<0.000000e+00> : vector<2x32xf32>
    %61 = tpu.matmul %58, %5, %cst_40 {dimension_numbers = #tpu.dot_dimension_numbers<[1], [0], [0], [1], [0, 0, 1, 1], [], []>} : vector<2x32xbf16>, vector<32x32xbf16>, vector<2x32xf32> -> vector<2x32xf32>
    %62 = vector.broadcast %7 : vector<1x32xf32> to vector<2x32xf32>
    %63 = arith.addf %61, %62 : vector<2x32xf32>
    %c0_41 = arith.constant 0 : index
    %64 = arith.index_cast %56 : i32 to index
    %c0_42 = arith.constant 0 : index
    %c0_43 = arith.constant 0 : index
    %65 = vector.load %arg1[%c0_41, %64, %c0_42, %c0_43] : memref<3x8x2x32xf32, #tpu.memory_space<vmem>>, vector<1x1x2x32xf32>
    %66 = vector.shape_cast %65 : vector<1x1x2x32xf32> to vector<2x32xf32>
    %67 = arith.addf %66, %59 : vector<2x32xf32>
    %68 = arith.negf %67 : vector<2x32xf32>
    %69 = math.exp %68 : vector<2x32xf32>
    %cst_44 = arith.constant 1.000000e+00 : f32
    %70 = vector.broadcast %cst_44 : f32 to vector<2x32xf32>
    %71 = arith.addf %70, %69 : vector<2x32xf32>
    %72 = arith.divf %70, %71 : vector<2x32xf32>
    %c1_45 = arith.constant 1 : index
    %73 = arith.index_cast %56 : i32 to index
    %c0_46 = arith.constant 0 : index
    %c0_47 = arith.constant 0 : index
    %74 = vector.load %arg1[%c1_45, %73, %c0_46, %c0_47] : memref<3x8x2x32xf32, #tpu.memory_space<vmem>>, vector<1x1x2x32xf32>
    %75 = vector.shape_cast %74 : vector<1x1x2x32xf32> to vector<2x32xf32>
    %76 = arith.addf %75, %60 : vector<2x32xf32>
    %77 = arith.negf %76 : vector<2x32xf32>
    %78 = math.exp %77 : vector<2x32xf32>
    %cst_48 = arith.constant 1.000000e+00 : f32
    %79 = vector.broadcast %cst_48 : f32 to vector<2x32xf32>
    %80 = arith.addf %79, %78 : vector<2x32xf32>
    %81 = arith.divf %79, %80 : vector<2x32xf32>
    %c2_49 = arith.constant 2 : index
    %82 = arith.index_cast %56 : i32 to index
    %c0_50 = arith.constant 0 : index
    %c0_51 = arith.constant 0 : index
    %83 = vector.load %arg1[%c2_49, %82, %c0_50, %c0_51] : memref<3x8x2x32xf32, #tpu.memory_space<vmem>>, vector<1x1x2x32xf32>
    %84 = vector.shape_cast %83 : vector<1x1x2x32xf32> to vector<2x32xf32>
    %85 = arith.mulf %72, %63 : vector<2x32xf32>
    %86 = arith.addf %84, %85 : vector<2x32xf32>
    %87 = math.tanh %86 : vector<2x32xf32>
    %cst_52 = arith.constant 1.000000e+00 : f32
    %88 = vector.broadcast %cst_52 : f32 to vector<2x32xf32>
    %89 = arith.subf %88, %81 : vector<2x32xf32>
    %90 = arith.mulf %89, %87 : vector<2x32xf32>
    %91 = arith.mulf %81, %57 : vector<2x32xf32>
    %92 = arith.addf %90, %91 : vector<2x32xf32>
    %c0_53 = arith.constant 0 : index
    %c0_54 = arith.constant 0 : index
    %93 = vector.load %arg6[%c0_53, %c0_54] : memref<2x32xf32, #tpu.memory_space<vmem>>, vector<2x32xf32>
    tpu.vector_store %arg6[%c0_53, %c0_54], %92 {strides = array<i32>} : memref<2x32xf32, #tpu.memory_space<vmem>>, vector<2x32xf32>,
    %c0_55 = arith.constant 0 : index
    %94 = arith.index_cast %56 : i32 to index
    %c0_56 = arith.constant 0 : index
    %c0_57 = arith.constant 0 : index
    %95 = vector.load %arg4[%c0_55, %94, %c0_56, %c0_57] : memref<1x8x2x32xf32, #tpu.memory_space<vmem>>, vector<1x1x2x32xf32>
    %96 = vector.shape_cast %95 : vector<1x1x2x32xf32> to vector<2x32xf32>
    %97 = vector.shape_cast %92 : vector<2x32xf32> to vector<1x1x2x32xf32>
    tpu.vector_store %arg4[%c0_55, %94, %c0_56, %c0_57], %97 {strides = array<i32>} : memref<1x8x2x32xf32, #tpu.memory_space<vmem>>, vector<1x1x2x32xf32>,
    %c2_i32 = arith.constant 2 : i32
    %c0_i32_58 = arith.constant 0 : i32
    %98 = arith.cmpi eq, %arg0, %c0_i32_58 : i32
    %c7_i32_59 = arith.constant 7 : i32
    %99 = arith.subi %c7_i32_59, %c2_i32 : i32
    %100 = arith.select %98, %c2_i32, %99 : i32
    %c0_60 = arith.constant 0 : index
    %c0_61 = arith.constant 0 : index
    %101 = vector.load %arg6[%c0_60, %c0_61] : memref<2x32xf32, #tpu.memory_space<vmem>>, vector<2x32xf32>
    %102 = arith.truncf %101 : vector<2x32xf32> to vector<2x32xbf16>
    %cst_62 = arith.constant dense<0.000000e+00> : vector<2x32xf32>
    %103 = tpu.matmul %102, %1, %cst_62 {dimension_numbers = #tpu.dot_dimension_numbers<[1], [0], [0], [1], [0, 0, 1, 1], [], []>} : vector<2x32xbf16>, vector<32x32xbf16>, vector<2x32xf32> -> vector<2x32xf32>
    %cst_63 = arith.constant dense<0.000000e+00> : vector<2x32xf32>
    %104 = tpu.matmul %102, %3, %cst_63 {dimension_numbers = #tpu.dot_dimension_numbers<[1], [0], [0], [1], [0, 0, 1, 1], [], []>} : vector<2x32xbf16>, vector<32x32xbf16>, vector<2x32xf32> -> vector<2x32xf32>
    %cst_64 = arith.constant dense<0.000000e+00> : vector<2x32xf32>
    %105 = tpu.matmul %102, %5, %cst_64 {dimension_numbers = #tpu.dot_dimension_numbers<[1], [0], [0], [1], [0, 0, 1, 1], [], []>} : vector<2x32xbf16>, vector<32x32xbf16>, vector<2x32xf32> -> vector<2x32xf32>
    %106 = vector.broadcast %7 : vector<1x32xf32> to vector<2x32xf32>
    %107 = arith.addf %105, %106 : vector<2x32xf32>
    %c0_65 = arith.constant 0 : index
    %108 = arith.index_cast %100 : i32 to index
    %c0_66 = arith.constant 0 : index
    %c0_67 = arith.constant 0 : index
    %109 = vector.load %arg1[%c0_65, %108, %c0_66, %c0_67] : memref<3x8x2x32xf32, #tpu.memory_space<vmem>>, vector<1x1x2x32xf32>
    %110 = vector.shape_cast %109 : vector<1x1x2x32xf32> to vector<2x32xf32>
    %111 = arith.addf %110, %103 : vector<2x32xf32>
    %112 = arith.negf %111 : vector<2x32xf32>
    %113 = math.exp %112 : vector<2x32xf32>
    %cst_68 = arith.constant 1.000000e+00 : f32
    %114 = vector.broadcast %cst_68 : f32 to vector<2x32xf32>
    %115 = arith.addf %114, %113 : vector<2x32xf32>
    %116 = arith.divf %114, %115 : vector<2x32xf32>
    %c1_69 = arith.constant 1 : index
    %117 = arith.index_cast %100 : i32 to index
    %c0_70 = arith.constant 0 : index
    %c0_71 = arith.constant 0 : index
    %118 = vector.load %arg1[%c1_69, %117, %c0_70, %c0_71] : memref<3x8x2x32xf32, #tpu.memory_space<vmem>>, vector<1x1x2x32xf32>
    %119 = vector.shape_cast %118 : vector<1x1x2x32xf32> to vector<2x32xf32>
    %120 = arith.addf %119, %104 : vector<2x32xf32>
    %121 = arith.negf %120 : vector<2x32xf32>
    %122 = math.exp %121 : vector<2x32xf32>
    %cst_72 = arith.constant 1.000000e+00 : f32
    %123 = vector.broadcast %cst_72 : f32 to vector<2x32xf32>
    %124 = arith.addf %123, %122 : vector<2x32xf32>
    %125 = arith.divf %123, %124 : vector<2x32xf32>
    %c2_73 = arith.constant 2 : index
    %126 = arith.index_cast %100 : i32 to index
    %c0_74 = arith.constant 0 : index
    %c0_75 = arith.constant 0 : index
    %127 = vector.load %arg1[%c2_73, %126, %c0_74, %c0_75] : memref<3x8x2x32xf32, #tpu.memory_space<vmem>>, vector<1x1x2x32xf32>
    %128 = vector.shape_cast %127 : vector<1x1x2x32xf32> to vector<2x32xf32>
    %129 = arith.mulf %116, %107 : vector<2x32xf32>
    %130 = arith.addf %128, %129 : vector<2x32xf32>
    %131 = math.tanh %130 : vector<2x32xf32>
    %cst_76 = arith.constant 1.000000e+00 : f32
    %132 = vector.broadcast %cst_76 : f32 to vector<2x32xf32>
    %133 = arith.subf %132, %125 : vector<2x32xf32>
    %134 = arith.mulf %133, %131 : vector<2x32xf32>
    %135 = arith.mulf %125, %101 : vector<2x32xf32>
    %136 = arith.addf %134, %135 : vector<2x32xf32>
    %c0_77 = arith.constant 0 : index
    %c0_78 = arith.constant 0 : index
    %137 = vector.load %arg6[%c0_77, %c0_78] : memref<2x32xf32, #tpu.memory_space<vmem>>, vector<2x32xf32>
    tpu.vector_store %arg6[%c0_77, %c0_78], %136 {strides = array<i32>} : memref<2x32xf32, #tpu.memory_space<vmem>>, vector<2x32xf32>,
    %c0_79 = arith.constant 0 : index
    %138 = arith.index_cast %100 : i32 to index
    %c0_80 = arith.constant 0 : index
    %c0_81 = arith.constant 0 : index
    %139 = vector.load %arg4[%c0_79, %138, %c0_80, %c0_81] : memref<1x8x2x32xf32, #tpu.memory_space<vmem>>, vector<1x1x2x32xf32>
    %140 = vector.shape_cast %139 : vector<1x1x2x32xf32> to vector<2x32xf32>
    %141 = vector.shape_cast %136 : vector<2x32xf32> to vector<1x1x2x32xf32>
    tpu.vector_store %arg4[%c0_79, %138, %c0_80, %c0_81], %141 {strides = array<i32>} : memref<1x8x2x32xf32, #tpu.memory_space<vmem>>, vector<1x1x2x32xf32>,
    %c3_i32 = arith.constant 3 : i32
    %c0_i32_82 = arith.constant 0 : i32
    %142 = arith.cmpi eq, %arg0, %c0_i32_82 : i32
    %c7_i32_83 = arith.constant 7 : i32
    %143 = arith.subi %c7_i32_83, %c3_i32 : i32
    %144 = arith.select %142, %c3_i32, %143 : i32
    %c0_84 = arith.constant 0 : index
    %c0_85 = arith.constant 0 : index
    %145 = vector.load %arg6[%c0_84, %c0_85] : memref<2x32xf32, #tpu.memory_space<vmem>>, vector<2x32xf32>
    %146 = arith.truncf %145 : vector<2x32xf32> to vector<2x32xbf16>
    %cst_86 = arith.constant dense<0.000000e+00> : vector<2x32xf32>
    %147 = tpu.matmul %146, %1, %cst_86 {dimension_numbers = #tpu.dot_dimension_numbers<[1], [0], [0], [1], [0, 0, 1, 1], [], []>} : vector<2x32xbf16>, vector<32x32xbf16>, vector<2x32xf32> -> vector<2x32xf32>
    %cst_87 = arith.constant dense<0.000000e+00> : vector<2x32xf32>
    %148 = tpu.matmul %146, %3, %cst_87 {dimension_numbers = #tpu.dot_dimension_numbers<[1], [0], [0], [1], [0, 0, 1, 1], [], []>} : vector<2x32xbf16>, vector<32x32xbf16>, vector<2x32xf32> -> vector<2x32xf32>
    %cst_88 = arith.constant dense<0.000000e+00> : vector<2x32xf32>
    %149 = tpu.matmul %146, %5, %cst_88 {dimension_numbers = #tpu.dot_dimension_numbers<[1], [0], [0], [1], [0, 0, 1, 1], [], []>} : vector<2x32xbf16>, vector<32x32xbf16>, vector<2x32xf32> -> vector<2x32xf32>
    %150 = vector.broadcast %7 : vector<1x32xf32> to vector<2x32xf32>
    %151 = arith.addf %149, %150 : vector<2x32xf32>
    %c0_89 = arith.constant 0 : index
    %152 = arith.index_cast %144 : i32 to index
    %c0_90 = arith.constant 0 : index
    %c0_91 = arith.constant 0 : index
    %153 = vector.load %arg1[%c0_89, %152, %c0_90, %c0_91] : memref<3x8x2x32xf32, #tpu.memory_space<vmem>>, vector<1x1x2x32xf32>
    %154 = vector.shape_cast %153 : vector<1x1x2x32xf32> to vector<2x32xf32>
    %155 = arith.addf %154, %147 : vector<2x32xf32>
    %156 = arith.negf %155 : vector<2x32xf32>
    %157 = math.exp %156 : vector<2x32xf32>
    %cst_92 = arith.constant 1.000000e+00 : f32
    %158 = vector.broadcast %cst_92 : f32 to vector<2x32xf32>
    %159 = arith.addf %158, %157 : vector<2x32xf32>
    %160 = arith.divf %158, %159 : vector<2x32xf32>
    %c1_93 = arith.constant 1 : index
    %161 = arith.index_cast %144 : i32 to index
    %c0_94 = arith.constant 0 : index
    %c0_95 = arith.constant 0 : index
    %162 = vector.load %arg1[%c1_93, %161, %c0_94, %c0_95] : memref<3x8x2x32xf32, #tpu.memory_space<vmem>>, vector<1x1x2x32xf32>
    %163 = vector.shape_cast %162 : vector<1x1x2x32xf32> to vector<2x32xf32>
    %164 = arith.addf %163, %148 : vector<2x32xf32>
    %165 = arith.negf %164 : vector<2x32xf32>
    %166 = math.exp %165 : vector<2x32xf32>
    %cst_96 = arith.constant 1.000000e+00 : f32
    %167 = vector.broadcast %cst_96 : f32 to vector<2x32xf32>
    %168 = arith.addf %167, %166 : vector<2x32xf32>
    %169 = arith.divf %167, %168 : vector<2x32xf32>
    %c2_97 = arith.constant 2 : index
    %170 = arith.index_cast %144 : i32 to index
    %c0_98 = arith.constant 0 : index
    %c0_99 = arith.constant 0 : index
    %171 = vector.load %arg1[%c2_97, %170, %c0_98, %c0_99] : memref<3x8x2x32xf32, #tpu.memory_space<vmem>>, vector<1x1x2x32xf32>
    %172 = vector.shape_cast %171 : vector<1x1x2x32xf32> to vector<2x32xf32>
    %173 = arith.mulf %160, %151 : vector<2x32xf32>
    %174 = arith.addf %172, %173 : vector<2x32xf32>
    %175 = math.tanh %174 : vector<2x32xf32>
    %cst_100 = arith.constant 1.000000e+00 : f32
    %176 = vector.broadcast %cst_100 : f32 to vector<2x32xf32>
    %177 = arith.subf %176, %169 : vector<2x32xf32>
    %178 = arith.mulf %177, %175 : vector<2x32xf32>
    %179 = arith.mulf %169, %145 : vector<2x32xf32>
    %180 = arith.addf %178, %179 : vector<2x32xf32>
    %c0_101 = arith.constant 0 : index
    %c0_102 = arith.constant 0 : index
    %181 = vector.load %arg6[%c0_101, %c0_102] : memref<2x32xf32, #tpu.memory_space<vmem>>, vector<2x32xf32>
    tpu.vector_store %arg6[%c0_101, %c0_102], %180 {strides = array<i32>} : memref<2x32xf32, #tpu.memory_space<vmem>>, vector<2x32xf32>,
    %c0_103 = arith.constant 0 : index
    %182 = arith.index_cast %144 : i32 to index
    %c0_104 = arith.constant 0 : index
    %c0_105 = arith.constant 0 : index
    %183 = vector.load %arg4[%c0_103, %182, %c0_104, %c0_105] : memref<1x8x2x32xf32, #tpu.memory_space<vmem>>, vector<1x1x2x32xf32>
    %184 = vector.shape_cast %183 : vector<1x1x2x32xf32> to vector<2x32xf32>
    %185 = vector.shape_cast %180 : vector<2x32xf32> to vector<1x1x2x32xf32>
    tpu.vector_store %arg4[%c0_103, %182, %c0_104, %c0_105], %185 {strides = array<i32>} : memref<1x8x2x32xf32, #tpu.memory_space<vmem>>, vector<1x1x2x32xf32>,
    %c4_i32 = arith.constant 4 : i32
    %c0_i32_106 = arith.constant 0 : i32
    %186 = arith.cmpi eq, %arg0, %c0_i32_106 : i32
    %c7_i32_107 = arith.constant 7 : i32
    %187 = arith.subi %c7_i32_107, %c4_i32 : i32
    %188 = arith.select %186, %c4_i32, %187 : i32
    %c0_108 = arith.constant 0 : index
    %c0_109 = arith.constant 0 : index
    %189 = vector.load %arg6[%c0_108, %c0_109] : memref<2x32xf32, #tpu.memory_space<vmem>>, vector<2x32xf32>
    %190 = arith.truncf %189 : vector<2x32xf32> to vector<2x32xbf16>
    %cst_110 = arith.constant dense<0.000000e+00> : vector<2x32xf32>
    %191 = tpu.matmul %190, %1, %cst_110 {dimension_numbers = #tpu.dot_dimension_numbers<[1], [0], [0], [1], [0, 0, 1, 1], [], []>} : vector<2x32xbf16>, vector<32x32xbf16>, vector<2x32xf32> -> vector<2x32xf32>
    %cst_111 = arith.constant dense<0.000000e+00> : vector<2x32xf32>
    %192 = tpu.matmul %190, %3, %cst_111 {dimension_numbers = #tpu.dot_dimension_numbers<[1], [0], [0], [1], [0, 0, 1, 1], [], []>} : vector<2x32xbf16>, vector<32x32xbf16>, vector<2x32xf32> -> vector<2x32xf32>
    %cst_112 = arith.constant dense<0.000000e+00> : vector<2x32xf32>
    %193 = tpu.matmul %190, %5, %cst_112 {dimension_numbers = #tpu.dot_dimension_numbers<[1], [0], [0], [1], [0, 0, 1, 1], [], []>} : vector<2x32xbf16>, vector<32x32xbf16>, vector<2x32xf32> -> vector<2x32xf32>
    %194 = vector.broadcast %7 : vector<1x32xf32> to vector<2x32xf32>
    %195 = arith.addf %193, %194 : vector<2x32xf32>
    %c0_113 = arith.constant 0 : index
    %196 = arith.index_cast %188 : i32 to index
    %c0_114 = arith.constant 0 : index
    %c0_115 = arith.constant 0 : index
    %197 = vector.load %arg1[%c0_113, %196, %c0_114, %c0_115] : memref<3x8x2x32xf32, #tpu.memory_space<vmem>>, vector<1x1x2x32xf32>
    %198 = vector.shape_cast %197 : vector<1x1x2x32xf32> to vector<2x32xf32>
    %199 = arith.addf %198, %191 : vector<2x32xf32>
    %200 = arith.negf %199 : vector<2x32xf32>
    %201 = math.exp %200 : vector<2x32xf32>
    %cst_116 = arith.constant 1.000000e+00 : f32
    %202 = vector.broadcast %cst_116 : f32 to vector<2x32xf32>
    %203 = arith.addf %202, %201 : vector<2x32xf32>
    %204 = arith.divf %202, %203 : vector<2x32xf32>
    %c1_117 = arith.constant 1 : index
    %205 = arith.index_cast %188 : i32 to index
    %c0_118 = arith.constant 0 : index
    %c0_119 = arith.constant 0 : index
    %206 = vector.load %arg1[%c1_117, %205, %c0_118, %c0_119] : memref<3x8x2x32xf32, #tpu.memory_space<vmem>>, vector<1x1x2x32xf32>
    %207 = vector.shape_cast %206 : vector<1x1x2x32xf32> to vector<2x32xf32>
    %208 = arith.addf %207, %192 : vector<2x32xf32>
    %209 = arith.negf %208 : vector<2x32xf32>
    %210 = math.exp %209 : vector<2x32xf32>
    %cst_120 = arith.constant 1.000000e+00 : f32
    %211 = vector.broadcast %cst_120 : f32 to vector<2x32xf32>
    %212 = arith.addf %211, %210 : vector<2x32xf32>
    %213 = arith.divf %211, %212 : vector<2x32xf32>
    %c2_121 = arith.constant 2 : index
    %214 = arith.index_cast %188 : i32 to index
    %c0_122 = arith.constant 0 : index
    %c0_123 = arith.constant 0 : index
    %215 = vector.load %arg1[%c2_121, %214, %c0_122, %c0_123] : memref<3x8x2x32xf32, #tpu.memory_space<vmem>>, vector<1x1x2x32xf32>
    %216 = vector.shape_cast %215 : vector<1x1x2x32xf32> to vector<2x32xf32>
    %217 = arith.mulf %204, %195 : vector<2x32xf32>
    %218 = arith.addf %216, %217 : vector<2x32xf32>
    %219 = math.tanh %218 : vector<2x32xf32>
    %cst_124 = arith.constant 1.000000e+00 : f32
    %220 = vector.broadcast %cst_124 : f32 to vector<2x32xf32>
    %221 = arith.subf %220, %213 : vector<2x32xf32>
    %222 = arith.mulf %221, %219 : vector<2x32xf32>
    %223 = arith.mulf %213, %189 : vector<2x32xf32>
    %224 = arith.addf %222, %223 : vector<2x32xf32>
    %c0_125 = arith.constant 0 : index
    %c0_126 = arith.constant 0 : index
    %225 = vector.load %arg6[%c0_125, %c0_126] : memref<2x32xf32, #tpu.memory_space<vmem>>, vector<2x32xf32>
    tpu.vector_store %arg6[%c0_125, %c0_126], %224 {strides = array<i32>} : memref<2x32xf32, #tpu.memory_space<vmem>>, vector<2x32xf32>,
    %c0_127 = arith.constant 0 : index
    %226 = arith.index_cast %188 : i32 to index
    %c0_128 = arith.constant 0 : index
    %c0_129 = arith.constant 0 : index
    %227 = vector.load %arg4[%c0_127, %226, %c0_128, %c0_129] : memref<1x8x2x32xf32, #tpu.memory_space<vmem>>, vector<1x1x2x32xf32>
    %228 = vector.shape_cast %227 : vector<1x1x2x32xf32> to vector<2x32xf32>
    %229 = vector.shape_cast %224 : vector<2x32xf32> to vector<1x1x2x32xf32>
    tpu.vector_store %arg4[%c0_127, %226, %c0_128, %c0_129], %229 {strides = array<i32>} : memref<1x8x2x32xf32, #tpu.memory_space<vmem>>, vector<1x1x2x32xf32>,
    %c5_i32 = arith.constant 5 : i32
    %c0_i32_130 = arith.constant 0 : i32
    %230 = arith.cmpi eq, %arg0, %c0_i32_130 : i32
    %c7_i32_131 = arith.constant 7 : i32
    %231 = arith.subi %c7_i32_131, %c5_i32 : i32
    %232 = arith.select %230, %c5_i32, %231 : i32
    %c0_132 = arith.constant 0 : index
    %c0_133 = arith.constant 0 : index
    %233 = vector.load %arg6[%c0_132, %c0_133] : memref<2x32xf32, #tpu.memory_space<vmem>>, vector<2x32xf32>
    %234 = arith.truncf %233 : vector<2x32xf32> to vector<2x32xbf16>
    %cst_134 = arith.constant dense<0.000000e+00> : vector<2x32xf32>
    %235 = tpu.matmul %234, %1, %cst_134 {dimension_numbers = #tpu.dot_dimension_numbers<[1], [0], [0], [1], [0, 0, 1, 1], [], []>} : vector<2x32xbf16>, vector<32x32xbf16>, vector<2x32xf32> -> vector<2x32xf32>
    %cst_135 = arith.constant dense<0.000000e+00> : vector<2x32xf32>
    %236 = tpu.matmul %234, %3, %cst_135 {dimension_numbers = #tpu.dot_dimension_numbers<[1], [0], [0], [1], [0, 0, 1, 1], [], []>} : vector<2x32xbf16>, vector<32x32xbf16>, vector<2x32xf32> -> vector<2x32xf32>
    %cst_136 = arith.constant dense<0.000000e+00> : vector<2x32xf32>
    %237 = tpu.matmul %234, %5, %cst_136 {dimension_numbers = #tpu.dot_dimension_numbers<[1], [0], [0], [1], [0, 0, 1, 1], [], []>} : vector<2x32xbf16>, vector<32x32xbf16>, vector<2x32xf32> -> vector<2x32xf32>
    %238 = vector.broadcast %7 : vector<1x32xf32> to vector<2x32xf32>
    %239 = arith.addf %237, %238 : vector<2x32xf32>
    %c0_137 = arith.constant 0 : index
    %240 = arith.index_cast %232 : i32 to index
    %c0_138 = arith.constant 0 : index
    %c0_139 = arith.constant 0 : index
    %241 = vector.load %arg1[%c0_137, %240, %c0_138, %c0_139] : memref<3x8x2x32xf32, #tpu.memory_space<vmem>>, vector<1x1x2x32xf32>
    %242 = vector.shape_cast %241 : vector<1x1x2x32xf32> to vector<2x32xf32>
    %243 = arith.addf %242, %235 : vector<2x32xf32>
    %244 = arith.negf %243 : vector<2x32xf32>
    %245 = math.exp %244 : vector<2x32xf32>
    %cst_140 = arith.constant 1.000000e+00 : f32
    %246 = vector.broadcast %cst_140 : f32 to vector<2x32xf32>
    %247 = arith.addf %246, %245 : vector<2x32xf32>
    %248 = arith.divf %246, %247 : vector<2x32xf32>
    %c1_141 = arith.constant 1 : index
    %249 = arith.index_cast %232 : i32 to index
    %c0_142 = arith.constant 0 : index
    %c0_143 = arith.constant 0 : index
    %250 = vector.load %arg1[%c1_141, %249, %c0_142, %c0_143] : memref<3x8x2x32xf32, #tpu.memory_space<vmem>>, vector<1x1x2x32xf32>
    %251 = vector.shape_cast %250 : vector<1x1x2x32xf32> to vector<2x32xf32>
    %252 = arith.addf %251, %236 : vector<2x32xf32>
    %253 = arith.negf %252 : vector<2x32xf32>
    %254 = math.exp %253 : vector<2x32xf32>
    %cst_144 = arith.constant 1.000000e+00 : f32
    %255 = vector.broadcast %cst_144 : f32 to vector<2x32xf32>
    %256 = arith.addf %255, %254 : vector<2x32xf32>
    %257 = arith.divf %255, %256 : vector<2x32xf32>
    %c2_145 = arith.constant 2 : index
    %258 = arith.index_cast %232 : i32 to index
    %c0_146 = arith.constant 0 : index
    %c0_147 = arith.constant 0 : index
    %259 = vector.load %arg1[%c2_145, %258, %c0_146, %c0_147] : memref<3x8x2x32xf32, #tpu.memory_space<vmem>>, vector<1x1x2x32xf32>
    %260 = vector.shape_cast %259 : vector<1x1x2x32xf32> to vector<2x32xf32>
    %261 = arith.mulf %248, %239 : vector<2x32xf32>
    %262 = arith.addf %260, %261 : vector<2x32xf32>
    %263 = math.tanh %262 : vector<2x32xf32>
    %cst_148 = arith.constant 1.000000e+00 : f32
    %264 = vector.broadcast %cst_148 : f32 to vector<2x32xf32>
    %265 = arith.subf %264, %257 : vector<2x32xf32>
    %266 = arith.mulf %265, %263 : vector<2x32xf32>
    %267 = arith.mulf %257, %233 : vector<2x32xf32>
    %268 = arith.addf %266, %267 : vector<2x32xf32>
    %c0_149 = arith.constant 0 : index
    %c0_150 = arith.constant 0 : index
    %269 = vector.load %arg6[%c0_149, %c0_150] : memref<2x32xf32, #tpu.memory_space<vmem>>, vector<2x32xf32>
    tpu.vector_store %arg6[%c0_149, %c0_150], %268 {strides = array<i32>} : memref<2x32xf32, #tpu.memory_space<vmem>>, vector<2x32xf32>,
    %c0_151 = arith.constant 0 : index
    %270 = arith.index_cast %232 : i32 to index
    %c0_152 = arith.constant 0 : index
    %c0_153 = arith.constant 0 : index
    %271 = vector.load %arg4[%c0_151, %270, %c0_152, %c0_153] : memref<1x8x2x32xf32, #tpu.memory_space<vmem>>, vector<1x1x2x32xf32>
    %272 = vector.shape_cast %271 : vector<1x1x2x32xf32> to vector<2x32xf32>
    %273 = vector.shape_cast %268 : vector<2x32xf32> to vector<1x1x2x32xf32>
    tpu.vector_store %arg4[%c0_151, %270, %c0_152, %c0_153], %273 {strides = array<i32>} : memref<1x8x2x32xf32, #tpu.memory_space<vmem>>, vector<1x1x2x32xf32>,
    %c6_i32 = arith.constant 6 : i32
    %c0_i32_154 = arith.constant 0 : i32
    %274 = arith.cmpi eq, %arg0, %c0_i32_154 : i32
    %c7_i32_155 = arith.constant 7 : i32
    %275 = arith.subi %c7_i32_155, %c6_i32 : i32
    %276 = arith.select %274, %c6_i32, %275 : i32
    %c0_156 = arith.constant 0 : index
    %c0_157 = arith.constant 0 : index
    %277 = vector.load %arg6[%c0_156, %c0_157] : memref<2x32xf32, #tpu.memory_space<vmem>>, vector<2x32xf32>
    %278 = arith.truncf %277 : vector<2x32xf32> to vector<2x32xbf16>
    %cst_158 = arith.constant dense<0.000000e+00> : vector<2x32xf32>
    %279 = tpu.matmul %278, %1, %cst_158 {dimension_numbers = #tpu.dot_dimension_numbers<[1], [0], [0], [1], [0, 0, 1, 1], [], []>} : vector<2x32xbf16>, vector<32x32xbf16>, vector<2x32xf32> -> vector<2x32xf32>
    %cst_159 = arith.constant dense<0.000000e+00> : vector<2x32xf32>
    %280 = tpu.matmul %278, %3, %cst_159 {dimension_numbers = #tpu.dot_dimension_numbers<[1], [0], [0], [1], [0, 0, 1, 1], [], []>} : vector<2x32xbf16>, vector<32x32xbf16>, vector<2x32xf32> -> vector<2x32xf32>
    %cst_160 = arith.constant dense<0.000000e+00> : vector<2x32xf32>
    %281 = tpu.matmul %278, %5, %cst_160 {dimension_numbers = #tpu.dot_dimension_numbers<[1], [0], [0], [1], [0, 0, 1, 1], [], []>} : vector<2x32xbf16>, vector<32x32xbf16>, vector<2x32xf32> -> vector<2x32xf32>
    %282 = vector.broadcast %7 : vector<1x32xf32> to vector<2x32xf32>
    %283 = arith.addf %281, %282 : vector<2x32xf32>
    %c0_161 = arith.constant 0 : index
    %284 = arith.index_cast %276 : i32 to index
    %c0_162 = arith.constant 0 : index
    %c0_163 = arith.constant 0 : index
    %285 = vector.load %arg1[%c0_161, %284, %c0_162, %c0_163] : memref<3x8x2x32xf32, #tpu.memory_space<vmem>>, vector<1x1x2x32xf32>
    %286 = vector.shape_cast %285 : vector<1x1x2x32xf32> to vector<2x32xf32>
    %287 = arith.addf %286, %279 : vector<2x32xf32>
    %288 = arith.negf %287 : vector<2x32xf32>
    %289 = math.exp %288 : vector<2x32xf32>
    %cst_164 = arith.constant 1.000000e+00 : f32
    %290 = vector.broadcast %cst_164 : f32 to vector<2x32xf32>
    %291 = arith.addf %290, %289 : vector<2x32xf32>
    %292 = arith.divf %290, %291 : vector<2x32xf32>
    %c1_165 = arith.constant 1 : index
    %293 = arith.index_cast %276 : i32 to index
    %c0_166 = arith.constant 0 : index
    %c0_167 = arith.constant 0 : index
    %294 = vector.load %arg1[%c1_165, %293, %c0_166, %c0_167] : memref<3x8x2x32xf32, #tpu.memory_space<vmem>>, vector<1x1x2x32xf32>
    %295 = vector.shape_cast %294 : vector<1x1x2x32xf32> to vector<2x32xf32>
    %296 = arith.addf %295, %280 : vector<2x32xf32>
    %297 = arith.negf %296 : vector<2x32xf32>
    %298 = math.exp %297 : vector<2x32xf32>
    %cst_168 = arith.constant 1.000000e+00 : f32
    %299 = vector.broadcast %cst_168 : f32 to vector<2x32xf32>
    %300 = arith.addf %299, %298 : vector<2x32xf32>
    %301 = arith.divf %299, %300 : vector<2x32xf32>
    %c2_169 = arith.constant 2 : index
    %302 = arith.index_cast %276 : i32 to index
    %c0_170 = arith.constant 0 : index
    %c0_171 = arith.constant 0 : index
    %303 = vector.load %arg1[%c2_169, %302, %c0_170, %c0_171] : memref<3x8x2x32xf32, #tpu.memory_space<vmem>>, vector<1x1x2x32xf32>
    %304 = vector.shape_cast %303 : vector<1x1x2x32xf32> to vector<2x32xf32>
    %305 = arith.mulf %292, %283 : vector<2x32xf32>
    %306 = arith.addf %304, %305 : vector<2x32xf32>
    %307 = math.tanh %306 : vector<2x32xf32>
    %cst_172 = arith.constant 1.000000e+00 : f32
    %308 = vector.broadcast %cst_172 : f32 to vector<2x32xf32>
    %309 = arith.subf %308, %301 : vector<2x32xf32>
    %310 = arith.mulf %309, %307 : vector<2x32xf32>
    %311 = arith.mulf %301, %277 : vector<2x32xf32>
    %312 = arith.addf %310, %311 : vector<2x32xf32>
    %c0_173 = arith.constant 0 : index
    %c0_174 = arith.constant 0 : index
    %313 = vector.load %arg6[%c0_173, %c0_174] : memref<2x32xf32, #tpu.memory_space<vmem>>, vector<2x32xf32>
    tpu.vector_store %arg6[%c0_173, %c0_174], %312 {strides = array<i32>} : memref<2x32xf32, #tpu.memory_space<vmem>>, vector<2x32xf32>,
    %c0_175 = arith.constant 0 : index
    %314 = arith.index_cast %276 : i32 to index
    %c0_176 = arith.constant 0 : index
    %c0_177 = arith.constant 0 : index
    %315 = vector.load %arg4[%c0_175, %314, %c0_176, %c0_177] : memref<1x8x2x32xf32, #tpu.memory_space<vmem>>, vector<1x1x2x32xf32>
    %316 = vector.shape_cast %315 : vector<1x1x2x32xf32> to vector<2x32xf32>
    %317 = vector.shape_cast %312 : vector<2x32xf32> to vector<1x1x2x32xf32>
    tpu.vector_store %arg4[%c0_175, %314, %c0_176, %c0_177], %317 {strides = array<i32>} : memref<1x8x2x32xf32, #tpu.memory_space<vmem>>, vector<1x1x2x32xf32>,
    %c7_i32_178 = arith.constant 7 : i32
    %c0_i32_179 = arith.constant 0 : i32
    %318 = arith.cmpi eq, %arg0, %c0_i32_179 : i32
    %c7_i32_180 = arith.constant 7 : i32
    %319 = arith.subi %c7_i32_180, %c7_i32_178 : i32
    %320 = arith.select %318, %c7_i32_178, %319 : i32
    %c0_181 = arith.constant 0 : index
    %c0_182 = arith.constant 0 : index
    %321 = vector.load %arg6[%c0_181, %c0_182] : memref<2x32xf32, #tpu.memory_space<vmem>>, vector<2x32xf32>
    %322 = arith.truncf %321 : vector<2x32xf32> to vector<2x32xbf16>
    %cst_183 = arith.constant dense<0.000000e+00> : vector<2x32xf32>
    %323 = tpu.matmul %322, %1, %cst_183 {dimension_numbers = #tpu.dot_dimension_numbers<[1], [0], [0], [1], [0, 0, 1, 1], [], []>} : vector<2x32xbf16>, vector<32x32xbf16>, vector<2x32xf32> -> vector<2x32xf32>
    %cst_184 = arith.constant dense<0.000000e+00> : vector<2x32xf32>
    %324 = tpu.matmul %322, %3, %cst_184 {dimension_numbers = #tpu.dot_dimension_numbers<[1], [0], [0], [1], [0, 0, 1, 1], [], []>} : vector<2x32xbf16>, vector<32x32xbf16>, vector<2x32xf32> -> vector<2x32xf32>
    %cst_185 = arith.constant dense<0.000000e+00> : vector<2x32xf32>
    %325 = tpu.matmul %322, %5, %cst_185 {dimension_numbers = #tpu.dot_dimension_numbers<[1], [0], [0], [1], [0, 0, 1, 1], [], []>} : vector<2x32xbf16>, vector<32x32xbf16>, vector<2x32xf32> -> vector<2x32xf32>
    %326 = vector.broadcast %7 : vector<1x32xf32> to vector<2x32xf32>
    %327 = arith.addf %325, %326 : vector<2x32xf32>
    %c0_186 = arith.constant 0 : index
    %328 = arith.index_cast %320 : i32 to index
    %c0_187 = arith.constant 0 : index
    %c0_188 = arith.constant 0 : index
    %329 = vector.load %arg1[%c0_186, %328, %c0_187, %c0_188] : memref<3x8x2x32xf32, #tpu.memory_space<vmem>>, vector<1x1x2x32xf32>
    %330 = vector.shape_cast %329 : vector<1x1x2x32xf32> to vector<2x32xf32>
    %331 = arith.addf %330, %323 : vector<2x32xf32>
    %332 = arith.negf %331 : vector<2x32xf32>
    %333 = math.exp %332 : vector<2x32xf32>
    %cst_189 = arith.constant 1.000000e+00 : f32
    %334 = vector.broadcast %cst_189 : f32 to vector<2x32xf32>
    %335 = arith.addf %334, %333 : vector<2x32xf32>
    %336 = arith.divf %334, %335 : vector<2x32xf32>
    %c1_190 = arith.constant 1 : index
    %337 = arith.index_cast %320 : i32 to index
    %c0_191 = arith.constant 0 : index
    %c0_192 = arith.constant 0 : index
    %338 = vector.load %arg1[%c1_190, %337, %c0_191, %c0_192] : memref<3x8x2x32xf32, #tpu.memory_space<vmem>>, vector<1x1x2x32xf32>
    %339 = vector.shape_cast %338 : vector<1x1x2x32xf32> to vector<2x32xf32>
    %340 = arith.addf %339, %324 : vector<2x32xf32>
    %341 = arith.negf %340 : vector<2x32xf32>
    %342 = math.exp %341 : vector<2x32xf32>
    %cst_193 = arith.constant 1.000000e+00 : f32
    %343 = vector.broadcast %cst_193 : f32 to vector<2x32xf32>
    %344 = arith.addf %343, %342 : vector<2x32xf32>
    %345 = arith.divf %343, %344 : vector<2x32xf32>
    %c2_194 = arith.constant 2 : index
    %346 = arith.index_cast %320 : i32 to index
    %c0_195 = arith.constant 0 : index
    %c0_196 = arith.constant 0 : index
    %347 = vector.load %arg1[%c2_194, %346, %c0_195, %c0_196] : memref<3x8x2x32xf32, #tpu.memory_space<vmem>>, vector<1x1x2x32xf32>
    %348 = vector.shape_cast %347 : vector<1x1x2x32xf32> to vector<2x32xf32>
    %349 = arith.mulf %336, %327 : vector<2x32xf32>
    %350 = arith.addf %348, %349 : vector<2x32xf32>
    %351 = math.tanh %350 : vector<2x32xf32>
    %cst_197 = arith.constant 1.000000e+00 : f32
    %352 = vector.broadcast %cst_197 : f32 to vector<2x32xf32>
    %353 = arith.subf %352, %345 : vector<2x32xf32>
    %354 = arith.mulf %353, %351 : vector<2x32xf32>
    %355 = arith.mulf %345, %321 : vector<2x32xf32>
    %356 = arith.addf %354, %355 : vector<2x32xf32>
    %c0_198 = arith.constant 0 : index
    %c0_199 = arith.constant 0 : index
    %357 = vector.load %arg6[%c0_198, %c0_199] : memref<2x32xf32, #tpu.memory_space<vmem>>, vector<2x32xf32>
    tpu.vector_store %arg6[%c0_198, %c0_199], %356 {strides = array<i32>} : memref<2x32xf32, #tpu.memory_space<vmem>>, vector<2x32xf32>,
    %c0_200 = arith.constant 0 : index
    %358 = arith.index_cast %320 : i32 to index
    %c0_201 = arith.constant 0 : index
    %c0_202 = arith.constant 0 : index
    %359 = vector.load %arg4[%c0_200, %358, %c0_201, %c0_202] : memref<1x8x2x32xf32, #tpu.memory_space<vmem>>, vector<1x1x2x32xf32>
    %360 = vector.shape_cast %359 : vector<1x1x2x32xf32> to vector<2x32xf32>
    %361 = vector.shape_cast %356 : vector<2x32xf32> to vector<1x1x2x32xf32>
    tpu.vector_store %arg4[%c0_200, %358, %c0_201, %c0_202], %361 {strides = array<i32>} : memref<1x8x2x32xf32, #tpu.memory_space<vmem>>, vector<1x1x2x32xf32>,
    %c8_i32 = arith.constant 8 : i32
    %c0_203 = arith.constant 0 : index
    %c0_204 = arith.constant 0 : index
    %362 = vector.load %arg6[%c0_203, %c0_204] : memref<2x32xf32, #tpu.memory_space<vmem>>, vector<2x32xf32>
    %c0_205 = arith.constant 0 : index
    %c0_206 = arith.constant 0 : index
    %c0_207 = arith.constant 0 : index
    %363 = vector.load %arg5[%c0_205, %c0_206, %c0_207] : memref<1x2x32xf32, #tpu.memory_space<vmem>>, vector<1x2x32xf32>
    %364 = vector.shape_cast %363 : vector<1x2x32xf32> to vector<2x32xf32>
    %365 = vector.shape_cast %362 : vector<2x32xf32> to vector<1x2x32xf32>
    tpu.vector_store %arg5[%c0_205, %c0_206, %c0_207], %365 {strides = array<i32>} : memref<1x2x32xf32, #tpu.memory_space<vmem>>, vector<1x2x32xf32>,
    return
  }
  func.func @transform_0(%arg0: i32) -> (i32, i32, i32, i32) {
    %c0_i32 = arith.constant 0 : i32
    %c0_i32_0 = arith.constant 0 : i32
    %c0_i32_1 = arith.constant 0 : i32
    %c0_i32_2 = arith.constant 0 : i32
    return %arg0, %c0_i32, %c0_i32_0, %c0_i32_1 : i32, i32, i32, i32
  }
  func.func @transform_1(%arg0: i32) -> (i32, i32, i32) {
    %c0_i32 = arith.constant 0 : i32
    %c0_i32_0 = arith.constant 0 : i32
    %c0_i32_1 = arith.constant 0 : i32
    return %arg0, %c0_i32, %c0_i32_0 : i32, i32, i32
  }
  func.func @transform_2(%arg0: i32) -> (i32, i32, i32) {
    %c0_i32 = arith.constant 0 : i32
    %c0_i32_0 = arith.constant 0 : i32
    %c0_i32_1 = arith.constant 0 : i32
    return %arg0, %c0_i32, %c0_i32_0 : i32, i32, i32
  }
  func.func @transform_3(%arg0: i32) -> (i32, i32, i32, i32) {
    %c0_i32 = arith.constant 0 : i32
    %c0_i32_0 = arith.constant 0 : i32
    %c0_i32_1 = arith.constant 0 : i32
    %c0_i32_2 = arith.constant 0 : i32
    return %arg0, %c0_i32, %c0_i32_0, %c0_i32_1 : i32, i32, i32, i32
  }
  func.func @transform_4(%arg0: i32) -> (i32, i32, i32) {
    %c0_i32 = arith.constant 0 : i32
    %c0_i32_0 = arith.constant 0 : i32
    %c0_i32_1 = arith.constant 0 : i32
    return %arg0, %c0_i32, %c0_i32_0 : i32, i32, i32
  }
}

</mosaic_0001>

<bundles_post_ra>
// kernel: _lambda_.7
= control target key start
LH: loop header
LB: loop body
LE: loop exit
PB: predicated region body
PF: predicated region fallthrough
CT: control target
= control target key end

     0   :  { %s333_s6 = smov 0   ;;  %s363_s0 = inlined_call_operand.vmem [shape: f32[2,8,64], index: 0, kind: input, shape index: {}]   ;;  %s364_s1 = inlined_call_operand.vmem [shape: f32[2,8,64], index: 1, kind: output, shape index: {}]  }
   0x1 LB: > { %s272_s7 = sadd.s32 4294967295, %s319_s6   ;;  %p276_p0 = scmp.ge.s32.totalorder %s319_s6, 1  ;;  %s319_s6 = sphi %s333_s6, %s11_s6  }
   0x2   : > { %p86_p1 = scmp.lt.s32.totalorder %s319_s6, 3 }
   0x4   : > { %p87_p2 = pnand %p276_p0, %p86_p1 }
   0x5   : > { %p104_p3 = scmp.lt.s32.totalorder (!%p87_p2), %s272_s7, 1  ;;  %v321_v0 = vmov (!%p87_p2), 0.0   ;;  %vm322_vm0 = vmmov (!%p87_p2), 0   ;;  %vm115_vm1 = vcmask (!%p87_p2), 523264   ;;  %vm159_vm2 = vcmask (!%p87_p2), 64512  }
   0x6   : > { %90 = sbr.rel (%p87_p2) target bundleno = 770 (0x302), region = 24  ;;  %287 = vmatprep.subr.bf16.mxu0 (!%p87_p2), %v321_v0  ;;  %289 = vmatprep.mubr.msk.bf16.mxu0 (!%p87_p2), %vm322_vm0, %v321_v0  ;;  %vm175_vm3 = vcmask (!%p87_p2), 1043456  }
   0x7   : > { %293 = vmatprep.subr.bf16.mxu1 (!%p87_p2), %v321_v0  ;;  %295 = vmatprep.mubr.msk.bf16.mxu1 (!%p87_p2), %vm322_vm0, %v321_v0 }
   0xd   : > { %s366_s7 = smov (!%p104_p3, %s272_s7), 1 }
   0xe   : > { %s277_s8 = sshll.u32 %s366_s7, 3 }
   0xf   : > { %s107_s11 = scalar_lea.vmem %s363_s0, %s277_s8  ;;  %s111_s14 = scalar_lea.vmem %s364_s1, %s277_s8 }
  0x10   : > { %v113_v1 = vld [vmem:[%s107_s11] sm:$0xff] }
  0x11   : > { %v114_v2 = vpack.c.bf16 %v113_v1, %v113_v1 }
  0x13   : > { %v117_v3 = vsel %vm115_vm1, %v114_v2, 0  ;;  %v176_v14 = vsel %vm175_vm3, %v114_v2, 0 }
  0x14   : > { %288 = vmatpush3.bf16.xpose.msra.mxu0 %v117_v3  ;;  %294 = vmatpush3.bf16.msra.mxu1 %v176_v14 }
  0x1b   : > { %290 = vmatmul.mubr.msk.bf16.vlgmr.msra.gmra.mrb[0].mxu0 %vm115_vm1, %v114_v2 }
  0xee   : > { %v153_v4 = vpop.f32.mrb[0].mxu0 }
  0xef   : > { %v291_v5 = vpop.f32.mrb[1].mxu0  ;;  %v160_v6 = vsel %vm159_vm2, %v153_v4, -inf }
  0xf0   : > { %161 = vmax.xlane.f32.xlu0 %v160_v6  ;;  %v156_v7 = vpop.f32.mrb[2].mxu0 }
  0xf1   : > { %v292_v8 = vpop.f32.mrb[3].mxu0 }
 0x17d   : > { %v162_v9 = vpop.xlane.xlu0 %161 }
 0x17e   : > { %v163_v10 = vsub.f32 %v153_v4, %v162_v9 }
 0x180   : > { %v164_v11 = vmul.f32 1.442695, %v163_v10 }
 0x182   : > { %309 = vpow2.f32 %v164_v11 }
 0x18c   : > { %v310_v12 = vpop.eup %309 }
 0x18d   : > { %v166_v13 = vsel %vm159_vm2, %v310_v12, 0.0 }
 0x18e   : > { %167 = vadd.xlane.f32.xlu0 %v166_v13 }
 0x21b   : > { %v168_v15 = vpop.xlane.xlu0 %167 }
 0x21c   : > { %311 = vrcp.f32 %v168_v15 }
 0x226   : > { %v312_v16 = vpop.eup %311 }
 0x227   : > { %v170_v17 = vmul.f32 %v312_v16, %v310_v12 }
 0x229   : > { %v171_v18 = vpack.c.bf16 %v170_v17, %v170_v17 }
 0x22b   : > { %296 = vmatmul.mubr.msk.bf16.vlgmr.msra.gmra.mrb[0].mxu1 %vm159_vm2, %v171_v18 }
 0x2fe   : > { %v212_v19 = vpop.f32.mrb[0].mxu1 }
 0x2ff   : > { %218 = vst.msk [vmem:[%s111_s14] sm:$0xff] %vm115_vm1, %v212_v19  ;;  %v297_v20 = vpop.f32.mrb[1].mxu1 }
 0x300   : > { %v215_v21 = vpop.f32.mrb[2].mxu1 }
 0x301   : > { %v298_v22 = vpop.f32.mrb[3].mxu1 }
 0x302 PF: > { %s11_s6 = sadd.s32 1, %s319_s6  }
 0x303   : > { %p8_p4 = scmp.ge.s32.totalorder %s11_s6, 4  }
 0x305   :  { %10 = sbr.rel (!%p8_p4) target bundleno = 1 (0x1), region = 54 }

// kernel: _lambda_.5
= control target key start
LH: loop header
LB: loop body
LE: loop exit
PB: predicated region body
PF: predicated region fallthrough
CT: control target
= control target key end

     0   :  { %10 = vsyncpa [#allocation4], 0  ;;  %s2821_s0 = inlined_call_operand.vmem [shape: f32[6,8,2,32], index: 0, kind: input, shape index: {}]   ;;  %s2822_s1 = inlined_call_operand.vmem [shape: bf16[6,32,32], index: 1, kind: input, shape index: {}]   ;;  %s2823_s2 = inlined_call_operand.vmem [shape: f32[2,1,32], index: 2, kind: input, shape index: {}]   ;;  %s2824_s3 = inlined_call_operand.vmem [shape: f32[2,8,2,32], index: 3, kind: output, shape index: {0}]   ;;  %s2825_s4 = inlined_call_operand.hbm [shape: f32[2,2,32], index: 4, kind: output, shape index: {1}]  }
   0x1   :  { %12 = vsyncpa [#allocation4 + $0x1], 0  ;;  %s2392_s15 = smov 0   ;;  %s2394_s16 = smov 0  }
   0x2   :  { %s2396_s17 = smov 0   ;;  %s2398_s18 = smov 0  }
   0x3 LB: > { %s2413_s19 = sadd.s32 4294967295, %s2362_s18   ;;  %s1796_s20 = sadd.s32 4294967294, %s2362_s18   ;;  %s2362_s18 = sphi %s2398_s18, %s2831_s18   ;;  %s2358_s17 = sphi %s2396_s17, %s2830_s17   ;;  %s2354_s16 = sphi %s2394_s16, %s2829_s16   ;;  %s2350_s15 = sphi %s2392_s15, %s2828_s15  }
   0x4   : > { %s2417_s21 = sadd.s32 1, %s2362_s18   ;;  %s129_s22 = sadd.s32 1, %s2358_s17 }
   0x5   : > { %s126_s23 = ssub.s32 %s2362_s18, %s2417_s21  ;;  %p139_p0 = scmp.ne.s32.totalorder %s2358_s17, %s2354_s16 }
   0x6   : > { %p127_p1 = scmp.eq.s32.totalorder %s126_s23, 0  ;;  %p140_p2 = scmp.eq.s32.totalorder %s2413_s19, 1 }
   0x7   : > { %p145_p3 = scmp.ne.s32.totalorder %s2354_s16, %s2350_s15  ;;  %p146_p4 = scmp.eq.s32.totalorder %s1796_s20, 1 }
   0x8   : > { %s2428_s24 = scalar_select %p127_p1, %s2358_s17, %s129_s22  }
   0x9   : > { %p2430_p5 = por %p140_p2, %p139_p0  ;;  %p2434_p6 = por %p146_p4, %p145_p3 }
   0xa   : > { %p1799_p7 = scmp.ge.s32.totalorder %s2362_s18, 1  ;;  %p190_p8 = scmp.lt.s32.totalorder %s2362_s18, 3 }
   0xc   : > { %p191_p9 = pnand %p1799_p7, %p190_p8 }
   0xd   : > { %s231_s27 = smul.u32 (!%p191_p9), 3, %s2413_s19  ;;  %vm269_vm0 = vcmask (!%p191_p9), 254976   ;;  %v2364_v0 = vmov (!%p191_p9), 0.0   ;;  %vm2365_vm1 = vmmov (!%p191_p9), 0   ;;  %vm287_vm2 = vcmask (!%p191_p9), 261120   ;;  %p271_p11 = scmp.eq.s32.totalorder (!%p191_p9), %s2413_s19, 0 }
   0xe   : > { %194 = sbr.rel (%p191_p9) target bundleno = 2196 (0x894), region = 32  ;;  %1981 = vmatprep.subr.bf16.mxu0 (!%p191_p9), %v2364_v0  ;;  %1985 = vmatprep.mubr.msk.bf16.mxu0 (!%p191_p9), %vm2365_vm1, %v2364_v0  ;;  %270 = vst.msk [vmem:[#allocation2] sm:$0x3] (!%p191_p9), %vm269_vm0, %v2364_v0  ;;  %p245_p12 = scmp.lt.s32.totalorder (!%p191_p9), %s2413_s19, 1 }
   0xf   : > { %p232_p10 = scmp.lt.s32.totalorder (!%p191_p9), %s231_s27, 5  ;;  %1989 = vmatprep.subr.bf16.mxu1 (!%p191_p9), %v2364_v0  ;;  %1993 = vmatprep.mubr.msk.bf16.mxu1 (!%p191_p9), %vm2365_vm1, %v2364_v0 }
  0x15   : > { %s2833_s27 = smov (!%p232_p10, %s231_s27), 5  ;;  %v2462_v3 = vld [vmem:[#allocation2] sm:$0x3] }
  0x16   : > { %s1906_s28 = sshll.u32 %s2833_s27, 4  ;;  %v274_v5 = vpack.c.bf16 %v2462_v3, %v2462_v3 }
  0x17   : > { %s243_s5 = scalar_lea.vmem %s2822_s1, %s1906_s28  ;;  %s2512_s9 = scalar_lea.vmem %s2821_s0, %s1906_s28 }
  0x18   : > { %v2457_v1 = vld [vmem:[%s243_s5] sm:$0xff]   ;;  %v2459_v2 = vld [vmem:[%s243_s5 + $0x8] sm:$0xff]   ;;  %v2465_v4 = vld [vmem:[%s243_s5 + $0x10] sm:$0xff]   ;;  %s2505_s6 = scalar_select %p271_p11, 0, 7 }
  0x19   : > { %1982 = vmatpush3.bf16.msra.mxu0 %v2457_v1  ;;  %1990 = vmatpush3.bf16.msra.mxu1 %v2465_v4  ;;  %v2470_v6 = vld [vmem:[%s243_s5 + $0x18] sm:$0xff]   ;;  %v2474_v7 = vld [vmem:[%s243_s5 + $0x20] sm:$0xff]   ;;  %v2480_v8 = vld [vmem:[%s243_s5 + $0x28] sm:$0xff]   ;;  %s246_s12 = scalar_select %p245_p12, %s2413_s19, 1 }
  0x1a   : > { %1983 = vmatprep.subr.bf16.mxu0 %v2364_v0  ;;  %1991 = vmatprep.subr.bf16.mxu1 %v2364_v0  ;;  %s1825_s10 = sshll.u32 %s2505_s6, 1 }
  0x1b   : > { %s2518_s11 = scalar_lea.vmem %s2512_s9, %s1825_s10  ;;  %s247_s20 = scalar_lea.vmem %s2823_s2, %s246_s12 }
  0x1c   : > { %v443_v9 = vld [vmem:[%s2518_s11] sm:$0x3]  ;;  %v1828_v13 = vld [vmem:[%s2518_s11 + $0x10] sm:$0x3]  ;;  %s1908_s22 = sshll.u32 %s246_s12, 4 }
  0x1d   : > { %1984 = vmatpush3.bf16.msra.mxu0 %v2459_v2  ;;  %1992 = vmatpush3.bf16.msra.mxu1 %v2470_v6  ;;  %v2527_v30 = vld [vmem:[%s247_s20] ss:$0 sm:$0xff]  ;;  %s2534_s28 = scalar_lea.vmem %s2824_s3, %s1908_s22 }
  0x1e   : > { %1997 = vmatprep.subr.bf16.mxu0 %v2364_v0  ;;  %2005 = vmatprep.subr.bf16.mxu1 %v2364_v0  ;;  %v1831_v34 = vld [vmem:[%s2518_s11 + $0x20] sm:$0x3]  ;;  %s472_s29 = scalar_lea.vmem %s2534_s28, %s1825_s10 }
  0x1f   : > { %s2565_s30 = scalar_select %p271_p11, 1, 6 }
  0x20   : > { %1986 = vmatmul.mubr.msk.bf16.vlgmr.msra.gmra.mrb[0].mxu0 %vm287_vm2, %v274_v5  ;;  %1994 = vmatmul.mubr.msk.bf16.vlgmr.msra.gmra.mrb[0].mxu1 %vm287_vm2, %v274_v5  ;;  %s2600_s8 = scalar_select %p271_p11, 2, 5 }
  0x21   : > { %1998 = vmatpush3.bf16.msra.mxu0 %v2474_v7  ;;  %2001 = vmatprep.mubr.msk.bf16.mxu0 %vm2365_vm1, %v2364_v0  ;;  %s1835_s5 = sshll.u32 %s2565_s30, 1 }
  0x22   : > { %1999 = vmatprep.subr.bf16.mxu0 %v2364_v0  ;;  %2006 = vmatpush3.bf16.msra.mxu1 %v2457_v1  ;;  %s601_s6 = scalar_lea.vmem %s2512_s9, %s1835_s5  ;;  %s631_s7 = scalar_lea.vmem %s2534_s28, %s1835_s5 }
  0x23   : > { %2009 = vmatprep.mubr.msk.bf16.mxu1 %vm2365_vm1, %v2364_v0  ;;  %2007 = vmatprep.subr.bf16.mxu1 %v2364_v0  ;;  %v602_v45 = vld [vmem:[%s601_s6] sm:$0x3]  ;;  %v1838_v49 = vld [vmem:[%s601_s6 + $0x10] sm:$0x3]  ;;  %s1845_s10 = sshll.u32 %s2600_s8, 1 }
  0x24   : > { %s760_s11 = scalar_lea.vmem %s2512_s9, %s1845_s10  ;;  %s790_s12 = scalar_lea.vmem %s2534_s28, %s1845_s10 }
  0x25   : > { %2000 = vmatpush3.bf16.msra.mxu0 %v2480_v8  ;;  %s2635_s13 = scalar_select %p271_p11, 3, 4 }
  0x26   : > { %2013 = vmatprep.subr.bf16.mxu0 %v2364_v0  ;;  %2008 = vmatpush3.bf16.msra.mxu1 %v2459_v2  ;;  %s2670_s23 = scalar_select %p271_p11, 4, 3 }
  0x27   : > { %2021 = vmatprep.subr.bf16.mxu1 %v2364_v0  ;;  %s1855_s14 = sshll.u32 %s2635_s13, 1 }
  0x28   : > { %2002 = vmatmul.mubr.msk.bf16.vlgmr.msra.gmra.mrb[4].mxu0 %vm287_vm2, %v274_v5  ;;  %s919_s20 = scalar_lea.vmem %s2512_s9, %s1855_s14  ;;  %s949_s22 = scalar_lea.vmem %s2534_s28, %s1855_s14 }
  0x29   : > { %2014 = vmatpush3.bf16.msra.mxu0 %v2465_v4  ;;  %2017 = vmatprep.mubr.msk.bf16.mxu0 %vm2365_vm1, %v2364_v0  ;;  %s1865_s27 = sshll.u32 %s2670_s23, 1 }
  0x2a   : > { %2015 = vmatprep.subr.bf16.mxu0 %v2364_v0  ;;  %s1108_s30 = scalar_lea.vmem %s2534_s28, %s1865_s27 }
  0x2b   : > { %s2705_s5 = scalar_select %p271_p11, 5, 2 }
  0x2c   : > { %s2739_s10 = scalar_select %p271_p11, 6, 1 }
  0x2d   : > { %2016 = vmatpush3.bf16.msra.mxu0 %v2470_v6  ;;  %s2761_s14 = scalar_select %p271_p11, 7, 0 }
  0x2e   : > { %2029 = vmatprep.subr.bf16.mxu0 %v2364_v0 }
  0xf3   : > { %v325_v10 = vpop.f32.mrb[0].mxu0  ;;  %v377_v17 = vpop.f32.mrb[0].mxu1 }
  0xf4   : > { %v444_v11 = vadd.f32 %v443_v9, %v325_v10  ;;  %v1987_v12 = vpop.f32.mrb[1].mxu0  ;;  %v454_v18 = vadd.f32 %v1828_v13, %v377_v17  ;;  %v1995_v19 = vpop.f32.mrb[1].mxu1 }
  0xf5   : > { %v328_v14 = vpop.f32.mrb[2].mxu0  ;;  %v380_v20 = vpop.f32.mrb[2].mxu1  ;;  %v1841_v12 = vld [vmem:[%s601_s6 + $0x20] sm:$0x3]  ;;  %s1875_s6 = sshll.u32 %s2705_s5, 1 }
  0xf6   : > { %v1826_v15 = vmul.f32 -1.442695, %v444_v11  ;;  %v1988_v16 = vpop.f32.mrb[3].mxu0  ;;  %v1829_v21 = vmul.f32 -1.442695, %v454_v18  ;;  %v1996_v22 = vpop.f32.mrb[3].mxu1  ;;  %s1267_s8 = scalar_lea.vmem %s2534_s28, %s1875_s6 }
  0xf8   : > { %2220 = vpow2.f32 %v1826_v15 }
  0xf9   : > { %2222 = vpow2.f32 %v1829_v21 }
  0xfb   : > { %v435_v23 = vpop.f32.mrb[4].mxu0 }
  0xfc   : > { %v2003_v24 = vpop.f32.mrb[5].mxu0  ;;  %v436_v32 = vadd.f32 %v2527_v30, %v435_v23  ;;  %v761_v23 = vld [vmem:[%s760_s11] sm:$0x3] }
  0xfd   : > { %v438_v25 = vpop.f32.mrb[6].mxu0 }
  0xfe   : > { %v2004_v26 = vpop.f32.mrb[7].mxu0 }
 0x102   : > { %v2221_v27 = vpop.eup %2220 }
 0x103   : > { %v448_v28 = vadd.f32 1.0, %v2221_v27  ;;  %v2223_v29 = vpop.eup %2222  ;;  %v1848_v27 = vld [vmem:[%s760_s11 + $0x10] sm:$0x3] }
 0x104   : > { %v458_v31 = vadd.f32 1.0, %v2223_v29 }
 0x105   : > { %2224 = vrcp.f32 %v448_v28 }
 0x106   : > { %2226 = vrcp.f32 %v458_v31 }
 0x10f   : > { %v2225_v33 = vpop.eup %2224 }
 0x110   : > { %v464_v35 = vmul.f32 %v2225_v33, %v436_v32  ;;  %v2227_v37 = vpop.eup %2226 }
 0x111   : > { %v467_v38 = vsub.f32 1.0, %v2227_v37  ;;  %v469_v40 = vmul.f32 %v2227_v37, %v2462_v3 }
 0x112   : > { %v465_v36 = vadd.f32 %v1831_v34, %v464_v35 }
 0x114   : > { %2228 = vtanh.f32 %v465_v36 }
 0x11e   : > { %v2229_v39 = vpop.eup %2228 }
 0x11f   : > { %v468_v41 = vmul.f32 %v2229_v39, %v467_v38 }
 0x121   : > { %v470_v42 = vadd.f32 %v469_v40, %v468_v41 }
 0x123   : > { %471 = vst.msk [vmem:[#allocation2] sm:$0x3] %vm269_vm0, %v470_v42  ;;  %473 = vst.msk [vmem:[%s472_s29] sm:$0x3] %vm269_vm0, %v470_v42  ;;  %s1078_s29 = scalar_lea.vmem %s2512_s9, %s1865_s27 }
 0x12a   : > { %v475_v43 = vld [vmem:[#allocation2] sm:$0x3] }
 0x12b   : > { %v476_v44 = vpack.c.bf16 %v475_v43, %v475_v43 }
 0x12d   : > { %2010 = vmatmul.mubr.msk.bf16.vlgmr.msra.gmra.mrb[4].mxu1 %vm287_vm2, %v476_v44  ;;  %2018 = vmatmul.mubr.msk.bf16.vlgmr.msra.gmra.mrb[8].mxu0 %vm287_vm2, %v476_v44 }
 0x12e   : > { %2022 = vmatpush3.bf16.msra.mxu1 %v2474_v7  ;;  %2025 = vmatprep.mubr.msk.bf16.mxu1 %vm2365_vm1, %v2364_v0 }
 0x12f   : > { %2023 = vmatprep.subr.bf16.mxu1 %v2364_v0  ;;  %2030 = vmatpush3.bf16.msra.mxu0 %v2457_v1 }
 0x130   : > { %2031 = vmatprep.subr.bf16.mxu0 %v2364_v0  ;;  %2033 = vmatprep.mubr.msk.bf16.mxu0 %vm2365_vm1, %v2364_v0 }
 0x132   : > { %2024 = vmatpush3.bf16.msra.mxu1 %v2480_v8 }
 0x133   : > { %2037 = vmatprep.subr.bf16.mxu1 %v2364_v0  ;;  %2032 = vmatpush3.bf16.msra.mxu0 %v2459_v2 }
 0x134   : > { %2045 = vmatprep.subr.bf16.mxu0 %v2364_v0 }
 0x135   : > { %2026 = vmatmul.mubr.msk.bf16.vlgmr.msra.gmra.mrb[8].mxu1 %vm287_vm2, %v476_v44 }
 0x136   : > { %2038 = vmatpush3.bf16.msra.mxu1 %v2465_v4  ;;  %2041 = vmatprep.mubr.msk.bf16.mxu1 %vm2365_vm1, %v2364_v0 }
 0x137   : > { %2039 = vmatprep.subr.bf16.mxu1 %v2364_v0 }
 0x13a   : > { %2040 = vmatpush3.bf16.msra.mxu1 %v2470_v6 }
 0x13b   : > { %2053 = vmatprep.subr.bf16.mxu1 %v2364_v0 }
 0x200   : > { %v514_v46 = vpop.f32.mrb[4].mxu1  ;;  %v554_v47 = vpop.f32.mrb[8].mxu0 }
 0x201   : > { %v603_v48 = vadd.f32 %v602_v45, %v514_v46  ;;  %v2011_v50 = vpop.f32.mrb[5].mxu1  ;;  %v2019_v51 = vpop.f32.mrb[9].mxu0  ;;  %v613_v57 = vadd.f32 %v1838_v49, %v554_v47 }
 0x202   : > { %v517_v52 = vpop.f32.mrb[6].mxu1  ;;  %v557_v53 = vpop.f32.mrb[10].mxu0 }
 0x203   : > { %v1836_v54 = vmul.f32 -1.442695, %v603_v48  ;;  %v2012_v55 = vpop.f32.mrb[7].mxu1  ;;  %v2020_v56 = vpop.f32.mrb[11].mxu0  ;;  %v1839_v58 = vmul.f32 -1.442695, %v613_v57 }
 0x204   : > { %v1851_v48 = vld [vmem:[%s760_s11 + $0x20] sm:$0x3]  ;;  %s1885_s11 = sshll.u32 %s2739_s10, 1 }
 0x205   : > { %2230 = vpow2.f32 %v1836_v54  ;;  %s1426_s13 = scalar_lea.vmem %s2534_s28, %s1885_s11 }
 0x206   : > { %2232 = vpow2.f32 %v1839_v58 }
 0x208   : > { %v594_v59 = vpop.f32.mrb[8].mxu1 }
 0x209   : > { %v2027_v60 = vpop.f32.mrb[9].mxu1  ;;  %v595_v10 = vadd.f32 %v2527_v30, %v594_v59  ;;  %v920_v59 = vld [vmem:[%s919_s20] sm:$0x3] }
 0x20a   : > { %v597_v61 = vpop.f32.mrb[10].mxu1 }
 0x20b   : > { %v2028_v62 = vpop.f32.mrb[11].mxu1 }
 0x20f   : > { %v2231_v63 = vpop.eup %2230 }
 0x210   : > { %v607_v3 = vadd.f32 1.0, %v2231_v63  ;;  %v2233_v5 = vpop.eup %2232  ;;  %v1858_v63 = vld [vmem:[%s919_s20 + $0x10] sm:$0x3] }
 0x211   : > { %v617_v9 = vadd.f32 1.0, %v2233_v5 }
 0x212   : > { %2234 = vrcp.f32 %v607_v3 }
 0x213   : > { %2236 = vrcp.f32 %v617_v9 }
 0x21c   : > { %v2235_v11 = vpop.eup %2234 }
 0x21d   : > { %v623_v13 = vmul.f32 %v2235_v11, %v595_v10  ;;  %v2237_v15 = vpop.eup %2236 }
 0x21e   : > { %v626_v16 = vsub.f32 1.0, %v2237_v15  ;;  %v628_v18 = vmul.f32 %v2237_v15, %v475_v43 }
 0x21f   : > { %v624_v14 = vadd.f32 %v1841_v12, %v623_v13 }
 0x221   : > { %2238 = vtanh.f32 %v624_v14 }
 0x22b   : > { %v2239_v17 = vpop.eup %2238 }
 0x22c   : > { %v627_v19 = vmul.f32 %v2239_v17, %v626_v16 }
 0x22e   : > { %v629_v20 = vadd.f32 %v628_v18, %v627_v19 }
 0x230   : > { %630 = vst.msk [vmem:[#allocation2] sm:$0x3] %vm269_vm0, %v629_v20  ;;  %632 = vst.msk [vmem:[%s631_s7] sm:$0x3] %vm269_vm0, %v629_v20  ;;  %s1237_s7 = scalar_lea.vmem %s2512_s9, %s1875_s6 }
 0x237   : > { %v634_v21 = vld [vmem:[#allocation2] sm:$0x3] }
 0x238   : > { %v635_v22 = vpack.c.bf16 %v634_v21, %v634_v21 }
 0x23a   : > { %2034 = vmatmul.mubr.msk.bf16.vlgmr.msra.gmra.mrb[12].mxu0 %vm287_vm2, %v635_v22  ;;  %2042 = vmatmul.mubr.msk.bf16.vlgmr.msra.gmra.mrb[12].mxu1 %vm287_vm2, %v635_v22 }
 0x23b   : > { %2046 = vmatpush3.bf16.msra.mxu0 %v2474_v7  ;;  %2049 = vmatprep.mubr.msk.bf16.mxu0 %vm2365_vm1, %v2364_v0 }
 0x23c   : > { %2047 = vmatprep.subr.bf16.mxu0 %v2364_v0  ;;  %2054 = vmatpush3.bf16.msra.mxu1 %v2457_v1 }
 0x23d   : > { %2055 = vmatprep.subr.bf16.mxu1 %v2364_v0  ;;  %2057 = vmatprep.mubr.msk.bf16.mxu1 %vm2365_vm1, %v2364_v0 }
 0x23f   : > { %2048 = vmatpush3.bf16.msra.mxu0 %v2480_v8 }
 0x240   : > { %2061 = vmatprep.subr.bf16.mxu0 %v2364_v0  ;;  %2056 = vmatpush3.bf16.msra.mxu1 %v2459_v2 }
 0x241   : > { %2069 = vmatprep.subr.bf16.mxu1 %v2364_v0 }
 0x242   : > { %2050 = vmatmul.mubr.msk.bf16.vlgmr.msra.gmra.mrb[16].mxu0 %vm287_vm2, %v635_v22 }
 0x243   : > { %2062 = vmatpush3.bf16.msra.mxu0 %v2465_v4  ;;  %2065 = vmatprep.mubr.msk.bf16.mxu0 %vm2365_vm1, %v2364_v0 }
 0x244   : > { %2063 = vmatprep.subr.bf16.mxu0 %v2364_v0 }
 0x247   : > { %2064 = vmatpush3.bf16.msra.mxu0 %v2470_v6 }
 0x248   : > { %2077 = vmatprep.subr.bf16.mxu0 %v2364_v0 }
 0x30d   : > { %v673_v24 = vpop.f32.mrb[12].mxu0  ;;  %v713_v25 = vpop.f32.mrb[12].mxu1 }
 0x30e   : > { %v762_v26 = vadd.f32 %v761_v23, %v673_v24  ;;  %v2035_v28 = vpop.f32.mrb[13].mxu0  ;;  %v2043_v29 = vpop.f32.mrb[13].mxu1  ;;  %v772_v36 = vadd.f32 %v1848_v27, %v713_v25 }
 0x30f   : > { %v676_v31 = vpop.f32.mrb[14].mxu0  ;;  %v716_v32 = vpop.f32.mrb[14].mxu1 }
 0x310   : > { %v1846_v33 = vmul.f32 -1.442695, %v762_v26  ;;  %v2036_v34 = vpop.f32.mrb[15].mxu0  ;;  %v2044_v35 = vpop.f32.mrb[15].mxu1  ;;  %v1849_v37 = vmul.f32 -1.442695, %v772_v36 }
 0x311   : > { %v1861_v26 = vld [vmem:[%s919_s20 + $0x20] sm:$0x3]  ;;  %s1895_s20 = sshll.u32 %s2761_s14, 1 }
 0x312   : > { %2240 = vpow2.f32 %v1846_v33  ;;  %s1585_s23 = scalar_lea.vmem %s2534_s28, %s1895_s20 }
 0x313   : > { %2242 = vpow2.f32 %v1849_v37 }
 0x315   : > { %v753_v38 = vpop.f32.mrb[16].mxu0 }
 0x316   : > { %v2051_v39 = vpop.f32.mrb[17].mxu0  ;;  %v754_v46 = vadd.f32 %v2527_v30, %v753_v38  ;;  %v1079_v38 = vld [vmem:[%s1078_s29] sm:$0x3] }
 0x317   : > { %v756_v40 = vpop.f32.mrb[18].mxu0 }
 0x318   : > { %v2052_v41 = vpop.f32.mrb[19].mxu0 }
 0x31c   : > { %v2241_v42 = vpop.eup %2240 }
 0x31d   : > { %v766_v43 = vadd.f32 1.0, %v2241_v42  ;;  %v2243_v44 = vpop.eup %2242  ;;  %v1868_v42 = vld [vmem:[%s1078_s29 + $0x10] sm:$0x3] }
 0x31e   : > { %v776_v45 = vadd.f32 1.0, %v2243_v44 }
 0x31f   : > { %2244 = vrcp.f32 %v766_v43 }
 0x320   : > { %2246 = vrcp.f32 %v776_v45 }
 0x329   : > { %v2245_v47 = vpop.eup %2244 }
 0x32a   : > { %v782_v49 = vmul.f32 %v2245_v47, %v754_v46  ;;  %v2247_v51 = vpop.eup %2246 }
 0x32b   : > { %v785_v52 = vsub.f32 1.0, %v2247_v51  ;;  %v787_v54 = vmul.f32 %v2247_v51, %v634_v21 }
 0x32c   : > { %v783_v50 = vadd.f32 %v1851_v48, %v782_v49 }
 0x32e   : > { %2248 = vtanh.f32 %v783_v50 }
 0x338   : > { %v2249_v53 = vpop.eup %2248 }
 0x339   : > { %v786_v55 = vmul.f32 %v2249_v53, %v785_v52 }
 0x33b   : > { %v788_v56 = vadd.f32 %v787_v54, %v786_v55 }
 0x33d   : > { %789 = vst.msk [vmem:[#allocation2] sm:$0x3] %vm269_vm0, %v788_v56  ;;  %791 = vst.msk [vmem:[%s790_s12] sm:$0x3] %vm269_vm0, %v788_v56  ;;  %s1396_s12 = scalar_lea.vmem %s2512_s9, %s1885_s11 }
 0x344   : > { %v793_v57 = vld [vmem:[#allocation2] sm:$0x3] }
 0x345   : > { %v794_v58 = vpack.c.bf16 %v793_v57, %v793_v57 }
 0x347   : > { %2058 = vmatmul.mubr.msk.bf16.vlgmr.msra.gmra.mrb[16].mxu1 %vm287_vm2, %v794_v58  ;;  %2066 = vmatmul.mubr.msk.bf16.vlgmr.msra.gmra.mrb[20].mxu0 %vm287_vm2, %v794_v58 }
 0x348   : > { %2070 = vmatpush3.bf16.msra.mxu1 %v2474_v7  ;;  %2073 = vmatprep.mubr.msk.bf16.mxu1 %vm2365_vm1, %v2364_v0 }
 0x349   : > { %2071 = vmatprep.subr.bf16.mxu1 %v2364_v0  ;;  %2078 = vmatpush3.bf16.msra.mxu0 %v2457_v1 }
 0x34a   : > { %2079 = vmatprep.subr.bf16.mxu0 %v2364_v0  ;;  %2081 = vmatprep.mubr.msk.bf16.mxu0 %vm2365_vm1, %v2364_v0 }
 0x34c   : > { %2072 = vmatpush3.bf16.msra.mxu1 %v2480_v8 }
 0x34d   : > { %2085 = vmatprep.subr.bf16.mxu1 %v2364_v0  ;;  %2080 = vmatpush3.bf16.msra.mxu0 %v2459_v2 }
 0x34e   : > { %2093 = vmatprep.subr.bf16.mxu0 %v2364_v0 }
 0x34f   : > { %2074 = vmatmul.mubr.msk.bf16.vlgmr.msra.gmra.mrb[20].mxu1 %vm287_vm2, %v794_v58 }
 0x350   : > { %2086 = vmatpush3.bf16.msra.mxu1 %v2465_v4  ;;  %2089 = vmatprep.mubr.msk.bf16.mxu1 %vm2365_vm1, %v2364_v0 }
 0x351   : > { %2087 = vmatprep.subr.bf16.mxu1 %v2364_v0 }
 0x354   : > { %2088 = vmatpush3.bf16.msra.mxu1 %v2470_v6 }
 0x355   : > { %2101 = vmatprep.subr.bf16.mxu1 %v2364_v0 }
 0x41a   : > { %v832_v60 = vpop.f32.mrb[16].mxu1  ;;  %v872_v61 = vpop.f32.mrb[20].mxu0 }
 0x41b   : > { %v921_v62 = vadd.f32 %v920_v59, %v832_v60  ;;  %v2059_v3 = vpop.f32.mrb[17].mxu1  ;;  %v2067_v5 = vpop.f32.mrb[21].mxu0  ;;  %v931_v14 = vadd.f32 %v1858_v63, %v872_v61 }
 0x41c   : > { %v835_v9 = vpop.f32.mrb[18].mxu1  ;;  %v875_v10 = vpop.f32.mrb[22].mxu0 }
 0x41d   : > { %v1856_v11 = vmul.f32 -1.442695, %v921_v62  ;;  %v2060_v12 = vpop.f32.mrb[19].mxu1  ;;  %v2068_v13 = vpop.f32.mrb[23].mxu0  ;;  %v1859_v15 = vmul.f32 -1.442695, %v931_v14 }
 0x41e   : > { %v1871_v62 = vld [vmem:[%s1078_s29 + $0x20] sm:$0x3]  ;;  %s1903_s29 = sshll.u32 %s2413_s19, 5  ;;  %s2366_s19 = smov [#allocation3]  }
 0x41f   : > { %2250 = vpow2.f32 %v1856_v11  ;;  %s2304_s11 = sshll.u32 %s2366_s19, 4  ;;  %s2305_s11 = int_to_ptr.vmem [resolvable:$false] %s2304_s11 }
 0x420   : > { %2252 = vpow2.f32 %v1859_v15 }
 0x422   : > { %v912_v16 = vpop.f32.mrb[20].mxu1 }
 0x423   : > { %v2075_v17 = vpop.f32.mrb[21].mxu1  ;;  %v913_v24 = vadd.f32 %v2527_v30, %v912_v16  ;;  %v1238_v16 = vld [vmem:[%s1237_s7] sm:$0x3] }
 0x424   : > { %v915_v18 = vpop.f32.mrb[22].mxu1 }
 0x425   : > { %v2076_v19 = vpop.f32.mrb[23].mxu1 }
 0x429   : > { %v2251_v20 = vpop.eup %2250 }
 0x42a   : > { %v925_v21 = vadd.f32 1.0, %v2251_v20  ;;  %v2253_v22 = vpop.eup %2252  ;;  %v1878_v20 = vld [vmem:[%s1237_s7 + $0x10] sm:$0x3] }
 0x42b   : > { %v935_v23 = vadd.f32 1.0, %v2253_v22 }
 0x42c   : > { %2254 = vrcp.f32 %v925_v21 }
 0x42d   : > { %2256 = vrcp.f32 %v935_v23 }
 0x436   : > { %v2255_v25 = vpop.eup %2254 }
 0x437   : > { %v941_v27 = vmul.f32 %v2255_v25, %v913_v24  ;;  %v2257_v29 = vpop.eup %2256 }
 0x438   : > { %v944_v31 = vsub.f32 1.0, %v2257_v29  ;;  %v946_v33 = vmul.f32 %v2257_v29, %v793_v57 }
 0x439   : > { %v942_v28 = vadd.f32 %v1861_v26, %v941_v27 }
 0x43b   : > { %2258 = vtanh.f32 %v942_v28 }
 0x445   : > { %v2259_v32 = vpop.eup %2258 }
 0x446   : > { %v945_v34 = vmul.f32 %v2259_v32, %v944_v31 }
 0x448   : > { %v947_v35 = vadd.f32 %v946_v33, %v945_v34 }
 0x44a   : > { %948 = vst.msk [vmem:[#allocation2] sm:$0x3] %vm269_vm0, %v947_v35  ;;  %950 = vst.msk [vmem:[%s949_s22] sm:$0x3] %vm269_vm0, %v947_v35  ;;  %s1555_s22 = scalar_lea.vmem %s2512_s9, %s1895_s20  ;;  %s228_s9 = sand.u32 1, %s2354_s16  }
 0x44b   : > { %s1800_s27 = sshll.u32 %s228_s9, 1  ;;  %s1595_s28 = scalar_lea.sflag [#allocation4], %s228_s9 }
 0x451   : > { %v952_v36 = vld [vmem:[#allocation2] sm:$0x3] }
 0x452   : > { %v953_v37 = vpack.c.bf16 %v952_v36, %v952_v36 }
 0x454   : > { %2082 = vmatmul.mubr.msk.bf16.vlgmr.msra.gmra.mrb[24].mxu0 %vm287_vm2, %v953_v37  ;;  %2090 = vmatmul.mubr.msk.bf16.vlgmr.msra.gmra.mrb[24].mxu1 %vm287_vm2, %v953_v37 }
 0x455   : > { %2094 = vmatpush3.bf16.msra.mxu0 %v2474_v7  ;;  %2097 = vmatprep.mubr.msk.bf16.mxu0 %vm2365_vm1, %v2364_v0 }
 0x456   : > { %2095 = vmatprep.subr.bf16.mxu0 %v2364_v0  ;;  %2102 = vmatpush3.bf16.msra.mxu1 %v2457_v1 }
 0x457   : > { %2103 = vmatprep.subr.bf16.mxu1 %v2364_v0  ;;  %2105 = vmatprep.mubr.msk.bf16.mxu1 %vm2365_vm1, %v2364_v0 }
 0x459   : > { %2096 = vmatpush3.bf16.msra.mxu0 %v2480_v8 }
 0x45a   : > { %2109 = vmatprep.subr.bf16.mxu0 %v2364_v0  ;;  %2104 = vmatpush3.bf16.msra.mxu1 %v2459_v2 }
 0x45b   : > { %2117 = vmatprep.subr.bf16.mxu1 %v2364_v0 }
 0x45c   : > { %2098 = vmatmul.mubr.msk.bf16.vlgmr.msra.gmra.mrb[28].mxu0 %vm287_vm2, %v953_v37 }
 0x45d   : > { %2110 = vmatpush3.bf16.msra.mxu0 %v2465_v4  ;;  %2113 = vmatprep.mubr.msk.bf16.mxu0 %vm2365_vm1, %v2364_v0 }
 0x45e   : > { %2111 = vmatprep.subr.bf16.mxu0 %v2364_v0 }
 0x461   : > { %2112 = vmatpush3.bf16.msra.mxu0 %v2470_v6 }
 0x462   : > { %2125 = vmatprep.subr.bf16.mxu0 %v2364_v0 }
 0x527   : > { %v991_v39 = vpop.f32.mrb[24].mxu0  ;;  %v1031_v40 = vpop.f32.mrb[24].mxu1 }
 0x528   : > { %v1080_v41 = vadd.f32 %v1079_v38, %v991_v39  ;;  %v2083_v43 = vpop.f32.mrb[25].mxu0  ;;  %v2091_v44 = vpop.f32.mrb[25].mxu1  ;;  %v1090_v50 = vadd.f32 %v1868_v42, %v1031_v40 }
 0x529   : > { %v994_v45 = vpop.f32.mrb[26].mxu0  ;;  %v1034_v46 = vpop.f32.mrb[26].mxu1 }
 0x52a   : > { %v1866_v47 = vmul.f32 -1.442695, %v1080_v41  ;;  %v2084_v48 = vpop.f32.mrb[27].mxu0  ;;  %v2092_v49 = vpop.f32.mrb[27].mxu1  ;;  %v1869_v51 = vmul.f32 -1.442695, %v1090_v50 }
 0x52b   : > { %v1881_v41 = vld [vmem:[%s1237_s7 + $0x20] sm:$0x3] }
 0x52c   : > { %2260 = vpow2.f32 %v1866_v47 }
 0x52d   : > { %2262 = vpow2.f32 %v1869_v51 }
 0x52f   : > { %v1071_v52 = vpop.f32.mrb[28].mxu0 }
 0x530   : > { %v2099_v53 = vpop.f32.mrb[29].mxu0  ;;  %v1072_v60 = vadd.f32 %v2527_v30, %v1071_v52 }
 0x531   : > { %v1074_v54 = vpop.f32.mrb[30].mxu0 }
 0x532   : > { %v2100_v55 = vpop.f32.mrb[31].mxu0 }
 0x536   : > { %v2261_v56 = vpop.eup %2260 }
 0x537   : > { %v1084_v57 = vadd.f32 1.0, %v2261_v56  ;;  %v2263_v58 = vpop.eup %2262 }
 0x538   : > { %v1094_v59 = vadd.f32 1.0, %v2263_v58 }
 0x539   : > { %2264 = vrcp.f32 %v1084_v57 }
 0x53a   : > { %2266 = vrcp.f32 %v1094_v59 }
 0x543   : > { %v2265_v61 = vpop.eup %2264 }
 0x544   : > { %v1100_v63 = vmul.f32 %v2265_v61, %v1072_v60  ;;  %v2267_v5 = vpop.eup %2266 }
 0x545   : > { %v1103_v9 = vsub.f32 1.0, %v2267_v5  ;;  %v1105_v11 = vmul.f32 %v2267_v5, %v952_v36 }
 0x546   : > { %v1101_v3 = vadd.f32 %v1871_v62, %v1100_v63 }
 0x548   : > { %2268 = vtanh.f32 %v1101_v3 }
 0x552   : > { %v2269_v10 = vpop.eup %2268 }
 0x553   : > { %v1104_v12 = vmul.f32 %v2269_v10, %v1103_v9 }
 0x555   : > { %v1106_v13 = vadd.f32 %v1105_v11, %v1104_v12 }
 0x557   : > { %1107 = vst.msk [vmem:[#allocation2] sm:$0x3] %vm269_vm0, %v1106_v13  ;;  %1109 = vst.msk [vmem:[%s1108_s30] sm:$0x3] %vm269_vm0, %v1106_v13  ;;  %s230_s30 = scalar_lea.vmem [#allocation3], %s1800_s27 }
 0x558   : > { %s1611_s5 = sshll.u32 %s230_s30, 4  ;;  %s2780_s5 = int_to_ptr.vmem [resolvable:$true] %s1611_s5 }
 0x559   : > { %s2300_s10 = scalar_lea.vmem %s2780_s5, 32  ;;  %p2307_p2 = scmp.lt.s32.totalorder %s2780_s5, %s2305_s11 }
 0x55a   : > { %p2301_p13 = scmp.ne.s32.totalorder %s2780_s5, %s2300_s10 }
 0x55c   : > { %p2302_p0 = pnand %p2301_p13, %p2430_p5 }
 0x55e   : > { %v1111_v14 = vld [vmem:[#allocation2] sm:$0x3]  ;;  %p2303_p1 = pneg %p2302_p0 }
 0x55f   : > { %v1112_v15 = vpack.c.bf16 %v1111_v14, %v1111_v14 }
 0x561   : > { %2106 = vmatmul.mubr.msk.bf16.vlgmr.msra.gmra.mrb[28].mxu1 %vm287_vm2, %v1112_v15  ;;  %2114 = vmatmul.mubr.msk.bf16.vlgmr.msra.gmra.mrb[32].mxu0 %vm287_vm2, %v1112_v15 }
 0x562   : > { %2118 = vmatpush3.bf16.msra.mxu1 %v2474_v7  ;;  %2121 = vmatprep.mubr.msk.bf16.mxu1 %vm2365_vm1, %v2364_v0 }
 0x563   : > { %2119 = vmatprep.subr.bf16.mxu1 %v2364_v0  ;;  %2126 = vmatpush3.bf16.msra.mxu0 %v2457_v1 }
 0x564   : > { %2127 = vmatprep.subr.bf16.mxu0 %v2364_v0  ;;  %2129 = vmatprep.mubr.msk.bf16.mxu0 %vm2365_vm1, %v2364_v0 }
 0x566   : > { %2120 = vmatpush3.bf16.msra.mxu1 %v2480_v8 }
 0x567   : > { %2133 = vmatprep.subr.bf16.mxu1 %v2364_v0  ;;  %2128 = vmatpush3.bf16.msra.mxu0 %v2459_v2 }
 0x568   : > { %2141 = vmatprep.subr.bf16.mxu0 %v2364_v0 }
 0x569   : > { %2122 = vmatmul.mubr.msk.bf16.vlgmr.msra.gmra.mrb[32].mxu1 %vm287_vm2, %v1112_v15  ;;  %v1891_v15 = vld [vmem:[%s1396_s12 + $0x20] sm:$0x3] }
 0x56a   : > { %2134 = vmatpush3.bf16.msra.mxu1 %v2465_v4  ;;  %2137 = vmatprep.mubr.msk.bf16.mxu1 %vm2365_vm1, %v2364_v0 }
 0x56b   : > { %2135 = vmatprep.subr.bf16.mxu1 %v2364_v0 }
 0x56e   : > { %2136 = vmatpush3.bf16.msra.mxu1 %v2470_v6 }
 0x56f   : > { %2149 = vmatprep.subr.bf16.mxu1 %v2364_v0 }
 0x634   : > { %v1150_v17 = vpop.f32.mrb[28].mxu1  ;;  %v1190_v18 = vpop.f32.mrb[32].mxu0 }
 0x635   : > { %v1239_v19 = vadd.f32 %v1238_v16, %v1150_v17  ;;  %v2107_v21 = vpop.f32.mrb[29].mxu1  ;;  %v2115_v22 = vpop.f32.mrb[33].mxu0  ;;  %v1249_v28 = vadd.f32 %v1878_v20, %v1190_v18 }
 0x636   : > { %v1153_v23 = vpop.f32.mrb[30].mxu1  ;;  %v1193_v24 = vpop.f32.mrb[34].mxu0 }
 0x637   : > { %v1876_v25 = vmul.f32 -1.442695, %v1239_v19  ;;  %v2108_v26 = vpop.f32.mrb[31].mxu1  ;;  %v2116_v27 = vpop.f32.mrb[35].mxu0  ;;  %v1879_v29 = vmul.f32 -1.442695, %v1249_v28 }
 0x638   : > { %v1556_v26 = vld [vmem:[%s1555_s22] sm:$0x3] }
 0x639   : > { %2270 = vpow2.f32 %v1876_v25 }
 0x63a   : > { %2272 = vpow2.f32 %v1879_v29  ;;  %v1898_v29 = vld [vmem:[%s1555_s22 + $0x10] sm:$0x3] }
 0x63c   : > { %v1230_v31 = vpop.f32.mrb[32].mxu1 }
 0x63d   : > { %v2123_v32 = vpop.f32.mrb[33].mxu1  ;;  %v1231_v39 = vadd.f32 %v2527_v30, %v1230_v31 }
 0x63e   : > { %v1233_v33 = vpop.f32.mrb[34].mxu1 }
 0x63f   : > { %v2124_v34 = vpop.f32.mrb[35].mxu1 }
 0x643   : > { %v2271_v35 = vpop.eup %2270 }
 0x644   : > { %v1243_v36 = vadd.f32 1.0, %v2271_v35  ;;  %v2273_v37 = vpop.eup %2272 }
 0x645   : > { %v1253_v38 = vadd.f32 1.0, %v2273_v37 }
 0x646   : > { %2274 = vrcp.f32 %v1243_v36 }
 0x647   : > { %2276 = vrcp.f32 %v1253_v38 }
 0x650   : > { %v2275_v40 = vpop.eup %2274 }
 0x651   : > { %v1259_v42 = vmul.f32 %v2275_v40, %v1231_v39  ;;  %v2277_v44 = vpop.eup %2276 }
 0x652   : > { %v1262_v45 = vsub.f32 1.0, %v2277_v44  ;;  %v1264_v47 = vmul.f32 %v2277_v44, %v1111_v14 }
 0x653   : > { %v1260_v43 = vadd.f32 %v1881_v41, %v1259_v42 }
 0x655   : > { %2278 = vtanh.f32 %v1260_v43 }
 0x65f   : > { %v2279_v46 = vpop.eup %2278 }
 0x660   : > { %v1263_v48 = vmul.f32 %v2279_v46, %v1262_v45 }
 0x662   : > { %v1265_v49 = vadd.f32 %v1264_v47, %v1263_v48  ;;  %v1901_v48 = vld [vmem:[%s1555_s22 + $0x20] sm:$0x3] }
 0x664   : > { %1268 = vst.msk [vmem:[%s1267_s8] sm:$0x3] %vm269_vm0, %v1265_v49  ;;  %1266 = vst.msk [vmem:[#allocation2] sm:$0x3] %vm269_vm0, %v1265_v49  ;;  %s2778_s8 = scalar_lea.hbm %s2825_s4, %s1903_s29 }
 0x66b   : > { %v1270_v50 = vld [vmem:[#allocation2] sm:$0x3] }
 0x66c   : > { %v1271_v51 = vpack.c.bf16 %v1270_v50, %v1270_v50 }
 0x66e   : > { %2130 = vmatmul.mubr.msk.bf16.vlgmr.msra.gmra.mrb[36].mxu0 %vm287_vm2, %v1271_v51  ;;  %2138 = vmatmul.mubr.msk.bf16.vlgmr.msra.gmra.mrb[36].mxu1 %vm287_vm2, %v1271_v51 }
 0x66f   : > { %2142 = vmatpush3.bf16.msra.mxu0 %v2474_v7  ;;  %2145 = vmatprep.mubr.msk.bf16.mxu0 %vm2365_vm1, %v2364_v0 }
 0x670   : > { %2143 = vmatprep.subr.bf16.mxu0 %v2364_v0  ;;  %2150 = vmatpush3.bf16.msra.mxu1 %v2457_v1  ;;  %v1397_v1 = vld [vmem:[%s1396_s12] sm:$0x3] }
 0x671   : > { %2151 = vmatprep.subr.bf16.mxu1 %v2364_v0  ;;  %2153 = vmatprep.mubr.msk.bf16.mxu1 %vm2365_vm1, %v2364_v0 }
 0x673   : > { %2144 = vmatpush3.bf16.msra.mxu0 %v2480_v8 }
 0x674   : > { %2157 = vmatprep.subr.bf16.mxu0 %v2364_v0  ;;  %2152 = vmatpush3.bf16.msra.mxu1 %v2459_v2 }
 0x675   : > { %2165 = vmatprep.subr.bf16.mxu1 %v2364_v0 }
 0x676   : > { %2146 = vmatmul.mubr.msk.bf16.vlgmr.msra.gmra.mrb[40].mxu0 %vm287_vm2, %v1271_v51 }
 0x677   : > { %2158 = vmatpush3.bf16.msra.mxu0 %v2465_v4  ;;  %2161 = vmatprep.mubr.msk.bf16.mxu0 %vm2365_vm1, %v2364_v0  ;;  %v1888_v4 = vld [vmem:[%s1396_s12 + $0x10] sm:$0x3]  ;;  %s2306_s12 = scalar_lea.vmem %s2305_s11, 64 }
 0x678   : > { %2159 = vmatprep.subr.bf16.mxu0 %v2364_v0  ;;  %p2308_p3 = scmp.lt.s32.totalorder %s2306_s12, %s2300_s10 }
 0x67a   : > { %p2309_p4 = por %p2308_p3, %p2307_p2 }
 0x67b   : > { %2160 = vmatpush3.bf16.msra.mxu0 %v2470_v6 }
 0x67c   : > { %p2310_p7 = pnand %p2309_p4, %p2303_p1 }
 0x741   : > { %v1309_v2 = vpop.f32.mrb[36].mxu0  ;;  %v1349_v52 = vpop.f32.mrb[36].mxu1 }
 0x742   : > { %v1398_v53 = vadd.f32 %v1397_v1, %v1309_v2  ;;  %v2131_v54 = vpop.f32.mrb[37].mxu0  ;;  %v2139_v55 = vpop.f32.mrb[37].mxu1  ;;  %v1408_v60 = vadd.f32 %v1888_v4, %v1349_v52 }
 0x743   : > { %v1312_v56 = vpop.f32.mrb[38].mxu0  ;;  %v1352_v57 = vpop.f32.mrb[38].mxu1 }
 0x744   : > { %v1886_v58 = vmul.f32 -1.442695, %v1398_v53  ;;  %v2132_v59 = vpop.f32.mrb[39].mxu0  ;;  %v2140_v6 = vpop.f32.mrb[39].mxu1  ;;  %v1889_v61 = vmul.f32 -1.442695, %v1408_v60 }
 0x746   : > { %2280 = vpow2.f32 %v1886_v58 }
 0x747   : > { %2282 = vpow2.f32 %v1889_v61 }
 0x749   : > { %v1389_v62 = vpop.f32.mrb[40].mxu0 }
 0x74a   : > { %v2147_v63 = vpop.f32.mrb[41].mxu0  ;;  %v1390_v13 = vadd.f32 %v2527_v30, %v1389_v62 }
 0x74b   : > { %v1392_v3 = vpop.f32.mrb[42].mxu0 }
 0x74c   : > { %v2148_v5 = vpop.f32.mrb[43].mxu0 }
 0x750   : > { %v2281_v9 = vpop.eup %2280 }
 0x751   : > { %v1402_v10 = vadd.f32 1.0, %v2281_v9  ;;  %v2283_v11 = vpop.eup %2282 }
 0x752   : > { %v1412_v12 = vadd.f32 1.0, %v2283_v11 }
 0x753   : > { %2284 = vrcp.f32 %v1402_v10 }
 0x754   : > { %2286 = vrcp.f32 %v1412_v12 }
 0x75d   : > { %v2285_v14 = vpop.eup %2284 }
 0x75e   : > { %v1418_v16 = vmul.f32 %v2285_v14, %v1390_v13  ;;  %v2287_v18 = vpop.eup %2286 }
 0x75f   : > { %v1421_v19 = vsub.f32 1.0, %v2287_v18  ;;  %v1423_v21 = vmul.f32 %v2287_v18, %v1270_v50 }
 0x760   : > { %v1419_v17 = vadd.f32 %v1891_v15, %v1418_v16 }
 0x762   : > { %2288 = vtanh.f32 %v1419_v17 }
 0x76c   : > { %v2289_v20 = vpop.eup %2288 }
 0x76d   : > { %v1422_v22 = vmul.f32 %v2289_v20, %v1421_v19 }
 0x76f   : > { %v1424_v23 = vadd.f32 %v1423_v21, %v1422_v22 }
 0x771   : > { %1427 = vst.msk [vmem:[%s1426_s13] sm:$0x3] %vm269_vm0, %v1424_v23  ;;  %1425 = vst.msk [vmem:[#allocation2] sm:$0x3] %vm269_vm0, %v1424_v23 }
 0x778   : > { %v1429_v24 = vld [vmem:[#allocation2] sm:$0x3] }
 0x779   : > { %v1430_v25 = vpack.c.bf16 %v1429_v24, %v1429_v24 }
 0x77b   : > { %2154 = vmatmul.mubr.msk.bf16.vlgmr.msra.gmra.mrb[40].mxu1 %vm287_vm2, %v1430_v25  ;;  %2162 = vmatmul.mubr.msk.bf16.vlgmr.msra.gmra.mrb[44].mxu0 %vm287_vm2, %v1430_v25 }
 0x77c   : > { %2166 = vmatpush3.bf16.msra.mxu1 %v2474_v7  ;;  %2169 = vmatprep.mubr.msk.bf16.mxu1 %vm2365_vm1, %v2364_v0 }
 0x77d   : > { %2167 = vmatprep.subr.bf16.mxu1 %v2364_v0 }
 0x780   : > { %2168 = vmatpush3.bf16.msra.mxu1 %v2480_v8 }
 0x783   : > { %2170 = vmatmul.mubr.msk.bf16.vlgmr.msra.gmra.mrb[44].mxu1 %vm287_vm2, %v1430_v25 }
 0x84e   : > { %v1468_v27 = vpop.f32.mrb[40].mxu1  ;;  %v1508_v7 = vpop.f32.mrb[44].mxu0 }
 0x84f   : > { %v1557_v28 = vadd.f32 %v1556_v26, %v1468_v27  ;;  %v2155_v31 = vpop.f32.mrb[41].mxu1  ;;  %v2163_v32 = vpop.f32.mrb[45].mxu0  ;;  %v1567_v36 = vadd.f32 %v1898_v29, %v1508_v7 }
 0x850   : > { %v1471_v0 = vpop.f32.mrb[42].mxu1  ;;  %v1511_v33 = vpop.f32.mrb[46].mxu0 }
 0x851   : > { %v1896_v8 = vmul.f32 -1.442695, %v1557_v28  ;;  %v2156_v34 = vpop.f32.mrb[43].mxu1  ;;  %v2164_v35 = vpop.f32.mrb[47].mxu0  ;;  %v1899_v37 = vmul.f32 -1.442695, %v1567_v36 }
 0x853   : > { %2290 = vpow2.f32 %v1896_v8 }
 0x854   : > { %2292 = vpow2.f32 %v1899_v37 }
 0x856   : > { %v1548_v38 = vpop.f32.mrb[44].mxu1 }
 0x857   : > { %v2171_v39 = vpop.f32.mrb[45].mxu1  ;;  %v1549_v46 = vadd.f32 %v2527_v30, %v1548_v38 }
 0x858   : > { %v1551_v40 = vpop.f32.mrb[46].mxu1 }
 0x859   : > { %v2172_v41 = vpop.f32.mrb[47].mxu1 }
 0x85d   : > { %v2291_v42 = vpop.eup %2290 }
 0x85e   : > { %v1561_v43 = vadd.f32 1.0, %v2291_v42  ;;  %v2293_v44 = vpop.eup %2292 }
 0x85f   : > { %v1571_v45 = vadd.f32 1.0, %v2293_v44 }
 0x860   : > { %2294 = vrcp.f32 %v1561_v43 }
 0x861   : > { %2296 = vrcp.f32 %v1571_v45 }
 0x86a   : > { %v2295_v47 = vpop.eup %2294 }
 0x86b   : > { %v1577_v49 = vmul.f32 %v2295_v47, %v1549_v46  ;;  %v2297_v51 = vpop.eup %2296 }
 0x86c   : > { %v1580_v1 = vsub.f32 1.0, %v2297_v51  ;;  %v1582_v52 = vmul.f32 %v2297_v51, %v1429_v24 }
 0x86d   : > { %v1578_v50 = vadd.f32 %v1901_v48, %v1577_v49 }
 0x86f   : > { %2298 = vtanh.f32 %v1578_v50 }
 0x879   : > { %v2299_v2 = vpop.eup %2298 }
 0x87a   : > { %v1581_v53 = vmul.f32 %v2299_v2, %v1580_v1 }
 0x87c   : > { %v1583_v4 = vadd.f32 %v1582_v52, %v1581_v53 }
 0x87e   : > { %1586 = vst.msk [vmem:[%s1585_s23] sm:$0x3] %vm269_vm0, %v1583_v4  ;;  %1584 = vst.msk [vmem:[#allocation2] sm:$0x3] %vm269_vm0, %v1583_v4 }
 0x885   : > { %v1587_v30 = vld [vmem:[#allocation2] sm:$0x3] }
 0x886   : > { %1588 = vst.msk [vmem:[%s230_s30] sm:$0x3] %vm269_vm0, %v1587_v30 }
 0x887   : > { %2313 = shalt.err (!%p2310_p7)
}
 0x888   : > { %s2314_s13 = scalar_lea.hbm %s2778_s8, 32  ;;  %s2318_s22 = scalar_lea.hbm %s2825_s4, 64 }
 0x889   : > { %p2315_p8 = scmp.ne.s32.totalorder %s2778_s8, %s2314_s13  ;;  %p2319_p11 = scmp.lt.u32.totalorder %s2778_s8, %s2825_s4 }
 0x88a   : > { %p2320_p12 = scmp.lt.u32.totalorder %s2318_s22, %s2314_s13  ;;  %p2322_p0 = scmp.lt.u32.totalorder %s2314_s13, %s2778_s8 }
 0x88b   : > { %p2316_p9 = pnand %p2315_p8, %p2430_p5 }
 0x88c   : > { %p2321_p13 = por %p2320_p12, %p2319_p11 }
 0x88d   : > { %p2317_p10 = pneg %p2316_p9 }
 0x88e   : > { %p2323_p1 = por %p2322_p0, %p2321_p13 }
 0x890   : > { %p2324_p2 = pnand %p2323_p1, %p2317_p10 }
 0x892   : > { %2327 = shalt.err (!%p2324_p2)
}
 0x893   : > { %2173 = dma.vmem_to_hbm [thread:$0]  (%p2430_p5), %s2780_s5, 32, %s2778_s8, %s1595_s28  }
 0x894 PF: > { %p2179_p3 = scmp.ge.s32.totalorder %s2362_s18, 2  ;;  %s1631_s27 = sand.u32 1, %s2350_s15  }
 0x895   : > { %s1632_s29 = scalar_lea.sflag [#allocation4], %s1631_s27 }
 0x896   : > { %p2176_p4 = pnand %p2179_p3, %p2434_p6 }
 0x898   : > { %2345 = dma.done.wait (!%p2176_p4), %s1632_s29, 32  }
 0x899   : > { %2347 = vsyncadd (!%p2176_p4), %s1632_s29, 4294967264  ;;  %p15_p7 = scmp.ge.s32.totalorder %s2417_s21, 4   ;;  %s2828_s15 = smov %s2354_s16 }
 0x89a   : > { %s2829_s16 = smov %s2358_s17  ;;  %s2830_s17 = smov %s2428_s24 }
 0x89b   : > { %s2831_s18 = smov %s2417_s21  ;;  %17 = sbr.rel (!%p15_p7) target bundleno = 3 (0x3), region = 119 }
 0x8a2   :  { %1637 = vsyncpa [#allocation4], 1 }
 0x8a3   :  { %1639 = vsyncpa [#allocation4 + $0x1], 1 }

// kernel: _lambda_.8
= control target key start
LH: loop header
LB: loop body
LE: loop exit
PB: predicated region body
PF: predicated region fallthrough
CT: control target
= control target key end

     0   :  { %s2283_s15 = smov 0   ;;  %s2638_s0 = inlined_call_operand.vmem [shape: f32[6,8,2,32], index: 0, kind: input, shape index: {}]   ;;  %s2639_s1 = inlined_call_operand.vmem [shape: bf16[6,32,32], index: 1, kind: input, shape index: {}]   ;;  %s2640_s2 = inlined_call_operand.vmem [shape: f32[2,1,32], index: 2, kind: input, shape index: {}]   ;;  %s2641_s3 = inlined_call_operand.vmem [shape: f32[2,8,2,32], index: 3, kind: output, shape index: {0}]   ;;  %s2642_s4 = inlined_call_operand.vmem [shape: f32[2,2,32], index: 4, kind: output, shape index: {1}]  }
   0x1 LB: > { %s2289_s16 = sadd.s32 4294967295, %s2254_s15   ;;  %p1780_p0 = scmp.ge.s32.totalorder %s2254_s15, 1  ;;  %s2254_s15 = sphi %s2283_s15, %s15_s15  }
   0x2   : > { %p187_p1 = scmp.lt.s32.totalorder %s2254_s15, 3 }
   0x4   : > { %p188_p2 = pnand %p1780_p0, %p187_p1 }
   0x5   : > { %s227_s17 = smul.u32 (!%p188_p2), 3, %s2289_s16  ;;  %vm269_vm0 = vcmask (!%p188_p2), 254976   ;;  %v2256_v0 = vmov (!%p188_p2), 0.0   ;;  %vm2257_vm1 = vmmov (!%p188_p2), 0   ;;  %vm287_vm2 = vcmask (!%p188_p2), 261120   ;;  %p271_p4 = scmp.eq.s32.totalorder (!%p188_p2), %s2289_s16, 0 }
   0x6   : > { %191 = sbr.rel (%p188_p2) target bundleno = 2175 (0x87f), region = 32  ;;  %1960 = vmatprep.subr.bf16.mxu0 (!%p188_p2), %v2256_v0  ;;  %1964 = vmatprep.mubr.msk.bf16.mxu0 (!%p188_p2), %vm2257_vm1, %v2256_v0  ;;  %270 = vst.msk [vmem:[#allocation2] sm:$0x3] (!%p188_p2), %vm269_vm0, %v2256_v0  ;;  %p241_p5 = scmp.lt.s32.totalorder (!%p188_p2), %s2289_s16, 1 }
   0x7   : > { %p228_p3 = scmp.lt.s32.totalorder (!%p188_p2), %s227_s17, 5  ;;  %1968 = vmatprep.subr.bf16.mxu1 (!%p188_p2), %v2256_v0  ;;  %1972 = vmatprep.mubr.msk.bf16.mxu1 (!%p188_p2), %vm2257_vm1, %v2256_v0 }
   0xd   : > { %s2644_s17 = smov (!%p228_p3, %s227_s17), 5  ;;  %v2315_v3 = vld [vmem:[#allocation2] sm:$0x3] }
   0xe   : > { %s1885_s18 = sshll.u32 %s2644_s17, 4  ;;  %v274_v5 = vpack.c.bf16 %v2315_v3, %v2315_v3 }
   0xf   : > { %s239_s21 = scalar_lea.vmem %s2639_s1, %s1885_s18  ;;  %s2365_s25 = scalar_lea.vmem %s2638_s0, %s1885_s18 }
  0x10   : > { %v2310_v1 = vld [vmem:[%s239_s21] sm:$0xff]   ;;  %v2312_v2 = vld [vmem:[%s239_s21 + $0x8] sm:$0xff]   ;;  %v2318_v4 = vld [vmem:[%s239_s21 + $0x10] sm:$0xff]   ;;  %s2358_s22 = scalar_select %p271_p4, 0, 7 }
  0x11   : > { %1961 = vmatpush3.bf16.msra.mxu0 %v2310_v1  ;;  %1969 = vmatpush3.bf16.msra.mxu1 %v2318_v4  ;;  %v2323_v6 = vld [vmem:[%s239_s21 + $0x18] sm:$0xff]   ;;  %v2327_v7 = vld [vmem:[%s239_s21 + $0x20] sm:$0xff]   ;;  %v2333_v8 = vld [vmem:[%s239_s21 + $0x28] sm:$0xff]   ;;  %s2377_s28 = scalar_select %p241_p5, %s2289_s16, 1 }
  0x12   : > { %1962 = vmatprep.subr.bf16.mxu0 %v2256_v0  ;;  %1970 = vmatprep.subr.bf16.mxu1 %v2256_v0  ;;  %s1806_s26 = sshll.u32 %s2358_s22, 1 }
  0x13   : > { %s2371_s27 = scalar_lea.vmem %s2365_s25, %s1806_s26  ;;  %s243_s5 = scalar_lea.vmem %s2640_s2, %s2377_s28 }
  0x14   : > { %v443_v9 = vld [vmem:[%s2371_s27] sm:$0x3]  ;;  %v1809_v13 = vld [vmem:[%s2371_s27 + $0x10] sm:$0x3]  ;;  %s1887_s6 = sshll.u32 %s2377_s28, 4 }
  0x15   : > { %1963 = vmatpush3.bf16.msra.mxu0 %v2312_v2  ;;  %1971 = vmatpush3.bf16.msra.mxu1 %v2323_v6  ;;  %v2383_v30 = vld [vmem:[%s243_s5] ss:$0 sm:$0xff]  ;;  %s2391_s9 = scalar_lea.vmem %s2641_s3, %s1887_s6 }
  0x16   : > { %1976 = vmatprep.subr.bf16.mxu0 %v2256_v0  ;;  %1984 = vmatprep.subr.bf16.mxu1 %v2256_v0  ;;  %v1812_v34 = vld [vmem:[%s2371_s27 + $0x20] sm:$0x3]  ;;  %s472_s10 = scalar_lea.vmem %s2391_s9, %s1806_s26 }
  0x17   : > { %s2422_s11 = scalar_select %p271_p4, 1, 6 }
  0x18   : > { %1965 = vmatmul.mubr.msk.bf16.vlgmr.msra.gmra.mrb[0].mxu0 %vm287_vm2, %v274_v5  ;;  %1973 = vmatmul.mubr.msk.bf16.vlgmr.msra.gmra.mrb[0].mxu1 %vm287_vm2, %v274_v5  ;;  %s2457_s17 = scalar_select %p271_p4, 2, 5 }
  0x19   : > { %1977 = vmatpush3.bf16.msra.mxu0 %v2327_v7  ;;  %1980 = vmatprep.mubr.msk.bf16.mxu0 %vm2257_vm1, %v2256_v0  ;;  %s1816_s12 = sshll.u32 %s2422_s11, 1 }
  0x1a   : > { %1978 = vmatprep.subr.bf16.mxu0 %v2256_v0  ;;  %1985 = vmatpush3.bf16.msra.mxu1 %v2310_v1  ;;  %s601_s13 = scalar_lea.vmem %s2365_s25, %s1816_s12  ;;  %s631_s14 = scalar_lea.vmem %s2391_s9, %s1816_s12 }
  0x1b   : > { %1988 = vmatprep.mubr.msk.bf16.mxu1 %vm2257_vm1, %v2256_v0  ;;  %1986 = vmatprep.subr.bf16.mxu1 %v2256_v0  ;;  %v602_v45 = vld [vmem:[%s601_s13] sm:$0x3]  ;;  %v1819_v49 = vld [vmem:[%s601_s13 + $0x10] sm:$0x3]  ;;  %s1826_s18 = sshll.u32 %s2457_s17, 1 }
  0x1c   : > { %s760_s19 = scalar_lea.vmem %s2365_s25, %s1826_s18  ;;  %s790_s20 = scalar_lea.vmem %s2391_s9, %s1826_s18 }
  0x1d   : > { %1979 = vmatpush3.bf16.msra.mxu0 %v2333_v8  ;;  %s2492_s21 = scalar_select %p271_p4, 3, 4 }
  0x1e   : > { %1992 = vmatprep.subr.bf16.mxu0 %v2256_v0  ;;  %1987 = vmatpush3.bf16.msra.mxu1 %v2312_v2  ;;  %s2527_s26 = scalar_select %p271_p4, 4, 3 }
  0x1f   : > { %2000 = vmatprep.subr.bf16.mxu1 %v2256_v0  ;;  %s1836_s22 = sshll.u32 %s2492_s21, 1 }
  0x20   : > { %1981 = vmatmul.mubr.msk.bf16.vlgmr.msra.gmra.mrb[4].mxu0 %vm287_vm2, %v274_v5  ;;  %s919_s23 = scalar_lea.vmem %s2365_s25, %s1836_s22  ;;  %s949_s24 = scalar_lea.vmem %s2391_s9, %s1836_s22 }
  0x21   : > { %1993 = vmatpush3.bf16.msra.mxu0 %v2318_v4  ;;  %1996 = vmatprep.mubr.msk.bf16.mxu0 %vm2257_vm1, %v2256_v0  ;;  %s1846_s27 = sshll.u32 %s2527_s26, 1 }
  0x22   : > { %1994 = vmatprep.subr.bf16.mxu0 %v2256_v0  ;;  %s1078_s29 = scalar_lea.vmem %s2365_s25, %s1846_s27  ;;  %s1108_s30 = scalar_lea.vmem %s2391_s9, %s1846_s27 }
  0x23   : > { %s2562_s5 = scalar_select %p271_p4, 5, 2 }
  0x25   : > { %1995 = vmatpush3.bf16.msra.mxu0 %v2323_v6  ;;  %s1856_s6 = sshll.u32 %s2562_s5, 1 }
  0x26   : > { %2008 = vmatprep.subr.bf16.mxu0 %v2256_v0  ;;  %s1237_s7 = scalar_lea.vmem %s2365_s25, %s1856_s6  ;;  %s1267_s8 = scalar_lea.vmem %s2391_s9, %s1856_s6 }
  0xeb   : > { %v325_v10 = vpop.f32.mrb[0].mxu0  ;;  %v377_v17 = vpop.f32.mrb[0].mxu1 }
  0xec   : > { %v444_v11 = vadd.f32 %v443_v9, %v325_v10  ;;  %v1966_v12 = vpop.f32.mrb[1].mxu0  ;;  %v454_v18 = vadd.f32 %v1809_v13, %v377_v17  ;;  %v1974_v19 = vpop.f32.mrb[1].mxu1 }
  0xed   : > { %v328_v14 = vpop.f32.mrb[2].mxu0  ;;  %v380_v20 = vpop.f32.mrb[2].mxu1  ;;  %v1822_v12 = vld [vmem:[%s601_s13 + $0x20] sm:$0x3] }
  0xee   : > { %v1807_v15 = vmul.f32 -1.442695, %v444_v11  ;;  %v1967_v16 = vpop.f32.mrb[3].mxu0  ;;  %v1810_v21 = vmul.f32 -1.442695, %v454_v18  ;;  %v1975_v22 = vpop.f32.mrb[3].mxu1 }
  0xf0   : > { %2168 = vpow2.f32 %v1807_v15 }
  0xf1   : > { %2170 = vpow2.f32 %v1810_v21 }
  0xf3   : > { %v435_v23 = vpop.f32.mrb[4].mxu0 }
  0xf4   : > { %v1982_v24 = vpop.f32.mrb[5].mxu0  ;;  %v436_v32 = vadd.f32 %v2383_v30, %v435_v23  ;;  %v761_v23 = vld [vmem:[%s760_s19] sm:$0x3] }
  0xf5   : > { %v438_v25 = vpop.f32.mrb[6].mxu0 }
  0xf6   : > { %v1983_v26 = vpop.f32.mrb[7].mxu0 }
  0xfa   : > { %v2169_v27 = vpop.eup %2168 }
  0xfb   : > { %v448_v28 = vadd.f32 1.0, %v2169_v27  ;;  %v2171_v29 = vpop.eup %2170  ;;  %v1829_v27 = vld [vmem:[%s760_s19 + $0x10] sm:$0x3] }
  0xfc   : > { %v458_v31 = vadd.f32 1.0, %v2171_v29 }
  0xfd   : > { %2172 = vrcp.f32 %v448_v28 }
  0xfe   : > { %2174 = vrcp.f32 %v458_v31 }
 0x107   : > { %v2173_v33 = vpop.eup %2172 }
 0x108   : > { %v464_v35 = vmul.f32 %v2173_v33, %v436_v32  ;;  %v2175_v37 = vpop.eup %2174 }
 0x109   : > { %v467_v38 = vsub.f32 1.0, %v2175_v37  ;;  %v469_v40 = vmul.f32 %v2175_v37, %v2315_v3 }
 0x10a   : > { %v465_v36 = vadd.f32 %v1812_v34, %v464_v35 }
 0x10c   : > { %2176 = vtanh.f32 %v465_v36 }
 0x116   : > { %v2177_v39 = vpop.eup %2176 }
 0x117   : > { %v468_v41 = vmul.f32 %v2177_v39, %v467_v38 }
 0x119   : > { %v470_v42 = vadd.f32 %v469_v40, %v468_v41 }
 0x11b   : > { %471 = vst.msk [vmem:[#allocation2] sm:$0x3] %vm269_vm0, %v470_v42  ;;  %473 = vst.msk [vmem:[%s472_s10] sm:$0x3] %vm269_vm0, %v470_v42  ;;  %s2596_s10 = scalar_select %p271_p4, 6, 1 }
 0x11d   : > { %s1866_s11 = sshll.u32 %s2596_s10, 1 }
 0x11e   : > { %s1396_s12 = scalar_lea.vmem %s2365_s25, %s1866_s11  ;;  %s1426_s13 = scalar_lea.vmem %s2391_s9, %s1866_s11 }
 0x122   : > { %v475_v43 = vld [vmem:[#allocation2] sm:$0x3] }
 0x123   : > { %v476_v44 = vpack.c.bf16 %v475_v43, %v475_v43 }
 0x125   : > { %1989 = vmatmul.mubr.msk.bf16.vlgmr.msra.gmra.mrb[4].mxu1 %vm287_vm2, %v476_v44  ;;  %1997 = vmatmul.mubr.msk.bf16.vlgmr.msra.gmra.mrb[8].mxu0 %vm287_vm2, %v476_v44 }
 0x126   : > { %2001 = vmatpush3.bf16.msra.mxu1 %v2327_v7  ;;  %2004 = vmatprep.mubr.msk.bf16.mxu1 %vm2257_vm1, %v2256_v0 }
 0x127   : > { %2002 = vmatprep.subr.bf16.mxu1 %v2256_v0  ;;  %2009 = vmatpush3.bf16.msra.mxu0 %v2310_v1 }
 0x128   : > { %2010 = vmatprep.subr.bf16.mxu0 %v2256_v0  ;;  %2012 = vmatprep.mubr.msk.bf16.mxu0 %vm2257_vm1, %v2256_v0 }
 0x12a   : > { %2003 = vmatpush3.bf16.msra.mxu1 %v2333_v8 }
 0x12b   : > { %2016 = vmatprep.subr.bf16.mxu1 %v2256_v0  ;;  %2011 = vmatpush3.bf16.msra.mxu0 %v2312_v2 }
 0x12c   : > { %2024 = vmatprep.subr.bf16.mxu0 %v2256_v0 }
 0x12d   : > { %2005 = vmatmul.mubr.msk.bf16.vlgmr.msra.gmra.mrb[8].mxu1 %vm287_vm2, %v476_v44 }
 0x12e   : > { %2017 = vmatpush3.bf16.msra.mxu1 %v2318_v4  ;;  %2020 = vmatprep.mubr.msk.bf16.mxu1 %vm2257_vm1, %v2256_v0 }
 0x12f   : > { %2018 = vmatprep.subr.bf16.mxu1 %v2256_v0 }
 0x132   : > { %2019 = vmatpush3.bf16.msra.mxu1 %v2323_v6 }
 0x133   : > { %2032 = vmatprep.subr.bf16.mxu1 %v2256_v0 }
 0x1f8   : > { %v514_v46 = vpop.f32.mrb[4].mxu1  ;;  %v554_v47 = vpop.f32.mrb[8].mxu0 }
 0x1f9   : > { %v603_v48 = vadd.f32 %v602_v45, %v514_v46  ;;  %v1990_v50 = vpop.f32.mrb[5].mxu1  ;;  %v1998_v51 = vpop.f32.mrb[9].mxu0  ;;  %v613_v57 = vadd.f32 %v1819_v49, %v554_v47 }
 0x1fa   : > { %v517_v52 = vpop.f32.mrb[6].mxu1  ;;  %v557_v53 = vpop.f32.mrb[10].mxu0 }
 0x1fb   : > { %v1817_v54 = vmul.f32 -1.442695, %v603_v48  ;;  %v1991_v55 = vpop.f32.mrb[7].mxu1  ;;  %v1999_v56 = vpop.f32.mrb[11].mxu0  ;;  %v1820_v58 = vmul.f32 -1.442695, %v613_v57 }
 0x1fc   : > { %v1832_v48 = vld [vmem:[%s760_s19 + $0x20] sm:$0x3] }
 0x1fd   : > { %2178 = vpow2.f32 %v1817_v54 }
 0x1fe   : > { %2180 = vpow2.f32 %v1820_v58 }
 0x200   : > { %v594_v59 = vpop.f32.mrb[8].mxu1 }
 0x201   : > { %v2006_v60 = vpop.f32.mrb[9].mxu1  ;;  %v595_v10 = vadd.f32 %v2383_v30, %v594_v59  ;;  %v920_v59 = vld [vmem:[%s919_s23] sm:$0x3] }
 0x202   : > { %v597_v61 = vpop.f32.mrb[10].mxu1 }
 0x203   : > { %v2007_v62 = vpop.f32.mrb[11].mxu1 }
 0x207   : > { %v2179_v63 = vpop.eup %2178 }
 0x208   : > { %v607_v3 = vadd.f32 1.0, %v2179_v63  ;;  %v2181_v5 = vpop.eup %2180  ;;  %v1839_v63 = vld [vmem:[%s919_s23 + $0x10] sm:$0x3] }
 0x209   : > { %v617_v9 = vadd.f32 1.0, %v2181_v5 }
 0x20a   : > { %2182 = vrcp.f32 %v607_v3 }
 0x20b   : > { %2184 = vrcp.f32 %v617_v9 }
 0x214   : > { %v2183_v11 = vpop.eup %2182 }
 0x215   : > { %v623_v13 = vmul.f32 %v2183_v11, %v595_v10  ;;  %v2185_v15 = vpop.eup %2184 }
 0x216   : > { %v626_v16 = vsub.f32 1.0, %v2185_v15  ;;  %v628_v18 = vmul.f32 %v2185_v15, %v475_v43 }
 0x217   : > { %v624_v14 = vadd.f32 %v1822_v12, %v623_v13 }
 0x219   : > { %2186 = vtanh.f32 %v624_v14 }
 0x223   : > { %v2187_v17 = vpop.eup %2186 }
 0x224   : > { %v627_v19 = vmul.f32 %v2187_v17, %v626_v16 }
 0x226   : > { %v629_v20 = vadd.f32 %v628_v18, %v627_v19 }
 0x228   : > { %630 = vst.msk [vmem:[#allocation2] sm:$0x3] %vm269_vm0, %v629_v20  ;;  %632 = vst.msk [vmem:[%s631_s14] sm:$0x3] %vm269_vm0, %v629_v20  ;;  %s2618_s14 = scalar_select %p271_p4, 7, 0 }
 0x22a   : > { %s1876_s17 = sshll.u32 %s2618_s14, 1 }
 0x22b   : > { %s1555_s18 = scalar_lea.vmem %s2365_s25, %s1876_s17  ;;  %s1585_s16 = scalar_lea.vmem %s2391_s9, %s1876_s17 }
 0x22c   : > { %s1787_s25 = sshll.u32 %s2377_s28, 1 }
 0x22d   : > { %s252_s21 = scalar_lea.vmem %s2642_s4, %s1787_s25 }
 0x22f   : > { %v634_v21 = vld [vmem:[#allocation2] sm:$0x3] }
 0x230   : > { %v635_v22 = vpack.c.bf16 %v634_v21, %v634_v21 }
 0x232   : > { %2013 = vmatmul.mubr.msk.bf16.vlgmr.msra.gmra.mrb[12].mxu0 %vm287_vm2, %v635_v22  ;;  %2021 = vmatmul.mubr.msk.bf16.vlgmr.msra.gmra.mrb[12].mxu1 %vm287_vm2, %v635_v22 }
 0x233   : > { %2025 = vmatpush3.bf16.msra.mxu0 %v2327_v7  ;;  %2028 = vmatprep.mubr.msk.bf16.mxu0 %vm2257_vm1, %v2256_v0 }
 0x234   : > { %2026 = vmatprep.subr.bf16.mxu0 %v2256_v0  ;;  %2033 = vmatpush3.bf16.msra.mxu1 %v2310_v1 }
 0x235   : > { %2034 = vmatprep.subr.bf16.mxu1 %v2256_v0  ;;  %2036 = vmatprep.mubr.msk.bf16.mxu1 %vm2257_vm1, %v2256_v0 }
 0x237   : > { %2027 = vmatpush3.bf16.msra.mxu0 %v2333_v8 }
 0x238   : > { %2040 = vmatprep.subr.bf16.mxu0 %v2256_v0  ;;  %2035 = vmatpush3.bf16.msra.mxu1 %v2312_v2 }
 0x239   : > { %2048 = vmatprep.subr.bf16.mxu1 %v2256_v0 }
 0x23a   : > { %2029 = vmatmul.mubr.msk.bf16.vlgmr.msra.gmra.mrb[16].mxu0 %vm287_vm2, %v635_v22 }
 0x23b   : > { %2041 = vmatpush3.bf16.msra.mxu0 %v2318_v4  ;;  %2044 = vmatprep.mubr.msk.bf16.mxu0 %vm2257_vm1, %v2256_v0 }
 0x23c   : > { %2042 = vmatprep.subr.bf16.mxu0 %v2256_v0 }
 0x23f   : > { %2043 = vmatpush3.bf16.msra.mxu0 %v2323_v6 }
 0x240   : > { %2056 = vmatprep.subr.bf16.mxu0 %v2256_v0 }
 0x305   : > { %v673_v24 = vpop.f32.mrb[12].mxu0  ;;  %v713_v25 = vpop.f32.mrb[12].mxu1 }
 0x306   : > { %v762_v26 = vadd.f32 %v761_v23, %v673_v24  ;;  %v2014_v28 = vpop.f32.mrb[13].mxu0  ;;  %v2022_v29 = vpop.f32.mrb[13].mxu1  ;;  %v772_v36 = vadd.f32 %v1829_v27, %v713_v25 }
 0x307   : > { %v676_v31 = vpop.f32.mrb[14].mxu0  ;;  %v716_v32 = vpop.f32.mrb[14].mxu1 }
 0x308   : > { %v1827_v33 = vmul.f32 -1.442695, %v762_v26  ;;  %v2015_v34 = vpop.f32.mrb[15].mxu0  ;;  %v2023_v35 = vpop.f32.mrb[15].mxu1  ;;  %v1830_v37 = vmul.f32 -1.442695, %v772_v36 }
 0x309   : > { %v1842_v26 = vld [vmem:[%s919_s23 + $0x20] sm:$0x3] }
 0x30a   : > { %2188 = vpow2.f32 %v1827_v33 }
 0x30b   : > { %2190 = vpow2.f32 %v1830_v37 }
 0x30d   : > { %v753_v38 = vpop.f32.mrb[16].mxu0 }
 0x30e   : > { %v2030_v39 = vpop.f32.mrb[17].mxu0  ;;  %v754_v46 = vadd.f32 %v2383_v30, %v753_v38  ;;  %v1079_v38 = vld [vmem:[%s1078_s29] sm:$0x3] }
 0x30f   : > { %v756_v40 = vpop.f32.mrb[18].mxu0 }
 0x310   : > { %v2031_v41 = vpop.f32.mrb[19].mxu0 }
 0x314   : > { %v2189_v42 = vpop.eup %2188 }
 0x315   : > { %v766_v43 = vadd.f32 1.0, %v2189_v42  ;;  %v2191_v44 = vpop.eup %2190  ;;  %v1849_v42 = vld [vmem:[%s1078_s29 + $0x10] sm:$0x3] }
 0x316   : > { %v776_v45 = vadd.f32 1.0, %v2191_v44 }
 0x317   : > { %2192 = vrcp.f32 %v766_v43 }
 0x318   : > { %2194 = vrcp.f32 %v776_v45 }
 0x321   : > { %v2193_v47 = vpop.eup %2192 }
 0x322   : > { %v782_v49 = vmul.f32 %v2193_v47, %v754_v46  ;;  %v2195_v51 = vpop.eup %2194 }
 0x323   : > { %v785_v52 = vsub.f32 1.0, %v2195_v51  ;;  %v787_v54 = vmul.f32 %v2195_v51, %v634_v21 }
 0x324   : > { %v783_v50 = vadd.f32 %v1832_v48, %v782_v49 }
 0x326   : > { %2196 = vtanh.f32 %v783_v50 }
 0x330   : > { %v2197_v53 = vpop.eup %2196 }
 0x331   : > { %v786_v55 = vmul.f32 %v2197_v53, %v785_v52 }
 0x333   : > { %v788_v56 = vadd.f32 %v787_v54, %v786_v55 }
 0x335   : > { %789 = vst.msk [vmem:[#allocation2] sm:$0x3] %vm269_vm0, %v788_v56  ;;  %791 = vst.msk [vmem:[%s790_s20] sm:$0x3] %vm269_vm0, %v788_v56 }
 0x33c   : > { %v793_v57 = vld [vmem:[#allocation2] sm:$0x3] }
 0x33d   : > { %v794_v58 = vpack.c.bf16 %v793_v57, %v793_v57 }
 0x33f   : > { %2037 = vmatmul.mubr.msk.bf16.vlgmr.msra.gmra.mrb[16].mxu1 %vm287_vm2, %v794_v58  ;;  %2045 = vmatmul.mubr.msk.bf16.vlgmr.msra.gmra.mrb[20].mxu0 %vm287_vm2, %v794_v58 }
 0x340   : > { %2049 = vmatpush3.bf16.msra.mxu1 %v2327_v7  ;;  %2052 = vmatprep.mubr.msk.bf16.mxu1 %vm2257_vm1, %v2256_v0 }
 0x341   : > { %2050 = vmatprep.subr.bf16.mxu1 %v2256_v0  ;;  %2057 = vmatpush3.bf16.msra.mxu0 %v2310_v1 }
 0x342   : > { %2058 = vmatprep.subr.bf16.mxu0 %v2256_v0  ;;  %2060 = vmatprep.mubr.msk.bf16.mxu0 %vm2257_vm1, %v2256_v0 }
 0x344   : > { %2051 = vmatpush3.bf16.msra.mxu1 %v2333_v8 }
 0x345   : > { %2064 = vmatprep.subr.bf16.mxu1 %v2256_v0  ;;  %2059 = vmatpush3.bf16.msra.mxu0 %v2312_v2 }
 0x346   : > { %2072 = vmatprep.subr.bf16.mxu0 %v2256_v0 }
 0x347   : > { %2053 = vmatmul.mubr.msk.bf16.vlgmr.msra.gmra.mrb[20].mxu1 %vm287_vm2, %v794_v58 }
 0x348   : > { %2065 = vmatpush3.bf16.msra.mxu1 %v2318_v4  ;;  %2068 = vmatprep.mubr.msk.bf16.mxu1 %vm2257_vm1, %v2256_v0 }
 0x349   : > { %2066 = vmatprep.subr.bf16.mxu1 %v2256_v0 }
 0x34c   : > { %2067 = vmatpush3.bf16.msra.mxu1 %v2323_v6 }
 0x34d   : > { %2080 = vmatprep.subr.bf16.mxu1 %v2256_v0 }
 0x412   : > { %v832_v60 = vpop.f32.mrb[16].mxu1  ;;  %v872_v61 = vpop.f32.mrb[20].mxu0 }
 0x413   : > { %v921_v62 = vadd.f32 %v920_v59, %v832_v60  ;;  %v2038_v3 = vpop.f32.mrb[17].mxu1  ;;  %v2046_v5 = vpop.f32.mrb[21].mxu0  ;;  %v931_v14 = vadd.f32 %v1839_v63, %v872_v61 }
 0x414   : > { %v835_v9 = vpop.f32.mrb[18].mxu1  ;;  %v875_v10 = vpop.f32.mrb[22].mxu0 }
 0x415   : > { %v1837_v11 = vmul.f32 -1.442695, %v921_v62  ;;  %v2039_v12 = vpop.f32.mrb[19].mxu1  ;;  %v2047_v13 = vpop.f32.mrb[23].mxu0  ;;  %v1840_v15 = vmul.f32 -1.442695, %v931_v14 }
 0x416   : > { %v1852_v62 = vld [vmem:[%s1078_s29 + $0x20] sm:$0x3] }
 0x417   : > { %2198 = vpow2.f32 %v1837_v11 }
 0x418   : > { %2200 = vpow2.f32 %v1840_v15 }
 0x41a   : > { %v912_v16 = vpop.f32.mrb[20].mxu1 }
 0x41b   : > { %v2054_v17 = vpop.f32.mrb[21].mxu1  ;;  %v913_v24 = vadd.f32 %v2383_v30, %v912_v16  ;;  %v1238_v16 = vld [vmem:[%s1237_s7] sm:$0x3] }
 0x41c   : > { %v915_v18 = vpop.f32.mrb[22].mxu1 }
 0x41d   : > { %v2055_v19 = vpop.f32.mrb[23].mxu1 }
 0x421   : > { %v2199_v20 = vpop.eup %2198 }
 0x422   : > { %v925_v21 = vadd.f32 1.0, %v2199_v20  ;;  %v2201_v22 = vpop.eup %2200  ;;  %v1859_v20 = vld [vmem:[%s1237_s7 + $0x10] sm:$0x3] }
 0x423   : > { %v935_v23 = vadd.f32 1.0, %v2201_v22 }
 0x424   : > { %2202 = vrcp.f32 %v925_v21 }
 0x425   : > { %2204 = vrcp.f32 %v935_v23 }
 0x42e   : > { %v2203_v25 = vpop.eup %2202 }
 0x42f   : > { %v941_v27 = vmul.f32 %v2203_v25, %v913_v24  ;;  %v2205_v29 = vpop.eup %2204 }
 0x430   : > { %v944_v31 = vsub.f32 1.0, %v2205_v29  ;;  %v946_v33 = vmul.f32 %v2205_v29, %v793_v57 }
 0x431   : > { %v942_v28 = vadd.f32 %v1842_v26, %v941_v27 }
 0x433   : > { %2206 = vtanh.f32 %v942_v28 }
 0x43d   : > { %v2207_v32 = vpop.eup %2206 }
 0x43e   : > { %v945_v34 = vmul.f32 %v2207_v32, %v944_v31 }
 0x440   : > { %v947_v35 = vadd.f32 %v946_v33, %v945_v34 }
 0x442   : > { %948 = vst.msk [vmem:[#allocation2] sm:$0x3] %vm269_vm0, %v947_v35  ;;  %950 = vst.msk [vmem:[%s949_s24] sm:$0x3] %vm269_vm0, %v947_v35 }
 0x449   : > { %v952_v36 = vld [vmem:[#allocation2] sm:$0x3] }
 0x44a   : > { %v953_v37 = vpack.c.bf16 %v952_v36, %v952_v36 }
 0x44c   : > { %2061 = vmatmul.mubr.msk.bf16.vlgmr.msra.gmra.mrb[24].mxu0 %vm287_vm2, %v953_v37  ;;  %2069 = vmatmul.mubr.msk.bf16.vlgmr.msra.gmra.mrb[24].mxu1 %vm287_vm2, %v953_v37 }
 0x44d   : > { %2073 = vmatpush3.bf16.msra.mxu0 %v2327_v7  ;;  %2076 = vmatprep.mubr.msk.bf16.mxu0 %vm2257_vm1, %v2256_v0 }
 0x44e   : > { %2074 = vmatprep.subr.bf16.mxu0 %v2256_v0  ;;  %2081 = vmatpush3.bf16.msra.mxu1 %v2310_v1 }
 0x44f   : > { %2082 = vmatprep.subr.bf16.mxu1 %v2256_v0  ;;  %2084 = vmatprep.mubr.msk.bf16.mxu1 %vm2257_vm1, %v2256_v0 }
 0x451   : > { %2075 = vmatpush3.bf16.msra.mxu0 %v2333_v8 }
 0x452   : > { %2088 = vmatprep.subr.bf16.mxu0 %v2256_v0  ;;  %2083 = vmatpush3.bf16.msra.mxu1 %v2312_v2 }
 0x453   : > { %2096 = vmatprep.subr.bf16.mxu1 %v2256_v0 }
 0x454   : > { %2077 = vmatmul.mubr.msk.bf16.vlgmr.msra.gmra.mrb[28].mxu0 %vm287_vm2, %v953_v37 }
 0x455   : > { %2089 = vmatpush3.bf16.msra.mxu0 %v2318_v4  ;;  %2092 = vmatprep.mubr.msk.bf16.mxu0 %vm2257_vm1, %v2256_v0 }
 0x456   : > { %2090 = vmatprep.subr.bf16.mxu0 %v2256_v0 }
 0x459   : > { %2091 = vmatpush3.bf16.msra.mxu0 %v2323_v6 }
 0x45a   : > { %2104 = vmatprep.subr.bf16.mxu0 %v2256_v0 }
 0x51f   : > { %v991_v39 = vpop.f32.mrb[24].mxu0  ;;  %v1031_v40 = vpop.f32.mrb[24].mxu1 }
 0x520   : > { %v1080_v41 = vadd.f32 %v1079_v38, %v991_v39  ;;  %v2062_v43 = vpop.f32.mrb[25].mxu0  ;;  %v2070_v44 = vpop.f32.mrb[25].mxu1  ;;  %v1090_v50 = vadd.f32 %v1849_v42, %v1031_v40 }
 0x521   : > { %v994_v45 = vpop.f32.mrb[26].mxu0  ;;  %v1034_v46 = vpop.f32.mrb[26].mxu1 }
 0x522   : > { %v1847_v47 = vmul.f32 -1.442695, %v1080_v41  ;;  %v2063_v48 = vpop.f32.mrb[27].mxu0  ;;  %v2071_v49 = vpop.f32.mrb[27].mxu1  ;;  %v1850_v51 = vmul.f32 -1.442695, %v1090_v50 }
 0x523   : > { %v1862_v41 = vld [vmem:[%s1237_s7 + $0x20] sm:$0x3] }
 0x524   : > { %2208 = vpow2.f32 %v1847_v47 }
 0x525   : > { %2210 = vpow2.f32 %v1850_v51 }
 0x527   : > { %v1071_v52 = vpop.f32.mrb[28].mxu0 }
 0x528   : > { %v2078_v53 = vpop.f32.mrb[29].mxu0  ;;  %v1072_v60 = vadd.f32 %v2383_v30, %v1071_v52 }
 0x529   : > { %v1074_v54 = vpop.f32.mrb[30].mxu0 }
 0x52a   : > { %v2079_v55 = vpop.f32.mrb[31].mxu0 }
 0x52e   : > { %v2209_v56 = vpop.eup %2208 }
 0x52f   : > { %v1084_v57 = vadd.f32 1.0, %v2209_v56  ;;  %v2211_v58 = vpop.eup %2210 }
 0x530   : > { %v1094_v59 = vadd.f32 1.0, %v2211_v58 }
 0x531   : > { %2212 = vrcp.f32 %v1084_v57 }
 0x532   : > { %2214 = vrcp.f32 %v1094_v59 }
 0x53b   : > { %v2213_v61 = vpop.eup %2212 }
 0x53c   : > { %v1100_v63 = vmul.f32 %v2213_v61, %v1072_v60  ;;  %v2215_v5 = vpop.eup %2214 }
 0x53d   : > { %v1103_v9 = vsub.f32 1.0, %v2215_v5  ;;  %v1105_v11 = vmul.f32 %v2215_v5, %v952_v36 }
 0x53e   : > { %v1101_v3 = vadd.f32 %v1852_v62, %v1100_v63 }
 0x540   : > { %2216 = vtanh.f32 %v1101_v3 }
 0x54a   : > { %v2217_v10 = vpop.eup %2216 }
 0x54b   : > { %v1104_v12 = vmul.f32 %v2217_v10, %v1103_v9 }
 0x54d   : > { %v1106_v13 = vadd.f32 %v1105_v11, %v1104_v12 }
 0x54f   : > { %1107 = vst.msk [vmem:[#allocation2] sm:$0x3] %vm269_vm0, %v1106_v13  ;;  %1109 = vst.msk [vmem:[%s1108_s30] sm:$0x3] %vm269_vm0, %v1106_v13 }
 0x556   : > { %v1111_v14 = vld [vmem:[#allocation2] sm:$0x3] }
 0x557   : > { %v1112_v15 = vpack.c.bf16 %v1111_v14, %v1111_v14 }
 0x559   : > { %2085 = vmatmul.mubr.msk.bf16.vlgmr.msra.gmra.mrb[28].mxu1 %vm287_vm2, %v1112_v15  ;;  %2093 = vmatmul.mubr.msk.bf16.vlgmr.msra.gmra.mrb[32].mxu0 %vm287_vm2, %v1112_v15 }
 0x55a   : > { %2097 = vmatpush3.bf16.msra.mxu1 %v2327_v7  ;;  %2100 = vmatprep.mubr.msk.bf16.mxu1 %vm2257_vm1, %v2256_v0 }
 0x55b   : > { %2098 = vmatprep.subr.bf16.mxu1 %v2256_v0  ;;  %2105 = vmatpush3.bf16.msra.mxu0 %v2310_v1 }
 0x55c   : > { %2106 = vmatprep.subr.bf16.mxu0 %v2256_v0  ;;  %2108 = vmatprep.mubr.msk.bf16.mxu0 %vm2257_vm1, %v2256_v0 }
 0x55e   : > { %2099 = vmatpush3.bf16.msra.mxu1 %v2333_v8 }
 0x55f   : > { %2112 = vmatprep.subr.bf16.mxu1 %v2256_v0  ;;  %2107 = vmatpush3.bf16.msra.mxu0 %v2312_v2 }
 0x560   : > { %2120 = vmatprep.subr.bf16.mxu0 %v2256_v0 }
 0x561   : > { %2101 = vmatmul.mubr.msk.bf16.vlgmr.msra.gmra.mrb[32].mxu1 %vm287_vm2, %v1112_v15  ;;  %v1872_v15 = vld [vmem:[%s1396_s12 + $0x20] sm:$0x3] }
 0x562   : > { %2113 = vmatpush3.bf16.msra.mxu1 %v2318_v4  ;;  %2116 = vmatprep.mubr.msk.bf16.mxu1 %vm2257_vm1, %v2256_v0 }
 0x563   : > { %2114 = vmatprep.subr.bf16.mxu1 %v2256_v0 }
 0x566   : > { %2115 = vmatpush3.bf16.msra.mxu1 %v2323_v6 }
 0x567   : > { %2128 = vmatprep.subr.bf16.mxu1 %v2256_v0 }
 0x62c   : > { %v1150_v17 = vpop.f32.mrb[28].mxu1  ;;  %v1190_v18 = vpop.f32.mrb[32].mxu0 }
 0x62d   : > { %v1239_v19 = vadd.f32 %v1238_v16, %v1150_v17  ;;  %v2086_v21 = vpop.f32.mrb[29].mxu1  ;;  %v2094_v22 = vpop.f32.mrb[33].mxu0  ;;  %v1249_v28 = vadd.f32 %v1859_v20, %v1190_v18 }
 0x62e   : > { %v1153_v23 = vpop.f32.mrb[30].mxu1  ;;  %v1193_v24 = vpop.f32.mrb[34].mxu0 }
 0x62f   : > { %v1857_v25 = vmul.f32 -1.442695, %v1239_v19  ;;  %v2087_v26 = vpop.f32.mrb[31].mxu1  ;;  %v2095_v27 = vpop.f32.mrb[35].mxu0  ;;  %v1860_v29 = vmul.f32 -1.442695, %v1249_v28 }
 0x630   : > { %v1556_v26 = vld [vmem:[%s1555_s18] sm:$0x3] }
 0x631   : > { %2218 = vpow2.f32 %v1857_v25 }
 0x632   : > { %2220 = vpow2.f32 %v1860_v29  ;;  %v1879_v29 = vld [vmem:[%s1555_s18 + $0x10] sm:$0x3] }
 0x634   : > { %v1230_v31 = vpop.f32.mrb[32].mxu1 }
 0x635   : > { %v2102_v32 = vpop.f32.mrb[33].mxu1  ;;  %v1231_v39 = vadd.f32 %v2383_v30, %v1230_v31 }
 0x636   : > { %v1233_v33 = vpop.f32.mrb[34].mxu1 }
 0x637   : > { %v2103_v34 = vpop.f32.mrb[35].mxu1 }
 0x63b   : > { %v2219_v35 = vpop.eup %2218 }
 0x63c   : > { %v1243_v36 = vadd.f32 1.0, %v2219_v35  ;;  %v2221_v37 = vpop.eup %2220 }
 0x63d   : > { %v1253_v38 = vadd.f32 1.0, %v2221_v37 }
 0x63e   : > { %2222 = vrcp.f32 %v1243_v36 }
 0x63f   : > { %2224 = vrcp.f32 %v1253_v38 }
 0x648   : > { %v2223_v40 = vpop.eup %2222 }
 0x649   : > { %v1259_v42 = vmul.f32 %v2223_v40, %v1231_v39  ;;  %v2225_v44 = vpop.eup %2224 }
 0x64a   : > { %v1262_v45 = vsub.f32 1.0, %v2225_v44  ;;  %v1264_v47 = vmul.f32 %v2225_v44, %v1111_v14 }
 0x64b   : > { %v1260_v43 = vadd.f32 %v1862_v41, %v1259_v42 }
 0x64d   : > { %2226 = vtanh.f32 %v1260_v43 }
 0x657   : > { %v2227_v46 = vpop.eup %2226 }
 0x658   : > { %v1263_v48 = vmul.f32 %v2227_v46, %v1262_v45 }
 0x65a   : > { %v1265_v49 = vadd.f32 %v1264_v47, %v1263_v48  ;;  %v1882_v48 = vld [vmem:[%s1555_s18 + $0x20] sm:$0x3] }
 0x65c   : > { %1268 = vst.msk [vmem:[%s1267_s8] sm:$0x3] %vm269_vm0, %v1265_v49  ;;  %1266 = vst.msk [vmem:[#allocation2] sm:$0x3] %vm269_vm0, %v1265_v49 }
 0x663   : > { %v1270_v50 = vld [vmem:[#allocation2] sm:$0x3] }
 0x664   : > { %v1271_v51 = vpack.c.bf16 %v1270_v50, %v1270_v50 }
 0x666   : > { %2109 = vmatmul.mubr.msk.bf16.vlgmr.msra.gmra.mrb[36].mxu0 %vm287_vm2, %v1271_v51  ;;  %2117 = vmatmul.mubr.msk.bf16.vlgmr.msra.gmra.mrb[36].mxu1 %vm287_vm2, %v1271_v51 }
 0x667   : > { %2121 = vmatpush3.bf16.msra.mxu0 %v2327_v7  ;;  %2124 = vmatprep.mubr.msk.bf16.mxu0 %vm2257_vm1, %v2256_v0 }
 0x668   : > { %2122 = vmatprep.subr.bf16.mxu0 %v2256_v0  ;;  %2129 = vmatpush3.bf16.msra.mxu1 %v2310_v1  ;;  %v1397_v1 = vld [vmem:[%s1396_s12] sm:$0x3] }
 0x669   : > { %2130 = vmatprep.subr.bf16.mxu1 %v2256_v0  ;;  %2132 = vmatprep.mubr.msk.bf16.mxu1 %vm2257_vm1, %v2256_v0 }
 0x66b   : > { %2123 = vmatpush3.bf16.msra.mxu0 %v2333_v8 }
 0x66c   : > { %2136 = vmatprep.subr.bf16.mxu0 %v2256_v0  ;;  %2131 = vmatpush3.bf16.msra.mxu1 %v2312_v2 }
 0x66d   : > { %2144 = vmatprep.subr.bf16.mxu1 %v2256_v0 }
 0x66e   : > { %2125 = vmatmul.mubr.msk.bf16.vlgmr.msra.gmra.mrb[40].mxu0 %vm287_vm2, %v1271_v51 }
 0x66f   : > { %2137 = vmatpush3.bf16.msra.mxu0 %v2318_v4  ;;  %2140 = vmatprep.mubr.msk.bf16.mxu0 %vm2257_vm1, %v2256_v0  ;;  %v1869_v4 = vld [vmem:[%s1396_s12 + $0x10] sm:$0x3] }
 0x670   : > { %2138 = vmatprep.subr.bf16.mxu0 %v2256_v0 }
 0x673   : > { %2139 = vmatpush3.bf16.msra.mxu0 %v2323_v6 }
 0x739   : > { %v1309_v2 = vpop.f32.mrb[36].mxu0  ;;  %v1349_v52 = vpop.f32.mrb[36].mxu1 }
 0x73a   : > { %v1398_v53 = vadd.f32 %v1397_v1, %v1309_v2  ;;  %v2110_v54 = vpop.f32.mrb[37].mxu0  ;;  %v2118_v55 = vpop.f32.mrb[37].mxu1  ;;  %v1408_v60 = vadd.f32 %v1869_v4, %v1349_v52 }
 0x73b   : > { %v1312_v56 = vpop.f32.mrb[38].mxu0  ;;  %v1352_v57 = vpop.f32.mrb[38].mxu1 }
 0x73c   : > { %v1867_v58 = vmul.f32 -1.442695, %v1398_v53  ;;  %v2111_v59 = vpop.f32.mrb[39].mxu0  ;;  %v2119_v6 = vpop.f32.mrb[39].mxu1  ;;  %v1870_v61 = vmul.f32 -1.442695, %v1408_v60 }
 0x73e   : > { %2228 = vpow2.f32 %v1867_v58 }
 0x73f   : > { %2230 = vpow2.f32 %v1870_v61 }
 0x741   : > { %v1389_v62 = vpop.f32.mrb[40].mxu0 }
 0x742   : > { %v2126_v63 = vpop.f32.mrb[41].mxu0  ;;  %v1390_v13 = vadd.f32 %v2383_v30, %v1389_v62 }
 0x743   : > { %v1392_v3 = vpop.f32.mrb[42].mxu0 }
 0x744   : > { %v2127_v5 = vpop.f32.mrb[43].mxu0 }
 0x748   : > { %v2229_v9 = vpop.eup %2228 }
 0x749   : > { %v1402_v10 = vadd.f32 1.0, %v2229_v9  ;;  %v2231_v11 = vpop.eup %2230 }
 0x74a   : > { %v1412_v12 = vadd.f32 1.0, %v2231_v11 }
 0x74b   : > { %2232 = vrcp.f32 %v1402_v10 }
 0x74c   : > { %2234 = vrcp.f32 %v1412_v12 }
 0x755   : > { %v2233_v14 = vpop.eup %2232 }
 0x756   : > { %v1418_v16 = vmul.f32 %v2233_v14, %v1390_v13  ;;  %v2235_v18 = vpop.eup %2234 }
 0x757   : > { %v1421_v19 = vsub.f32 1.0, %v2235_v18  ;;  %v1423_v21 = vmul.f32 %v2235_v18, %v1270_v50 }
 0x758   : > { %v1419_v17 = vadd.f32 %v1872_v15, %v1418_v16 }
 0x75a   : > { %2236 = vtanh.f32 %v1419_v17 }
 0x764   : > { %v2237_v20 = vpop.eup %2236 }
 0x765   : > { %v1422_v22 = vmul.f32 %v2237_v20, %v1421_v19 }
 0x767   : > { %v1424_v23 = vadd.f32 %v1423_v21, %v1422_v22 }
 0x769   : > { %1427 = vst.msk [vmem:[%s1426_s13] sm:$0x3] %vm269_vm0, %v1424_v23  ;;  %1425 = vst.msk [vmem:[#allocation2] sm:$0x3] %vm269_vm0, %v1424_v23 }
 0x770   : > { %v1429_v24 = vld [vmem:[#allocation2] sm:$0x3] }
 0x771   : > { %v1430_v25 = vpack.c.bf16 %v1429_v24, %v1429_v24 }
 0x773   : > { %2133 = vmatmul.mubr.msk.bf16.vlgmr.msra.gmra.mrb[40].mxu1 %vm287_vm2, %v1430_v25  ;;  %2141 = vmatmul.mubr.msk.bf16.vlgmr.msra.gmra.mrb[44].mxu0 %vm287_vm2, %v1430_v25 }
 0x774   : > { %2145 = vmatpush3.bf16.msra.mxu1 %v2327_v7  ;;  %2148 = vmatprep.mubr.msk.bf16.mxu1 %vm2257_vm1, %v2256_v0 }
 0x775   : > { %2146 = vmatprep.subr.bf16.mxu1 %v2256_v0 }
 0x778   : > { %2147 = vmatpush3.bf16.msra.mxu1 %v2333_v8 }
 0x77b   : > { %2149 = vmatmul.mubr.msk.bf16.vlgmr.msra.gmra.mrb[44].mxu1 %vm287_vm2, %v1430_v25 }
 0x846   : > { %v1468_v27 = vpop.f32.mrb[40].mxu1  ;;  %v1508_v7 = vpop.f32.mrb[44].mxu0 }
 0x847   : > { %v1557_v28 = vadd.f32 %v1556_v26, %v1468_v27  ;;  %v2134_v31 = vpop.f32.mrb[41].mxu1  ;;  %v2142_v32 = vpop.f32.mrb[45].mxu0  ;;  %v1567_v36 = vadd.f32 %v1879_v29, %v1508_v7 }
 0x848   : > { %v1471_v0 = vpop.f32.mrb[42].mxu1  ;;  %v1511_v33 = vpop.f32.mrb[46].mxu0 }
 0x849   : > { %v1877_v8 = vmul.f32 -1.442695, %v1557_v28  ;;  %v2135_v34 = vpop.f32.mrb[43].mxu1  ;;  %v2143_v35 = vpop.f32.mrb[47].mxu0  ;;  %v1880_v37 = vmul.f32 -1.442695, %v1567_v36 }
 0x84b   : > { %2238 = vpow2.f32 %v1877_v8 }
 0x84c   : > { %2240 = vpow2.f32 %v1880_v37 }
 0x84e   : > { %v1548_v38 = vpop.f32.mrb[44].mxu1 }
 0x84f   : > { %v2150_v39 = vpop.f32.mrb[45].mxu1  ;;  %v1549_v46 = vadd.f32 %v2383_v30, %v1548_v38 }
 0x850   : > { %v1551_v40 = vpop.f32.mrb[46].mxu1 }
 0x851   : > { %v2151_v41 = vpop.f32.mrb[47].mxu1 }
 0x855   : > { %v2239_v42 = vpop.eup %2238 }
 0x856   : > { %v1561_v43 = vadd.f32 1.0, %v2239_v42  ;;  %v2241_v44 = vpop.eup %2240 }
 0x857   : > { %v1571_v45 = vadd.f32 1.0, %v2241_v44 }
 0x858   : > { %2242 = vrcp.f32 %v1561_v43 }
 0x859   : > { %2244 = vrcp.f32 %v1571_v45 }
 0x862   : > { %v2243_v47 = vpop.eup %2242 }
 0x863   : > { %v1577_v49 = vmul.f32 %v2243_v47, %v1549_v46  ;;  %v2245_v51 = vpop.eup %2244 }
 0x864   : > { %v1580_v1 = vsub.f32 1.0, %v2245_v51  ;;  %v1582_v52 = vmul.f32 %v2245_v51, %v1429_v24 }
 0x865   : > { %v1578_v50 = vadd.f32 %v1882_v48, %v1577_v49 }
 0x867   : > { %2246 = vtanh.f32 %v1578_v50 }
 0x871   : > { %v2247_v2 = vpop.eup %2246 }
 0x872   : > { %v1581_v53 = vmul.f32 %v2247_v2, %v1580_v1 }
 0x874   : > { %v1583_v4 = vadd.f32 %v1582_v52, %v1581_v53 }
 0x876   : > { %1584 = vst.msk [vmem:[#allocation2] sm:$0x3] %vm269_vm0, %v1583_v4  ;;  %1586 = vst.msk [vmem:[%s1585_s16] sm:$0x3] %vm269_vm0, %v1583_v4 }
 0x87d   : > { %v1587_v30 = vld [vmem:[#allocation2] sm:$0x3] }
 0x87e   : > { %1588 = vst.msk [vmem:[%s252_s21] sm:$0x3] %vm269_vm0, %v1587_v30 }
 0x87f PF: > { %s15_s15 = sadd.s32 1, %s2254_s15  }
 0x880   : > { %p12_p6 = scmp.ge.s32.totalorder %s15_s15, 4  }
 0x882   :  { %14 = sbr.rel (!%p12_p6) target bundleno = 1 (0x1), region = 114 }

// kernel: _lambda_.9
= control target key start
LH: loop header
LB: loop body
LE: loop exit
PB: predicated region body
PF: predicated region fallthrough
CT: control target
= control target key end

     0   :  { %10 = vsyncpa [#allocation4], 0  ;;  %s2836_s0 = inlined_call_operand.vmem [shape: f32[6,8,2,32], index: 0, kind: input, shape index: {}]   ;;  %s2837_s1 = inlined_call_operand.vmem [shape: bf16[6,32,32], index: 1, kind: input, shape index: {}]   ;;  %s2838_s2 = inlined_call_operand.vmem [shape: f32[2,1,32], index: 2, kind: input, shape index: {}]   ;;  %s2839_s3 = inlined_call_operand.hbm [shape: f32[2,8,2,32], index: 3, kind: output, shape index: {0}]   ;;  %s2840_s4 = inlined_call_operand.vmem [shape: f32[2,2,32], index: 4, kind: output, shape index: {1}]  }
   0x1   :  { %12 = vsyncpa [#allocation4 + $0x1], 0  ;;  %s2395_s15 = smov 0   ;;  %s2397_s16 = smov 0  }
   0x2   :  { %s2399_s17 = smov 0   ;;  %s2401_s18 = smov 0  }
   0x3 LB: > { %s2416_s19 = sadd.s32 4294967295, %s2363_s18   ;;  %s1795_s20 = sadd.s32 4294967294, %s2363_s18   ;;  %s2363_s18 = sphi %s2401_s18, %s2846_s18   ;;  %s2359_s17 = sphi %s2399_s17, %s2845_s17   ;;  %s2355_s16 = sphi %s2397_s16, %s2844_s16   ;;  %s2351_s15 = sphi %s2395_s15, %s2843_s15  }
   0x4   : > { %s2420_s21 = sadd.s32 1, %s2363_s18   ;;  %s103_s22 = sadd.s32 1, %s2359_s17 }
   0x5   : > { %s100_s23 = ssub.s32 %s2363_s18, %s2420_s21  ;;  %p113_p0 = scmp.ne.s32.totalorder %s2359_s17, %s2355_s16 }
   0x6   : > { %p101_p1 = scmp.eq.s32.totalorder %s100_s23, 0  ;;  %p114_p2 = scmp.eq.s32.totalorder %s2416_s19, 1 }
   0x7   : > { %p119_p3 = scmp.ne.s32.totalorder %s2355_s16, %s2351_s15  ;;  %p120_p4 = scmp.eq.s32.totalorder %s1795_s20, 1 }
   0x8   : > { %s2431_s24 = scalar_select %p101_p1, %s2359_s17, %s103_s22  }
   0x9   : > { %p2433_p5 = por %p114_p2, %p113_p0  ;;  %p2437_p6 = por %p120_p4, %p119_p3 }
   0xa   : > { %p1798_p7 = scmp.ge.s32.totalorder %s2363_s18, 1  ;;  %p190_p8 = scmp.lt.s32.totalorder %s2363_s18, 3 }
   0xc   : > { %p191_p9 = pnand %p1798_p7, %p190_p8 }
   0xd   : > { %s230_s27 = smul.u32 (!%p191_p9), 3, %s2416_s19  ;;  %vm267_vm0 = vcmask (!%p191_p9), 254976   ;;  %v2365_v0 = vmov (!%p191_p9), 0.0   ;;  %vm2366_vm1 = vmmov (!%p191_p9), 0   ;;  %vm285_vm2 = vcmask (!%p191_p9), 261120   ;;  %p269_p11 = scmp.eq.s32.totalorder (!%p191_p9), %s2416_s19, 0 }
   0xe   : > { %194 = sbr.rel (%p191_p9) target bundleno = 2192 (0x890), region = 32  ;;  %1980 = vmatprep.subr.bf16.mxu0 (!%p191_p9), %v2365_v0  ;;  %1984 = vmatprep.mubr.msk.bf16.mxu0 (!%p191_p9), %vm2366_vm1, %v2365_v0  ;;  %268 = vst.msk [vmem:[#allocation2] sm:$0x3] (!%p191_p9), %vm267_vm0, %v2365_v0  ;;  %p244_p12 = scmp.lt.s32.totalorder (!%p191_p9), %s2416_s19, 1 }
   0xf   : > { %p231_p10 = scmp.lt.s32.totalorder (!%p191_p9), %s230_s27, 5  ;;  %1988 = vmatprep.subr.bf16.mxu1 (!%p191_p9), %v2365_v0  ;;  %1992 = vmatprep.mubr.msk.bf16.mxu1 (!%p191_p9), %vm2366_vm1, %v2365_v0  ;;  %s221_s22 = sand.u32 (!%p191_p9), 1, %s2355_s16  }
  0x10   : > { %s1799_s23 = sshll.u32 (!%p191_p9), %s221_s22, 4 }
  0x15   : > { %s2848_s27 = smov (!%p231_p10, %s230_s27), 5  ;;  %v2465_v3 = vld [vmem:[#allocation2] sm:$0x3] }
  0x16   : > { %s1905_s28 = sshll.u32 %s2848_s27, 4  ;;  %v272_v5 = vpack.c.bf16 %v2465_v3, %v2465_v3  ;;  %s2541_s27 = scalar_lea.vmem [#allocation3], %s1799_s23 }
  0x17   : > { %s242_s5 = scalar_lea.vmem %s2837_s1, %s1905_s28  ;;  %s2515_s9 = scalar_lea.vmem %s2836_s0, %s1905_s28 }
  0x18   : > { %v2460_v1 = vld [vmem:[%s242_s5] sm:$0xff]   ;;  %v2462_v2 = vld [vmem:[%s242_s5 + $0x8] sm:$0xff]   ;;  %v2468_v4 = vld [vmem:[%s242_s5 + $0x10] sm:$0xff]   ;;  %s2508_s6 = scalar_select %p269_p11, 0, 7 }
  0x19   : > { %1981 = vmatpush3.bf16.msra.mxu0 %v2460_v1  ;;  %1989 = vmatpush3.bf16.msra.mxu1 %v2468_v4  ;;  %v2473_v6 = vld [vmem:[%s242_s5 + $0x18] sm:$0xff]   ;;  %v2477_v7 = vld [vmem:[%s242_s5 + $0x20] sm:$0xff]   ;;  %v2483_v8 = vld [vmem:[%s242_s5 + $0x28] sm:$0xff]   ;;  %s2527_s12 = scalar_select %p244_p12, %s2416_s19, 1 }
  0x1a   : > { %1982 = vmatprep.subr.bf16.mxu0 %v2365_v0  ;;  %1990 = vmatprep.subr.bf16.mxu1 %v2365_v0  ;;  %s1823_s10 = sshll.u32 %s2508_s6, 1 }
  0x1b   : > { %s2521_s11 = scalar_lea.vmem %s2515_s9, %s1823_s10  ;;  %s246_s20 = scalar_lea.vmem %s2838_s2, %s2527_s12 }
  0x1c   : > { %v441_v9 = vld [vmem:[%s2521_s11] sm:$0x3]  ;;  %v1826_v13 = vld [vmem:[%s2521_s11 + $0x10] sm:$0x3]  ;;  %s470_s28 = scalar_lea.vmem %s2541_s27, %s1823_s10 [#allocation3] }
  0x1d   : > { %1983 = vmatpush3.bf16.msra.mxu0 %v2462_v2  ;;  %1991 = vmatpush3.bf16.msra.mxu1 %v2473_v6  ;;  %v2533_v30 = vld [vmem:[%s246_s20] ss:$0 sm:$0xff]  ;;  %s2571_s29 = scalar_select %p269_p11, 1, 6 }
  0x1e   : > { %1996 = vmatprep.subr.bf16.mxu0 %v2365_v0  ;;  %2004 = vmatprep.subr.bf16.mxu1 %v2365_v0  ;;  %v1829_v34 = vld [vmem:[%s2521_s11 + $0x20] sm:$0x3]  ;;  %s2606_s7 = scalar_select %p269_p11, 2, 5 }
  0x1f   : > { %s1833_s30 = sshll.u32 %s2571_s29, 1 }
  0x20   : > { %1985 = vmatmul.mubr.msk.bf16.vlgmr.msra.gmra.mrb[0].mxu0 %vm285_vm2, %v272_v5  ;;  %1993 = vmatmul.mubr.msk.bf16.vlgmr.msra.gmra.mrb[0].mxu1 %vm285_vm2, %v272_v5  ;;  %s599_s5 = scalar_lea.vmem %s2515_s9, %s1833_s30  ;;  %s629_s6 = scalar_lea.vmem %s2541_s27, %s1833_s30 [#allocation3] }
  0x21   : > { %1997 = vmatpush3.bf16.msra.mxu0 %v2477_v7  ;;  %2000 = vmatprep.mubr.msk.bf16.mxu0 %vm2366_vm1, %v2365_v0  ;;  %v600_v45 = vld [vmem:[%s599_s5] sm:$0x3]  ;;  %v1836_v49 = vld [vmem:[%s599_s5 + $0x10] sm:$0x3]  ;;  %s1843_s8 = sshll.u32 %s2606_s7, 1 }
  0x22   : > { %1998 = vmatprep.subr.bf16.mxu0 %v2365_v0  ;;  %2005 = vmatpush3.bf16.msra.mxu1 %v2460_v1  ;;  %s758_s10 = scalar_lea.vmem %s2515_s9, %s1843_s8  ;;  %s788_s11 = scalar_lea.vmem %s2541_s27, %s1843_s8 [#allocation3] }
  0x23   : > { %2008 = vmatprep.mubr.msk.bf16.mxu1 %vm2366_vm1, %v2365_v0  ;;  %2006 = vmatprep.subr.bf16.mxu1 %v2365_v0  ;;  %s2641_s13 = scalar_select %p269_p11, 3, 4 }
  0x25   : > { %1999 = vmatpush3.bf16.msra.mxu0 %v2483_v8  ;;  %s1853_s14 = sshll.u32 %s2641_s13, 1 }
  0x26   : > { %2012 = vmatprep.subr.bf16.mxu0 %v2365_v0  ;;  %2007 = vmatpush3.bf16.msra.mxu1 %v2462_v2  ;;  %s917_s20 = scalar_lea.vmem %s2515_s9, %s1853_s14  ;;  %s947_s23 = scalar_lea.vmem %s2541_s27, %s1853_s14 [#allocation3] }
  0x27   : > { %2020 = vmatprep.subr.bf16.mxu1 %v2365_v0 }
  0x28   : > { %2001 = vmatmul.mubr.msk.bf16.vlgmr.msra.gmra.mrb[4].mxu0 %vm285_vm2, %v272_v5 }
  0x29   : > { %2013 = vmatpush3.bf16.msra.mxu0 %v2468_v4  ;;  %2016 = vmatprep.mubr.msk.bf16.mxu0 %vm2366_vm1, %v2365_v0 }
  0x2a   : > { %2014 = vmatprep.subr.bf16.mxu0 %v2365_v0 }
  0x2d   : > { %2015 = vmatpush3.bf16.msra.mxu0 %v2473_v6 }
  0x2e   : > { %2028 = vmatprep.subr.bf16.mxu0 %v2365_v0 }
  0xf3   : > { %v323_v10 = vpop.f32.mrb[0].mxu0  ;;  %v375_v17 = vpop.f32.mrb[0].mxu1 }
  0xf4   : > { %v442_v11 = vadd.f32 %v441_v9, %v323_v10  ;;  %v1986_v12 = vpop.f32.mrb[1].mxu0  ;;  %v452_v18 = vadd.f32 %v1826_v13, %v375_v17  ;;  %v1994_v19 = vpop.f32.mrb[1].mxu1 }
  0xf5   : > { %v326_v14 = vpop.f32.mrb[2].mxu0  ;;  %v378_v20 = vpop.f32.mrb[2].mxu1  ;;  %v1839_v12 = vld [vmem:[%s599_s5 + $0x20] sm:$0x3] }
  0xf6   : > { %v1824_v15 = vmul.f32 -1.442695, %v442_v11  ;;  %v1987_v16 = vpop.f32.mrb[3].mxu0  ;;  %v1827_v21 = vmul.f32 -1.442695, %v452_v18  ;;  %v1995_v22 = vpop.f32.mrb[3].mxu1 }
  0xf8   : > { %2221 = vpow2.f32 %v1824_v15 }
  0xf9   : > { %2223 = vpow2.f32 %v1827_v21 }
  0xfb   : > { %v433_v23 = vpop.f32.mrb[4].mxu0 }
  0xfc   : > { %v2002_v24 = vpop.f32.mrb[5].mxu0  ;;  %v434_v32 = vadd.f32 %v2533_v30, %v433_v23  ;;  %v759_v23 = vld [vmem:[%s758_s10] sm:$0x3] }
  0xfd   : > { %v436_v25 = vpop.f32.mrb[6].mxu0 }
  0xfe   : > { %v2003_v26 = vpop.f32.mrb[7].mxu0 }
 0x102   : > { %v2222_v27 = vpop.eup %2221 }
 0x103   : > { %v446_v28 = vadd.f32 1.0, %v2222_v27  ;;  %v2224_v29 = vpop.eup %2223  ;;  %v1846_v27 = vld [vmem:[%s758_s10 + $0x10] sm:$0x3] }
 0x104   : > { %v456_v31 = vadd.f32 1.0, %v2224_v29 }
 0x105   : > { %2225 = vrcp.f32 %v446_v28 }
 0x106   : > { %2227 = vrcp.f32 %v456_v31 }
 0x10f   : > { %v2226_v33 = vpop.eup %2225 }
 0x110   : > { %v462_v35 = vmul.f32 %v2226_v33, %v434_v32  ;;  %v2228_v37 = vpop.eup %2227 }
 0x111   : > { %v465_v38 = vsub.f32 1.0, %v2228_v37  ;;  %v467_v40 = vmul.f32 %v2228_v37, %v2465_v3 }
 0x112   : > { %v463_v36 = vadd.f32 %v1829_v34, %v462_v35 }
 0x114   : > { %2229 = vtanh.f32 %v463_v36 }
 0x11e   : > { %v2230_v39 = vpop.eup %2229 }
 0x11f   : > { %v466_v41 = vmul.f32 %v2230_v39, %v465_v38 }
 0x121   : > { %v468_v42 = vadd.f32 %v467_v40, %v466_v41 }
 0x123   : > { %469 = vst.msk [vmem:[#allocation2] sm:$0x3] %vm267_vm0, %v468_v42  ;;  %471 = vst.msk [vmem:[%s470_s28] sm:$0x3] %vm267_vm0, %v468_v42  ;;  %s2676_s28 = scalar_select %p269_p11, 4, 3 }
 0x125   : > { %s1863_s29 = sshll.u32 %s2676_s28, 1 }
 0x126   : > { %s1076_s30 = scalar_lea.vmem %s2515_s9, %s1863_s29  ;;  %s1106_s5 = scalar_lea.vmem %s2541_s27, %s1863_s29 [#allocation3] }
 0x12a   : > { %v473_v43 = vld [vmem:[#allocation2] sm:$0x3] }
 0x12b   : > { %v474_v44 = vpack.c.bf16 %v473_v43, %v473_v43 }
 0x12d   : > { %2009 = vmatmul.mubr.msk.bf16.vlgmr.msra.gmra.mrb[4].mxu1 %vm285_vm2, %v474_v44  ;;  %2017 = vmatmul.mubr.msk.bf16.vlgmr.msra.gmra.mrb[8].mxu0 %vm285_vm2, %v474_v44 }
 0x12e   : > { %2021 = vmatpush3.bf16.msra.mxu1 %v2477_v7  ;;  %2024 = vmatprep.mubr.msk.bf16.mxu1 %vm2366_vm1, %v2365_v0 }
 0x12f   : > { %2022 = vmatprep.subr.bf16.mxu1 %v2365_v0  ;;  %2029 = vmatpush3.bf16.msra.mxu0 %v2460_v1 }
 0x130   : > { %2030 = vmatprep.subr.bf16.mxu0 %v2365_v0  ;;  %2032 = vmatprep.mubr.msk.bf16.mxu0 %vm2366_vm1, %v2365_v0 }
 0x132   : > { %2023 = vmatpush3.bf16.msra.mxu1 %v2483_v8 }
 0x133   : > { %2036 = vmatprep.subr.bf16.mxu1 %v2365_v0  ;;  %2031 = vmatpush3.bf16.msra.mxu0 %v2462_v2 }
 0x134   : > { %2044 = vmatprep.subr.bf16.mxu0 %v2365_v0 }
 0x135   : > { %2025 = vmatmul.mubr.msk.bf16.vlgmr.msra.gmra.mrb[8].mxu1 %vm285_vm2, %v474_v44 }
 0x136   : > { %2037 = vmatpush3.bf16.msra.mxu1 %v2468_v4  ;;  %2040 = vmatprep.mubr.msk.bf16.mxu1 %vm2366_vm1, %v2365_v0 }
 0x137   : > { %2038 = vmatprep.subr.bf16.mxu1 %v2365_v0 }
 0x13a   : > { %2039 = vmatpush3.bf16.msra.mxu1 %v2473_v6 }
 0x13b   : > { %2052 = vmatprep.subr.bf16.mxu1 %v2365_v0 }
 0x200   : > { %v512_v46 = vpop.f32.mrb[4].mxu1  ;;  %v552_v47 = vpop.f32.mrb[8].mxu0 }
 0x201   : > { %v601_v48 = vadd.f32 %v600_v45, %v512_v46  ;;  %v2010_v50 = vpop.f32.mrb[5].mxu1  ;;  %v2018_v51 = vpop.f32.mrb[9].mxu0  ;;  %v611_v57 = vadd.f32 %v1836_v49, %v552_v47 }
 0x202   : > { %v515_v52 = vpop.f32.mrb[6].mxu1  ;;  %v555_v53 = vpop.f32.mrb[10].mxu0 }
 0x203   : > { %v1834_v54 = vmul.f32 -1.442695, %v601_v48  ;;  %v2011_v55 = vpop.f32.mrb[7].mxu1  ;;  %v2019_v56 = vpop.f32.mrb[11].mxu0  ;;  %v1837_v58 = vmul.f32 -1.442695, %v611_v57 }
 0x204   : > { %v1849_v48 = vld [vmem:[%s758_s10 + $0x20] sm:$0x3] }
 0x205   : > { %2231 = vpow2.f32 %v1834_v54 }
 0x206   : > { %2233 = vpow2.f32 %v1837_v58 }
 0x208   : > { %v592_v59 = vpop.f32.mrb[8].mxu1 }
 0x209   : > { %v2026_v60 = vpop.f32.mrb[9].mxu1  ;;  %v593_v10 = vadd.f32 %v2533_v30, %v592_v59  ;;  %v918_v59 = vld [vmem:[%s917_s20] sm:$0x3] }
 0x20a   : > { %v595_v61 = vpop.f32.mrb[10].mxu1 }
 0x20b   : > { %v2027_v62 = vpop.f32.mrb[11].mxu1 }
 0x20f   : > { %v2232_v63 = vpop.eup %2231 }
 0x210   : > { %v605_v3 = vadd.f32 1.0, %v2232_v63  ;;  %v2234_v5 = vpop.eup %2233  ;;  %v1856_v63 = vld [vmem:[%s917_s20 + $0x10] sm:$0x3] }
 0x211   : > { %v615_v9 = vadd.f32 1.0, %v2234_v5 }
 0x212   : > { %2235 = vrcp.f32 %v605_v3 }
 0x213   : > { %2237 = vrcp.f32 %v615_v9 }
 0x21c   : > { %v2236_v11 = vpop.eup %2235 }
 0x21d   : > { %v621_v13 = vmul.f32 %v2236_v11, %v593_v10  ;;  %v2238_v15 = vpop.eup %2237 }
 0x21e   : > { %v624_v16 = vsub.f32 1.0, %v2238_v15  ;;  %v626_v18 = vmul.f32 %v2238_v15, %v473_v43 }
 0x21f   : > { %v622_v14 = vadd.f32 %v1839_v12, %v621_v13 }
 0x221   : > { %2239 = vtanh.f32 %v622_v14 }
 0x22b   : > { %v2240_v17 = vpop.eup %2239 }
 0x22c   : > { %v625_v19 = vmul.f32 %v2240_v17, %v624_v16 }
 0x22e   : > { %v627_v20 = vadd.f32 %v626_v18, %v625_v19 }
 0x230   : > { %628 = vst.msk [vmem:[#allocation2] sm:$0x3] %vm267_vm0, %v627_v20  ;;  %630 = vst.msk [vmem:[%s629_s6] sm:$0x3] %vm267_vm0, %v627_v20  ;;  %s2711_s6 = scalar_select %p269_p11, 5, 2 }
 0x232   : > { %s1873_s7 = sshll.u32 %s2711_s6, 1 }
 0x233   : > { %s1235_s8 = scalar_lea.vmem %s2515_s9, %s1873_s7  ;;  %s1265_s10 = scalar_lea.vmem %s2541_s27, %s1873_s7 [#allocation3] }
 0x237   : > { %v632_v21 = vld [vmem:[#allocation2] sm:$0x3] }
 0x238   : > { %v633_v22 = vpack.c.bf16 %v632_v21, %v632_v21 }
 0x23a   : > { %2033 = vmatmul.mubr.msk.bf16.vlgmr.msra.gmra.mrb[12].mxu0 %vm285_vm2, %v633_v22  ;;  %2041 = vmatmul.mubr.msk.bf16.vlgmr.msra.gmra.mrb[12].mxu1 %vm285_vm2, %v633_v22 }
 0x23b   : > { %2045 = vmatpush3.bf16.msra.mxu0 %v2477_v7  ;;  %2048 = vmatprep.mubr.msk.bf16.mxu0 %vm2366_vm1, %v2365_v0 }
 0x23c   : > { %2046 = vmatprep.subr.bf16.mxu0 %v2365_v0  ;;  %2053 = vmatpush3.bf16.msra.mxu1 %v2460_v1 }
 0x23d   : > { %2054 = vmatprep.subr.bf16.mxu1 %v2365_v0  ;;  %2056 = vmatprep.mubr.msk.bf16.mxu1 %vm2366_vm1, %v2365_v0 }
 0x23f   : > { %2047 = vmatpush3.bf16.msra.mxu0 %v2483_v8 }
 0x240   : > { %2060 = vmatprep.subr.bf16.mxu0 %v2365_v0  ;;  %2055 = vmatpush3.bf16.msra.mxu1 %v2462_v2 }
 0x241   : > { %2068 = vmatprep.subr.bf16.mxu1 %v2365_v0 }
 0x242   : > { %2049 = vmatmul.mubr.msk.bf16.vlgmr.msra.gmra.mrb[16].mxu0 %vm285_vm2, %v633_v22 }
 0x243   : > { %2061 = vmatpush3.bf16.msra.mxu0 %v2468_v4  ;;  %2064 = vmatprep.mubr.msk.bf16.mxu0 %vm2366_vm1, %v2365_v0 }
 0x244   : > { %2062 = vmatprep.subr.bf16.mxu0 %v2365_v0 }
 0x247   : > { %2063 = vmatpush3.bf16.msra.mxu0 %v2473_v6 }
 0x248   : > { %2076 = vmatprep.subr.bf16.mxu0 %v2365_v0 }
 0x30d   : > { %v671_v24 = vpop.f32.mrb[12].mxu0  ;;  %v711_v25 = vpop.f32.mrb[12].mxu1 }
 0x30e   : > { %v760_v26 = vadd.f32 %v759_v23, %v671_v24  ;;  %v2034_v28 = vpop.f32.mrb[13].mxu0  ;;  %v2042_v29 = vpop.f32.mrb[13].mxu1  ;;  %v770_v36 = vadd.f32 %v1846_v27, %v711_v25 }
 0x30f   : > { %v674_v31 = vpop.f32.mrb[14].mxu0  ;;  %v714_v32 = vpop.f32.mrb[14].mxu1 }
 0x310   : > { %v1844_v33 = vmul.f32 -1.442695, %v760_v26  ;;  %v2035_v34 = vpop.f32.mrb[15].mxu0  ;;  %v2043_v35 = vpop.f32.mrb[15].mxu1  ;;  %v1847_v37 = vmul.f32 -1.442695, %v770_v36 }
 0x311   : > { %v1859_v26 = vld [vmem:[%s917_s20 + $0x20] sm:$0x3] }
 0x312   : > { %2241 = vpow2.f32 %v1844_v33 }
 0x313   : > { %2243 = vpow2.f32 %v1847_v37 }
 0x315   : > { %v751_v38 = vpop.f32.mrb[16].mxu0 }
 0x316   : > { %v2050_v39 = vpop.f32.mrb[17].mxu0  ;;  %v752_v46 = vadd.f32 %v2533_v30, %v751_v38  ;;  %v1077_v38 = vld [vmem:[%s1076_s30] sm:$0x3] }
 0x317   : > { %v754_v40 = vpop.f32.mrb[18].mxu0 }
 0x318   : > { %v2051_v41 = vpop.f32.mrb[19].mxu0 }
 0x31c   : > { %v2242_v42 = vpop.eup %2241 }
 0x31d   : > { %v764_v43 = vadd.f32 1.0, %v2242_v42  ;;  %v2244_v44 = vpop.eup %2243  ;;  %v1866_v42 = vld [vmem:[%s1076_s30 + $0x10] sm:$0x3] }
 0x31e   : > { %v774_v45 = vadd.f32 1.0, %v2244_v44 }
 0x31f   : > { %2245 = vrcp.f32 %v764_v43 }
 0x320   : > { %2247 = vrcp.f32 %v774_v45 }
 0x329   : > { %v2246_v47 = vpop.eup %2245 }
 0x32a   : > { %v780_v49 = vmul.f32 %v2246_v47, %v752_v46  ;;  %v2248_v51 = vpop.eup %2247 }
 0x32b   : > { %v783_v52 = vsub.f32 1.0, %v2248_v51  ;;  %v785_v54 = vmul.f32 %v2248_v51, %v632_v21 }
 0x32c   : > { %v781_v50 = vadd.f32 %v1849_v48, %v780_v49 }
 0x32e   : > { %2249 = vtanh.f32 %v781_v50 }
 0x338   : > { %v2250_v53 = vpop.eup %2249 }
 0x339   : > { %v784_v55 = vmul.f32 %v2250_v53, %v783_v52 }
 0x33b   : > { %v786_v56 = vadd.f32 %v785_v54, %v784_v55 }
 0x33d   : > { %787 = vst.msk [vmem:[#allocation2] sm:$0x3] %vm267_vm0, %v786_v56  ;;  %789 = vst.msk [vmem:[%s788_s11] sm:$0x3] %vm267_vm0, %v786_v56  ;;  %s2745_s11 = scalar_select %p269_p11, 6, 1 }
 0x33f   : > { %s1883_s13 = sshll.u32 %s2745_s11, 1 }
 0x340   : > { %s1394_s14 = scalar_lea.vmem %s2515_s9, %s1883_s13  ;;  %s1424_s20 = scalar_lea.vmem %s2541_s27, %s1883_s13 [#allocation3] }
 0x344   : > { %v791_v57 = vld [vmem:[#allocation2] sm:$0x3] }
 0x345   : > { %v792_v58 = vpack.c.bf16 %v791_v57, %v791_v57 }
 0x347   : > { %2057 = vmatmul.mubr.msk.bf16.vlgmr.msra.gmra.mrb[16].mxu1 %vm285_vm2, %v792_v58  ;;  %2065 = vmatmul.mubr.msk.bf16.vlgmr.msra.gmra.mrb[20].mxu0 %vm285_vm2, %v792_v58 }
 0x348   : > { %2069 = vmatpush3.bf16.msra.mxu1 %v2477_v7  ;;  %2072 = vmatprep.mubr.msk.bf16.mxu1 %vm2366_vm1, %v2365_v0 }
 0x349   : > { %2070 = vmatprep.subr.bf16.mxu1 %v2365_v0  ;;  %2077 = vmatpush3.bf16.msra.mxu0 %v2460_v1 }
 0x34a   : > { %2078 = vmatprep.subr.bf16.mxu0 %v2365_v0  ;;  %2080 = vmatprep.mubr.msk.bf16.mxu0 %vm2366_vm1, %v2365_v0 }
 0x34c   : > { %2071 = vmatpush3.bf16.msra.mxu1 %v2483_v8 }
 0x34d   : > { %2084 = vmatprep.subr.bf16.mxu1 %v2365_v0  ;;  %2079 = vmatpush3.bf16.msra.mxu0 %v2462_v2 }
 0x34e   : > { %2092 = vmatprep.subr.bf16.mxu0 %v2365_v0 }
 0x34f   : > { %2073 = vmatmul.mubr.msk.bf16.vlgmr.msra.gmra.mrb[20].mxu1 %vm285_vm2, %v792_v58 }
 0x350   : > { %2085 = vmatpush3.bf16.msra.mxu1 %v2468_v4  ;;  %2088 = vmatprep.mubr.msk.bf16.mxu1 %vm2366_vm1, %v2365_v0 }
 0x351   : > { %2086 = vmatprep.subr.bf16.mxu1 %v2365_v0 }
 0x354   : > { %2087 = vmatpush3.bf16.msra.mxu1 %v2473_v6 }
 0x355   : > { %2100 = vmatprep.subr.bf16.mxu1 %v2365_v0 }
 0x41a   : > { %v830_v60 = vpop.f32.mrb[16].mxu1  ;;  %v870_v61 = vpop.f32.mrb[20].mxu0 }
 0x41b   : > { %v919_v62 = vadd.f32 %v918_v59, %v830_v60  ;;  %v2058_v3 = vpop.f32.mrb[17].mxu1  ;;  %v2066_v5 = vpop.f32.mrb[21].mxu0  ;;  %v929_v14 = vadd.f32 %v1856_v63, %v870_v61 }
 0x41c   : > { %v833_v9 = vpop.f32.mrb[18].mxu1  ;;  %v873_v10 = vpop.f32.mrb[22].mxu0 }
 0x41d   : > { %v1854_v11 = vmul.f32 -1.442695, %v919_v62  ;;  %v2059_v12 = vpop.f32.mrb[19].mxu1  ;;  %v2067_v13 = vpop.f32.mrb[23].mxu0  ;;  %v1857_v15 = vmul.f32 -1.442695, %v929_v14 }
 0x41e   : > { %v1869_v62 = vld [vmem:[%s1076_s30 + $0x20] sm:$0x3]  ;;  %s1605_s30 = sshll.u32 %s2541_s27, 4  ;;  %s2784_s30 = int_to_ptr.vmem [resolvable:$true] %s1605_s30 }
 0x41f   : > { %2251 = vpow2.f32 %v1854_v11 }
 0x420   : > { %2253 = vpow2.f32 %v1857_v15 }
 0x422   : > { %v910_v16 = vpop.f32.mrb[20].mxu1 }
 0x423   : > { %v2074_v17 = vpop.f32.mrb[21].mxu1  ;;  %v911_v24 = vadd.f32 %v2533_v30, %v910_v16  ;;  %v1236_v16 = vld [vmem:[%s1235_s8] sm:$0x3] }
 0x424   : > { %v913_v18 = vpop.f32.mrb[22].mxu1 }
 0x425   : > { %v2075_v19 = vpop.f32.mrb[23].mxu1 }
 0x429   : > { %v2252_v20 = vpop.eup %2251 }
 0x42a   : > { %v923_v21 = vadd.f32 1.0, %v2252_v20  ;;  %v2254_v22 = vpop.eup %2253  ;;  %v1876_v20 = vld [vmem:[%s1235_s8 + $0x10] sm:$0x3] }
 0x42b   : > { %v933_v23 = vadd.f32 1.0, %v2254_v22 }
 0x42c   : > { %2255 = vrcp.f32 %v923_v21 }
 0x42d   : > { %2257 = vrcp.f32 %v933_v23 }
 0x436   : > { %v2256_v25 = vpop.eup %2255 }
 0x437   : > { %v939_v27 = vmul.f32 %v2256_v25, %v911_v24  ;;  %v2258_v29 = vpop.eup %2257 }
 0x438   : > { %v942_v31 = vsub.f32 1.0, %v2258_v29  ;;  %v944_v33 = vmul.f32 %v2258_v29, %v791_v57 }
 0x439   : > { %v940_v28 = vadd.f32 %v1859_v26, %v939_v27 }
 0x43b   : > { %2259 = vtanh.f32 %v940_v28 }
 0x445   : > { %v2260_v32 = vpop.eup %2259 }
 0x446   : > { %v943_v34 = vmul.f32 %v2260_v32, %v942_v31 }
 0x448   : > { %v945_v35 = vadd.f32 %v944_v33, %v943_v34 }
 0x44a   : > { %946 = vst.msk [vmem:[#allocation2] sm:$0x3] %vm267_vm0, %v945_v35  ;;  %948 = vst.msk [vmem:[%s947_s23] sm:$0x3] %vm267_vm0, %v945_v35  ;;  %s2767_s23 = scalar_select %p269_p11, 7, 0 }
 0x44c   : > { %s1893_s28 = sshll.u32 %s2767_s23, 1 }
 0x44d   : > { %s1553_s29 = scalar_lea.vmem %s2515_s9, %s1893_s28  ;;  %s1907_s9 = sshll.u32 %s2416_s19, 8 }
 0x44e   : > { %s2790_s19 = scalar_lea.sflag [#allocation4], %s221_s22 }
 0x451   : > { %v950_v36 = vld [vmem:[#allocation2] sm:$0x3] }
 0x452   : > { %v951_v37 = vpack.c.bf16 %v950_v36, %v950_v36 }
 0x454   : > { %2081 = vmatmul.mubr.msk.bf16.vlgmr.msra.gmra.mrb[24].mxu0 %vm285_vm2, %v951_v37  ;;  %2089 = vmatmul.mubr.msk.bf16.vlgmr.msra.gmra.mrb[24].mxu1 %vm285_vm2, %v951_v37 }
 0x455   : > { %2093 = vmatpush3.bf16.msra.mxu0 %v2477_v7  ;;  %2096 = vmatprep.mubr.msk.bf16.mxu0 %vm2366_vm1, %v2365_v0 }
 0x456   : > { %2094 = vmatprep.subr.bf16.mxu0 %v2365_v0  ;;  %2101 = vmatpush3.bf16.msra.mxu1 %v2460_v1 }
 0x457   : > { %2102 = vmatprep.subr.bf16.mxu1 %v2365_v0  ;;  %2104 = vmatprep.mubr.msk.bf16.mxu1 %vm2366_vm1, %v2365_v0 }
 0x459   : > { %2095 = vmatpush3.bf16.msra.mxu0 %v2483_v8 }
 0x45a   : > { %2108 = vmatprep.subr.bf16.mxu0 %v2365_v0  ;;  %2103 = vmatpush3.bf16.msra.mxu1 %v2462_v2 }
 0x45b   : > { %2116 = vmatprep.subr.bf16.mxu1 %v2365_v0 }
 0x45c   : > { %2097 = vmatmul.mubr.msk.bf16.vlgmr.msra.gmra.mrb[28].mxu0 %vm285_vm2, %v951_v37 }
 0x45d   : > { %2109 = vmatpush3.bf16.msra.mxu0 %v2468_v4  ;;  %2112 = vmatprep.mubr.msk.bf16.mxu0 %vm2366_vm1, %v2365_v0 }
 0x45e   : > { %2110 = vmatprep.subr.bf16.mxu0 %v2365_v0 }
 0x461   : > { %2111 = vmatpush3.bf16.msra.mxu0 %v2473_v6 }
 0x462   : > { %2124 = vmatprep.subr.bf16.mxu0 %v2365_v0 }
 0x527   : > { %v989_v39 = vpop.f32.mrb[24].mxu0  ;;  %v1029_v40 = vpop.f32.mrb[24].mxu1 }
 0x528   : > { %v1078_v41 = vadd.f32 %v1077_v38, %v989_v39  ;;  %v2082_v43 = vpop.f32.mrb[25].mxu0  ;;  %v2090_v44 = vpop.f32.mrb[25].mxu1  ;;  %v1088_v50 = vadd.f32 %v1866_v42, %v1029_v40 }
 0x529   : > { %v992_v45 = vpop.f32.mrb[26].mxu0  ;;  %v1032_v46 = vpop.f32.mrb[26].mxu1 }
 0x52a   : > { %v1864_v47 = vmul.f32 -1.442695, %v1078_v41  ;;  %v2083_v48 = vpop.f32.mrb[27].mxu0  ;;  %v2091_v49 = vpop.f32.mrb[27].mxu1  ;;  %v1867_v51 = vmul.f32 -1.442695, %v1088_v50 }
 0x52b   : > { %v1879_v41 = vld [vmem:[%s1235_s8 + $0x20] sm:$0x3]  ;;  %s2782_s8 = scalar_lea.hbm %s2839_s3, %s1907_s9 }
 0x52c   : > { %2261 = vpow2.f32 %v1864_v47 }
 0x52d   : > { %2263 = vpow2.f32 %v1867_v51 }
 0x52f   : > { %v1069_v52 = vpop.f32.mrb[28].mxu0 }
 0x530   : > { %v2098_v53 = vpop.f32.mrb[29].mxu0  ;;  %v1070_v60 = vadd.f32 %v2533_v30, %v1069_v52 }
 0x531   : > { %v1072_v54 = vpop.f32.mrb[30].mxu0 }
 0x532   : > { %v2099_v55 = vpop.f32.mrb[31].mxu0 }
 0x536   : > { %v2262_v56 = vpop.eup %2261 }
 0x537   : > { %v1082_v57 = vadd.f32 1.0, %v2262_v56  ;;  %v2264_v58 = vpop.eup %2263 }
 0x538   : > { %v1092_v59 = vadd.f32 1.0, %v2264_v58 }
 0x539   : > { %2265 = vrcp.f32 %v1082_v57 }
 0x53a   : > { %2267 = vrcp.f32 %v1092_v59 }
 0x543   : > { %v2266_v61 = vpop.eup %2265 }
 0x544   : > { %v1098_v63 = vmul.f32 %v2266_v61, %v1070_v60  ;;  %v2268_v5 = vpop.eup %2267 }
 0x545   : > { %v1101_v9 = vsub.f32 1.0, %v2268_v5  ;;  %v1103_v11 = vmul.f32 %v2268_v5, %v950_v36 }
 0x546   : > { %v1099_v3 = vadd.f32 %v1869_v62, %v1098_v63 }
 0x548   : > { %2269 = vtanh.f32 %v1099_v3 }
 0x552   : > { %v2270_v10 = vpop.eup %2269 }
 0x553   : > { %v1102_v12 = vmul.f32 %v2270_v10, %v1101_v9 }
 0x555   : > { %v1104_v13 = vadd.f32 %v1103_v11, %v1102_v12 }
 0x557   : > { %1105 = vst.msk [vmem:[#allocation2] sm:$0x3] %vm267_vm0, %v1104_v13  ;;  %1107 = vst.msk [vmem:[%s1106_s5] sm:$0x3] %vm267_vm0, %v1104_v13  ;;  %s1583_s5 = scalar_lea.vmem %s2541_s27, %s1893_s28 [#allocation3]  ;;  %s2301_s27 = scalar_lea.vmem %s2784_s30, 256 }
 0x558   : > { %p2302_p13 = scmp.ne.s32.totalorder %s2784_s30, %s2301_s27 }
 0x55a   : > { %p2303_p0 = pnand %p2302_p13, %p2433_p5 }
 0x55c   : > { %p2304_p1 = pneg %p2303_p0 }
 0x55e   : > { %v1109_v14 = vld [vmem:[#allocation2] sm:$0x3] }
 0x55f   : > { %v1110_v15 = vpack.c.bf16 %v1109_v14, %v1109_v14 }
 0x561   : > { %2105 = vmatmul.mubr.msk.bf16.vlgmr.msra.gmra.mrb[28].mxu1 %vm285_vm2, %v1110_v15  ;;  %2113 = vmatmul.mubr.msk.bf16.vlgmr.msra.gmra.mrb[32].mxu0 %vm285_vm2, %v1110_v15 }
 0x562   : > { %2117 = vmatpush3.bf16.msra.mxu1 %v2477_v7  ;;  %2120 = vmatprep.mubr.msk.bf16.mxu1 %vm2366_vm1, %v2365_v0 }
 0x563   : > { %2118 = vmatprep.subr.bf16.mxu1 %v2365_v0  ;;  %2125 = vmatpush3.bf16.msra.mxu0 %v2460_v1 }
 0x564   : > { %2126 = vmatprep.subr.bf16.mxu0 %v2365_v0  ;;  %2128 = vmatprep.mubr.msk.bf16.mxu0 %vm2366_vm1, %v2365_v0 }
 0x566   : > { %2119 = vmatpush3.bf16.msra.mxu1 %v2483_v8 }
 0x567   : > { %2132 = vmatprep.subr.bf16.mxu1 %v2365_v0  ;;  %2127 = vmatpush3.bf16.msra.mxu0 %v2462_v2 }
 0x568   : > { %2140 = vmatprep.subr.bf16.mxu0 %v2365_v0 }
 0x569   : > { %2121 = vmatmul.mubr.msk.bf16.vlgmr.msra.gmra.mrb[32].mxu1 %vm285_vm2, %v1110_v15  ;;  %v1889_v15 = vld [vmem:[%s1394_s14 + $0x20] sm:$0x3] }
 0x56a   : > { %2133 = vmatpush3.bf16.msra.mxu1 %v2468_v4  ;;  %2136 = vmatprep.mubr.msk.bf16.mxu1 %vm2366_vm1, %v2365_v0 }
 0x56b   : > { %2134 = vmatprep.subr.bf16.mxu1 %v2365_v0 }
 0x56e   : > { %2135 = vmatpush3.bf16.msra.mxu1 %v2473_v6 }
 0x56f   : > { %2148 = vmatprep.subr.bf16.mxu1 %v2365_v0 }
 0x634   : > { %v1148_v17 = vpop.f32.mrb[28].mxu1  ;;  %v1188_v18 = vpop.f32.mrb[32].mxu0 }
 0x635   : > { %v1237_v19 = vadd.f32 %v1236_v16, %v1148_v17  ;;  %v2106_v21 = vpop.f32.mrb[29].mxu1  ;;  %v2114_v22 = vpop.f32.mrb[33].mxu0  ;;  %v1247_v28 = vadd.f32 %v1876_v20, %v1188_v18 }
 0x636   : > { %v1151_v23 = vpop.f32.mrb[30].mxu1  ;;  %v1191_v24 = vpop.f32.mrb[34].mxu0 }
 0x637   : > { %v1874_v25 = vmul.f32 -1.442695, %v1237_v19  ;;  %v2107_v26 = vpop.f32.mrb[31].mxu1  ;;  %v2115_v27 = vpop.f32.mrb[35].mxu0  ;;  %v1877_v29 = vmul.f32 -1.442695, %v1247_v28 }
 0x638   : > { %v1554_v26 = vld [vmem:[%s1553_s29] sm:$0x3] }
 0x639   : > { %2271 = vpow2.f32 %v1874_v25 }
 0x63a   : > { %2273 = vpow2.f32 %v1877_v29  ;;  %v1896_v29 = vld [vmem:[%s1553_s29 + $0x10] sm:$0x3] }
 0x63c   : > { %v1228_v31 = vpop.f32.mrb[32].mxu1 }
 0x63d   : > { %v2122_v32 = vpop.f32.mrb[33].mxu1  ;;  %v1229_v39 = vadd.f32 %v2533_v30, %v1228_v31 }
 0x63e   : > { %v1231_v33 = vpop.f32.mrb[34].mxu1 }
 0x63f   : > { %v2123_v34 = vpop.f32.mrb[35].mxu1 }
 0x643   : > { %v2272_v35 = vpop.eup %2271 }
 0x644   : > { %v1241_v36 = vadd.f32 1.0, %v2272_v35  ;;  %v2274_v37 = vpop.eup %2273 }
 0x645   : > { %v1251_v38 = vadd.f32 1.0, %v2274_v37 }
 0x646   : > { %2275 = vrcp.f32 %v1241_v36 }
 0x647   : > { %2277 = vrcp.f32 %v1251_v38 }
 0x650   : > { %v2276_v40 = vpop.eup %2275 }
 0x651   : > { %v1257_v42 = vmul.f32 %v2276_v40, %v1229_v39  ;;  %v2278_v44 = vpop.eup %2277 }
 0x652   : > { %v1260_v45 = vsub.f32 1.0, %v2278_v44  ;;  %v1262_v47 = vmul.f32 %v2278_v44, %v1109_v14 }
 0x653   : > { %v1258_v43 = vadd.f32 %v1879_v41, %v1257_v42 }
 0x655   : > { %2279 = vtanh.f32 %v1258_v43 }
 0x65f   : > { %v2280_v46 = vpop.eup %2279 }
 0x660   : > { %v1261_v48 = vmul.f32 %v2280_v46, %v1260_v45 }
 0x662   : > { %v1263_v49 = vadd.f32 %v1262_v47, %v1261_v48  ;;  %v1899_v48 = vld [vmem:[%s1553_s29 + $0x20] sm:$0x3] }
 0x664   : > { %1264 = vst.msk [vmem:[#allocation2] sm:$0x3] %vm267_vm0, %v1263_v49  ;;  %1266 = vst.msk [vmem:[%s1265_s10] sm:$0x3] %vm267_vm0, %v1263_v49  ;;  %s2367_s10 = smov [#allocation3]  }
 0x665   : > { %s2305_s11 = sshll.u32 %s2367_s10, 4  ;;  %s2306_s11 = int_to_ptr.vmem [resolvable:$false] %s2305_s11 }
 0x666   : > { %s2307_s13 = scalar_lea.vmem %s2306_s11, 512  ;;  %p2308_p2 = scmp.lt.s32.totalorder %s2784_s30, %s2306_s11 }
 0x667   : > { %p2309_p3 = scmp.lt.s32.totalorder %s2307_s13, %s2301_s27 }
 0x669   : > { %p2310_p4 = por %p2309_p3, %p2308_p2 }
 0x66b   : > { %v1268_v50 = vld [vmem:[#allocation2] sm:$0x3]  ;;  %p2311_p7 = pnand %p2310_p4, %p2304_p1 }
 0x66c   : > { %v1269_v51 = vpack.c.bf16 %v1268_v50, %v1268_v50 }
 0x66e   : > { %2129 = vmatmul.mubr.msk.bf16.vlgmr.msra.gmra.mrb[36].mxu0 %vm285_vm2, %v1269_v51  ;;  %2137 = vmatmul.mubr.msk.bf16.vlgmr.msra.gmra.mrb[36].mxu1 %vm285_vm2, %v1269_v51 }
 0x66f   : > { %2141 = vmatpush3.bf16.msra.mxu0 %v2477_v7  ;;  %2144 = vmatprep.mubr.msk.bf16.mxu0 %vm2366_vm1, %v2365_v0 }
 0x670   : > { %2142 = vmatprep.subr.bf16.mxu0 %v2365_v0  ;;  %2149 = vmatpush3.bf16.msra.mxu1 %v2460_v1  ;;  %v1395_v1 = vld [vmem:[%s1394_s14] sm:$0x3] }
 0x671   : > { %2150 = vmatprep.subr.bf16.mxu1 %v2365_v0  ;;  %2152 = vmatprep.mubr.msk.bf16.mxu1 %vm2366_vm1, %v2365_v0 }
 0x673   : > { %2143 = vmatpush3.bf16.msra.mxu0 %v2483_v8 }
 0x674   : > { %2156 = vmatprep.subr.bf16.mxu0 %v2365_v0  ;;  %2151 = vmatpush3.bf16.msra.mxu1 %v2462_v2 }
 0x675   : > { %2164 = vmatprep.subr.bf16.mxu1 %v2365_v0 }
 0x676   : > { %2145 = vmatmul.mubr.msk.bf16.vlgmr.msra.gmra.mrb[40].mxu0 %vm285_vm2, %v1269_v51 }
 0x677   : > { %2157 = vmatpush3.bf16.msra.mxu0 %v2468_v4  ;;  %2160 = vmatprep.mubr.msk.bf16.mxu0 %vm2366_vm1, %v2365_v0  ;;  %v1886_v4 = vld [vmem:[%s1394_s14 + $0x10] sm:$0x3] }
 0x678   : > { %2158 = vmatprep.subr.bf16.mxu0 %v2365_v0 }
 0x67b   : > { %2159 = vmatpush3.bf16.msra.mxu0 %v2473_v6 }
 0x741   : > { %v1307_v2 = vpop.f32.mrb[36].mxu0  ;;  %v1347_v52 = vpop.f32.mrb[36].mxu1 }
 0x742   : > { %v1396_v53 = vadd.f32 %v1395_v1, %v1307_v2  ;;  %v2130_v54 = vpop.f32.mrb[37].mxu0  ;;  %v2138_v55 = vpop.f32.mrb[37].mxu1  ;;  %v1406_v60 = vadd.f32 %v1886_v4, %v1347_v52 }
 0x743   : > { %v1310_v56 = vpop.f32.mrb[38].mxu0  ;;  %v1350_v57 = vpop.f32.mrb[38].mxu1 }
 0x744   : > { %v1884_v58 = vmul.f32 -1.442695, %v1396_v53  ;;  %v2131_v59 = vpop.f32.mrb[39].mxu0  ;;  %v2139_v6 = vpop.f32.mrb[39].mxu1  ;;  %v1887_v61 = vmul.f32 -1.442695, %v1406_v60 }
 0x746   : > { %2281 = vpow2.f32 %v1884_v58 }
 0x747   : > { %2283 = vpow2.f32 %v1887_v61 }
 0x749   : > { %v1387_v62 = vpop.f32.mrb[40].mxu0 }
 0x74a   : > { %v2146_v63 = vpop.f32.mrb[41].mxu0  ;;  %v1388_v13 = vadd.f32 %v2533_v30, %v1387_v62 }
 0x74b   : > { %v1390_v3 = vpop.f32.mrb[42].mxu0 }
 0x74c   : > { %v2147_v5 = vpop.f32.mrb[43].mxu0 }
 0x750   : > { %v2282_v9 = vpop.eup %2281 }
 0x751   : > { %v1400_v10 = vadd.f32 1.0, %v2282_v9  ;;  %v2284_v11 = vpop.eup %2283 }
 0x752   : > { %v1410_v12 = vadd.f32 1.0, %v2284_v11 }
 0x753   : > { %2285 = vrcp.f32 %v1400_v10 }
 0x754   : > { %2287 = vrcp.f32 %v1410_v12 }
 0x75d   : > { %v2286_v14 = vpop.eup %2285 }
 0x75e   : > { %v1416_v16 = vmul.f32 %v2286_v14, %v1388_v13  ;;  %v2288_v18 = vpop.eup %2287 }
 0x75f   : > { %v1419_v19 = vsub.f32 1.0, %v2288_v18  ;;  %v1421_v21 = vmul.f32 %v2288_v18, %v1268_v50 }
 0x760   : > { %v1417_v17 = vadd.f32 %v1889_v15, %v1416_v16 }
 0x762   : > { %2289 = vtanh.f32 %v1417_v17 }
 0x76c   : > { %v2290_v20 = vpop.eup %2289 }
 0x76d   : > { %v1420_v22 = vmul.f32 %v2290_v20, %v1419_v19 }
 0x76f   : > { %v1422_v23 = vadd.f32 %v1421_v21, %v1420_v22 }
 0x771   : > { %1423 = vst.msk [vmem:[#allocation2] sm:$0x3] %vm267_vm0, %v1422_v23  ;;  %1425 = vst.msk [vmem:[%s1424_s20] sm:$0x3] %vm267_vm0, %v1422_v23 }
 0x778   : > { %v1427_v24 = vld [vmem:[#allocation2] sm:$0x3] }
 0x779   : > { %v1428_v25 = vpack.c.bf16 %v1427_v24, %v1427_v24 }
 0x77b   : > { %2153 = vmatmul.mubr.msk.bf16.vlgmr.msra.gmra.mrb[40].mxu1 %vm285_vm2, %v1428_v25  ;;  %2161 = vmatmul.mubr.msk.bf16.vlgmr.msra.gmra.mrb[44].mxu0 %vm285_vm2, %v1428_v25 }
 0x77c   : > { %2165 = vmatpush3.bf16.msra.mxu1 %v2477_v7  ;;  %2168 = vmatprep.mubr.msk.bf16.mxu1 %vm2366_vm1, %v2365_v0 }
 0x77d   : > { %2166 = vmatprep.subr.bf16.mxu1 %v2365_v0 }
 0x780   : > { %2167 = vmatpush3.bf16.msra.mxu1 %v2483_v8 }
 0x783   : > { %2169 = vmatmul.mubr.msk.bf16.vlgmr.msra.gmra.mrb[44].mxu1 %vm285_vm2, %v1428_v25 }
 0x84e   : > { %v1466_v27 = vpop.f32.mrb[40].mxu1  ;;  %v1506_v7 = vpop.f32.mrb[44].mxu0 }
 0x84f   : > { %v1555_v28 = vadd.f32 %v1554_v26, %v1466_v27  ;;  %v2154_v31 = vpop.f32.mrb[41].mxu1  ;;  %v2162_v32 = vpop.f32.mrb[45].mxu0  ;;  %v1565_v36 = vadd.f32 %v1896_v29, %v1506_v7 }
 0x850   : > { %v1469_v0 = vpop.f32.mrb[42].mxu1  ;;  %v1509_v33 = vpop.f32.mrb[46].mxu0 }
 0x851   : > { %v1894_v8 = vmul.f32 -1.442695, %v1555_v28  ;;  %v2155_v34 = vpop.f32.mrb[43].mxu1  ;;  %v2163_v35 = vpop.f32.mrb[47].mxu0  ;;  %v1897_v37 = vmul.f32 -1.442695, %v1565_v36 }
 0x853   : > { %2291 = vpow2.f32 %v1894_v8 }
 0x854   : > { %2293 = vpow2.f32 %v1897_v37 }
 0x856   : > { %v1546_v38 = vpop.f32.mrb[44].mxu1 }
 0x857   : > { %v2170_v39 = vpop.f32.mrb[45].mxu1  ;;  %v1547_v46 = vadd.f32 %v2533_v30, %v1546_v38 }
 0x858   : > { %v1549_v40 = vpop.f32.mrb[46].mxu1 }
 0x859   : > { %v2171_v41 = vpop.f32.mrb[47].mxu1 }
 0x85d   : > { %v2292_v42 = vpop.eup %2291 }
 0x85e   : > { %v1559_v43 = vadd.f32 1.0, %v2292_v42  ;;  %v2294_v44 = vpop.eup %2293 }
 0x85f   : > { %v1569_v45 = vadd.f32 1.0, %v2294_v44 }
 0x860   : > { %2295 = vrcp.f32 %v1559_v43 }
 0x861   : > { %2297 = vrcp.f32 %v1569_v45 }
 0x86a   : > { %v2296_v47 = vpop.eup %2295 }
 0x86b   : > { %v1575_v49 = vmul.f32 %v2296_v47, %v1547_v46  ;;  %v2298_v51 = vpop.eup %2297 }
 0x86c   : > { %v1578_v1 = vsub.f32 1.0, %v2298_v51  ;;  %v1580_v52 = vmul.f32 %v2298_v51, %v1427_v24 }
 0x86d   : > { %v1576_v50 = vadd.f32 %v1899_v48, %v1575_v49 }
 0x86f   : > { %2299 = vtanh.f32 %v1576_v50 }
 0x879   : > { %v2300_v2 = vpop.eup %2299 }
 0x87a   : > { %v1579_v53 = vmul.f32 %v2300_v2, %v1578_v1 }
 0x87c   : > { %v1581_v30 = vadd.f32 %v1580_v52, %v1579_v53 }
 0x87e   : > { %1582 = vst.msk [vmem:[#allocation2] sm:$0x3] %vm267_vm0, %v1581_v30  ;;  %1584 = vst.msk [vmem:[%s1583_s5] sm:$0x3] %vm267_vm0, %v1581_v30 }
 0x87f   : > { %2314 = shalt.err (!%p2311_p7)
}
 0x880   : > { %s2315_s22 = scalar_lea.hbm %s2782_s8, 256  ;;  %s2319_s23 = scalar_lea.hbm %s2839_s3, 512 }
 0x881   : > { %p2316_p8 = scmp.ne.s32.totalorder %s2782_s8, %s2315_s22  ;;  %p2320_p11 = scmp.lt.u32.totalorder %s2782_s8, %s2839_s3 }
 0x882   : > { %p2321_p12 = scmp.lt.u32.totalorder %s2319_s23, %s2315_s22  ;;  %p2323_p0 = scmp.lt.u32.totalorder %s2315_s22, %s2782_s8 }
 0x883   : > { %p2317_p9 = pnand %p2316_p8, %p2433_p5 }
 0x884   : > { %p2322_p13 = por %p2321_p12, %p2320_p11 }
 0x885   : > { %p2318_p10 = pneg %p2317_p9 }
 0x886   : > { %p2324_p1 = por %p2323_p0, %p2322_p13 }
 0x888   : > { %p2325_p2 = pnand %p2324_p1, %p2318_p10 }
 0x88a   : > { %2328 = shalt.err (!%p2325_p2)
}
 0x88b   : > { %s2368_s9 = smov 32   ;;  %s2369_s5 = smov 2   ;;  %v1585_v4 = vld [vmem:[#allocation2] sm:$0x3] }
 0x88c   : > { %2172 = dma.vmem_to_hbm [thread:$0]  (%p2433_p5), %s2784_s30, 256, %s2782_s8, %s2790_s19, %s2368_s9, %s2368_s9, %s2369_s5  }
 0x88d   : > { %s1804_s6 = sshll.u32 %s2527_s12, 1 }
 0x88e   : > { %s250_s10 = scalar_lea.vmem %s2840_s4, %s1804_s6 }
 0x88f   : > { %1586 = vst.msk [vmem:[%s250_s10] sm:$0x3] %vm267_vm0, %v1585_v4 }
 0x890 PF: > { %p2178_p3 = scmp.ge.s32.totalorder %s2363_s18, 2  ;;  %s1623_s11 = sand.u32 1, %s2351_s15  }
 0x891   : > { %s1624_s13 = scalar_lea.sflag [#allocation4], %s1623_s11 }
 0x892   : > { %p2175_p4 = pnand %p2178_p3, %p2437_p6 }
 0x894   : > { %2346 = dma.done.wait (!%p2175_p4), %s1624_s13, 256  }
 0x895   : > { %2348 = vsyncadd (!%p2175_p4), %s1624_s13, 4294967040  ;;  %p15_p5 = scmp.ge.s32.totalorder %s2420_s21, 4   ;;  %s2843_s15 = smov %s2355_s16 }
 0x896   : > { %s2844_s16 = smov %s2359_s17  ;;  %s2845_s17 = smov %s2431_s24 }
 0x897   : > { %s2846_s18 = smov %s2420_s21  ;;  %17 = sbr.rel (!%p15_p5) target bundleno = 3 (0x3), region = 119 }
 0x89e   :  { %1636 = vsyncpa [#allocation4], 1 }
 0x89f   :  { %1638 = vsyncpa [#allocation4 + $0x1], 1 }

</bundles_post_ra>
